<compile_context>
chip_gen: v5e
topology: v5e:2x2
jax: 0.10.0
libtpu: 0.0.40
codegen_flags: <defaults>
</compile_context>

<pallas_src>
import numpy as np
import jax
import jax.numpy as jnp
from jax.experimental import pallas as pl
from jax.experimental.pallas import tpu as pltpu


# ----------------------------- Pallas kernels ------------------------------

def _make_branch_kernel(img_w, hw):
    """Both 3x3 up-branch convs (as 3 row-shifted matmuls each) + BN partial
    sums, one batch image per grid step."""

    def kernel(xw2_ref, xw3_ref, w2_ref, w3_ref, y2_ref, y3_ref, st_ref):
        # xw*_ref: (1, (H+2)*W, 3*Cin)  bf16  width-tap slab, height-padded
        # w*_ref:  (3, 3*Cin, C)        bf16  one (3*Cin, C) matrix per dy
        # y*_ref:  (1, HW, C)           bf16  conv output
        # st_ref:  (1, 4, C)            f32   [sum2, sumsq2, sum3, sumsq3]
        def conv(xw_ref, w_ref):
            acc = jnp.dot(xw_ref[0, 0:hw, :], w_ref[0],
                          preferred_element_type=jnp.float32)
            for dy in (1, 2):
                acc = acc + jnp.dot(xw_ref[0, dy * img_w:dy * img_w + hw, :],
                                    w_ref[dy],
                                    preferred_element_type=jnp.float32)
            return acc                                      # (HW, C) f32

        acc2 = conv(xw2_ref, w2_ref)
        acc3 = conv(xw3_ref, w3_ref)
        y2_ref[0] = acc2.astype(jnp.bfloat16)
        y3_ref[0] = acc3.astype(jnp.bfloat16)
        # BN partial statistics (per image); combined across batch in JAX.
        st_ref[0, 0:1, :] = jnp.sum(acc2, axis=0, keepdims=True)
        st_ref[0, 1:2, :] = jnp.sum(acc2 * acc2, axis=0, keepdims=True)
        st_ref[0, 2:3, :] = jnp.sum(acc3, axis=0, keepdims=True)
        st_ref[0, 3:4, :] = jnp.sum(acc3 * acc3, axis=0, keepdims=True)

    return kernel


def _fuse_eca_kernel(x1_ref, y2_ref, y3_ref, vec_ref, wT_ref, o_ref):
    # x1_ref/y2_ref/y3_ref: (1, HW, C) bf16
    # vec_ref: (9, C) f32 rows = [bn2_scale, bn2_shift, bn3_scale, bn3_shift,
    #                             fusion_bias, eca_w0, eca_w1, eca_w2, gamma]
    #          (scalar rows are constant across lanes)
    # wT_ref:  (3C, C) bf16   fusion 1x1 conv weight, transposed
    # o_ref:   (1, HW, C) f32
    C = o_ref.shape[-1]
    f32 = jnp.float32
    vec = vec_ref[...]

    # BN affine + ReLU for both up-branches (f32 epilogue math).
    a2 = jnp.maximum(y2_ref[0].astype(f32) * vec[0:1] + vec[1:2], 0.0)
    a3 = jnp.maximum(y3_ref[0].astype(f32) * vec[2:3] + vec[3:4], 0.0)

    # 1x1 fusion conv over cat([x1, a2, a3], ch) -> 3 accumulated bf16 matmuls.
    x4 = jnp.dot(x1_ref[0], wT_ref[0:C, :], preferred_element_type=f32)
    x4 = x4 + jnp.dot(a2.astype(jnp.bfloat16), wT_ref[C:2 * C, :],
                      preferred_element_type=f32)
    x4 = x4 + jnp.dot(a3.astype(jnp.bfloat16), wT_ref[2 * C:3 * C, :],
                      preferred_element_type=f32)
    x4 = x4 + vec[4:5]                                       # fusion bias

    # ECA: spatial max -> conv1d(k=3, zero pad) -> sigmoid gate.
    m = jnp.max(x4, axis=0, keepdims=True)                   # (1, C)
    ii = jax.lax.broadcasted_iota(jnp.int32, (C, C), 0)
    jj = jax.lax.broadcasted_iota(jnp.int32, (C, C), 1)
    band = ((ii == jj - 1).astype(f32) * vec[5:6]            # built in VMEM,
            + (ii == jj).astype(f32) * vec[6:7]              # no HBM stream
            + (ii == jj + 1).astype(f32) * vec[7:8])         # (C, C)
    g = jnp.dot(m, band, preferred_element_type=f32)         # (1, C)
    # gamma * (x4 * sig) + x4  ==  x4 * (1 + gamma * sig)    (single FMA)
    gate = 1.0 + vec[8:9] * jax.nn.sigmoid(g)
    o_ref[0] = x4 * gate


# ----------------------------- Pallas wrappers ------------------------------

def branch_conv_pallas(xw2, xw3, w2f, w3f, *, img_w, hw):
    n, rows, K2 = xw2.shape
    K3 = xw3.shape[-1]
    C = w2f.shape[-1]
    return pl.pallas_call(
        _make_branch_kernel(img_w, hw),
        out_shape=(jax.ShapeDtypeStruct((n, hw, C), jnp.bfloat16),
                   jax.ShapeDtypeStruct((n, hw, C), jnp.bfloat16),
                   jax.ShapeDtypeStruct((n, 4, C), jnp.float32)),
        grid=(n,),
        in_specs=[
            pl.BlockSpec((1, rows, K2), lambda b: (b, 0, 0)),
            pl.BlockSpec((1, rows, K3), lambda b: (b, 0, 0)),
            pl.BlockSpec((3, K2, C), lambda b: (0, 0, 0)),
            pl.BlockSpec((3, K3, C), lambda b: (0, 0, 0)),
        ],
        out_specs=(
            pl.BlockSpec((1, hw, C), lambda b: (b, 0, 0)),
            pl.BlockSpec((1, hw, C), lambda b: (b, 0, 0)),
            pl.BlockSpec((1, 4, C), lambda b: (b, 0, 0)),
        ),
        compiler_params=pltpu.CompilerParams(
            dimension_semantics=("parallel",)),
    )(xw2, xw3, w2f, w3f)


def fuse_eca_pallas(x1_nhwc, y2, y3, vecs, wT):
    n, hw, C = x1_nhwc.shape
    return pl.pallas_call(
        _fuse_eca_kernel,
        out_shape=jax.ShapeDtypeStruct((n, hw, C), jnp.float32),
        grid=(n,),
        in_specs=[
            pl.BlockSpec((1, hw, C), lambda b: (b, 0, 0)),
            pl.BlockSpec((1, hw, C), lambda b: (b, 0, 0)),
            pl.BlockSpec((1, hw, C), lambda b: (b, 0, 0)),
            pl.BlockSpec((9, C), lambda b: (0, 0)),
            pl.BlockSpec((3 * C, C), lambda b: (0, 0)),
        ],
        out_specs=pl.BlockSpec((1, hw, C), lambda b: (b, 0, 0)),
        compiler_params=pltpu.CompilerParams(
            dimension_semantics=("parallel",)),
    )(x1_nhwc, y2, y3, vecs, wT)


# ------------------------------- JAX glue -----------------------------------

def upsample_nearest_nchw(x, s):
    # nn.Upsample(scale_factor=s, mode='nearest'): out[i, j] = in[i // s, j // s]
    return jnp.repeat(jnp.repeat(x, s, axis=2), s, axis=3)


def width_tap_slab(x_nchw, s):
    """Nearest-upsample by s, pad by 1, and build the width-tap slab
    (n, (H+2)*W, 3*Cin) in bf16.  Vertical taps are handled in-kernel as
    static row-offset slices, so the slab is only 3x (not 9x) the image."""
    n, Cin, h, w = x_nchw.shape
    H, W = h * s, w * s
    x = jnp.transpose(x_nchw, (0, 2, 3, 1))                      # NHWC
    x = jnp.repeat(jnp.repeat(x, s, axis=1), s, axis=2)          # (n,H,W,Cin)
    xp = jnp.pad(x, ((0, 0), (1, 1), (1, 1), (0, 0)))            # (n,H+2,W+2,Cin)
    taps = [xp[:, :, dx:dx + W, :] for dx in range(3)]           # (n,H+2,W,Cin)
    xw = jnp.concatenate(taps, axis=-1)                          # (n,H+2,W,3Cin)
    return xw.reshape(n, (H + 2) * W, 3 * Cin).astype(jnp.bfloat16)


def conv3x3_weight_rows(w):
    # (Cout, Cin, 3, 3) -> (3, 3*Cin, Cout): [dy, dx*Cin + c, o] = w[o, c, dy, dx]
    Cout, Cin = w.shape[0], w.shape[1]
    return jnp.transpose(w, (2, 3, 1, 0)).reshape(3, 3 * Cin, Cout).astype(jnp.bfloat16)


@jax.jit
def apf_forward(x1, x2, x3, params):
    n, C, H, W = x1.shape
    HW = H * W

    # --- branch inputs: bf16 width-tap slabs + per-dy weight matrices ---
    xw2 = width_tap_slab(x2, 2)                           # (n, (H+2)*W, 3*Cin2)
    xw3 = width_tap_slab(x3, 4)                           # (n, (H+2)*W, 3*Cin3)
    w2f = conv3x3_weight_rows(params['up2_w'])
    w3f = conv3x3_weight_rows(params['up3_w'])

    # --- kernel 1: both 3x3 convs + BN partial sums (single pallas_call) ---
    y2, y3, stats = branch_conv_pallas(xw2, xw3, w2f, w3f, img_w=W, hw=HW)

    # --- BN scale/shift from kernel-emitted partial sums (tiny, f32) ---
    cnt = float(n * HW)
    s = jnp.sum(stats, axis=0)                            # (4, C)
    mean2 = s[0] / cnt
    var2 = jnp.maximum(s[1] / cnt - mean2 * mean2, 0.0)   # biased (train-mode BN)
    mean3 = s[2] / cnt
    var3 = jnp.maximum(s[3] / cnt - mean3 * mean3, 0.0)
    sc2 = params['bn2_w'] / jnp.sqrt(var2 + 1e-5)
    sh2 = params['bn2_b'] - mean2 * sc2
    sc3 = params['bn3_w'] / jnp.sqrt(var3 + 1e-5)
    sh3 = params['bn3_b'] - mean3 * sc3

    vecs = jnp.concatenate([
        jnp.stack([sc2, sh2, sc3, sh3, params['fusion_b']], axis=0),   # (5, C)
        jnp.broadcast_to(params['eca_w'][:, None], (3, C)),            # (3, C)
        jnp.broadcast_to(params['gamma'][:, None], (1, C)),            # (1, C)
    ], axis=0).astype(jnp.float32)                                     # (9, C)

    # --- kernel 2: BN+ReLU, 1x1 fusion conv, ECA gate, gamma residual ---
    # (module interface is NCHW; the two layout transposes stay in the wrapper)
    x1b = jnp.transpose(x1, (0, 2, 3, 1)).reshape(n, HW, C).astype(jnp.bfloat16)
    wT = jnp.transpose(params['fusion_w'], (1, 0)).astype(jnp.bfloat16)  # (3C, C)
    out = fuse_eca_pallas(x1b, y2, y3, vecs, wT)                         # (n,HW,C)
    return jnp.transpose(out.reshape(n, H, W, C), (0, 3, 1, 2))          # NCHW


# -------------------------- pure-JAX reference ------------------------------

def apf_reference(x1, x2, x3, params):
    def up_branch(x, s, w, bnw, bnb):
        xu = upsample_nearest_nchw(x, s)
        y = jax.lax.conv_general_dilated(
            xu, w, (1, 1), 'SAME',
            dimension_numbers=('NCHW', 'OIHW', 'NCHW'), precision='highest')
        mean = y.mean(axis=(0, 2, 3))
        var = y.var(axis=(0, 2, 3))                               # biased var
        yhat = ((y - mean[None, :, None, None]) /
                jnp.sqrt(var + 1e-5)[None, :, None, None])
        yhat = yhat * bnw[None, :, None, None] + bnb[None, :, None, None]
        return jnp.maximum(yhat, 0.0)

    a2 = up_branch(x2, 2, params['up2_w'], params['bn2_w'], params['bn2_b'])
    a3 = up_branch(x3, 4, params['up3_w'], params['bn3_w'], params['bn3_b'])
    cat = jnp.concatenate([x1, a2, a3], axis=1)
    x4 = (jnp.einsum('oc,nchw->nohw', params['fusion_w'], cat,
                     precision='highest')
          + params['fusion_b'][None, :, None, None])
    # eca: AdaptiveMaxPool2d(1) -> Conv1d(k=3, pad=1, no bias) -> sigmoid gate
    m = jnp.max(x4, axis=(2, 3))                                  # (n, C)
    mp = jnp.pad(m, ((0, 0), (1, 1)))
    g = (params['eca_w'][0] * mp[:, :-2]
         + params['eca_w'][1] * mp[:, 1:-1]
         + params['eca_w'][2] * mp[:, 2:])
    gate = jax.nn.sigmoid(g)[:, :, None, None]
    out = x4 * gate
    return params['gamma'][0] * out + x4


# ------------------------------ parameters ----------------------------------

def init_params(key, out_ch, in_ch2, in_ch3):
    ks = jax.random.split(key, 10)
    sc = 0.1
    return {
        'up2_w': sc * jax.random.normal(ks[0], (out_ch, in_ch2, 3, 3), jnp.float32),
        'up3_w': sc * jax.random.normal(ks[1], (out_ch, in_ch3, 3, 3), jnp.float32),
        'bn2_w': 1.0 + sc * jax.random.normal(ks[2], (out_ch,), jnp.float32),
        'bn2_b': sc * jax.random.normal(ks[3], (out_ch,), jnp.float32),
        'bn3_w': 1.0 + sc * jax.random.normal(ks[4], (out_ch,), jnp.float32),
        'bn3_b': sc * jax.random.normal(ks[5], (out_ch,), jnp.float32),
        'fusion_w': sc * jax.random.normal(ks[6], (out_ch, 3 * out_ch), jnp.float32),
        'fusion_b': sc * jax.random.normal(ks[7], (out_ch,), jnp.float32),
        'eca_w': jax.random.normal(ks[8], (3,), jnp.float32),
        # PyTorch initializes gamma = 0 (output would equal x4 exactly);
        # use a nonzero value so the full eca/gamma path is exercised.
        'gamma': jnp.asarray([0.5], jnp.float32),
    }


# --------------------------------- main --------------------------------------

if __name__ == "__main__":
    # APF(in_ch1=128, in_ch2=96, in_ch3=64, out_ch=128); x1 NCHW at full res,
    # x2 at 1/2 res, x3 at 1/4 res (as the 2x / 4x upsamples imply).
    n, out_ch, H, W = 2, 128, 16, 16
    in_ch1, in_ch2, in_ch3 = out_ch, 96, 64

    key = jax.random.PRNGKey(0)
    k1, k2, k3, kp = jax.random.split(key, 4)
    x1 = jax.random.normal(k1, (n, in_ch1, H, W), jnp.float32)
    x2 = jax.random.normal(k2, (n, in_ch2, H // 2, W // 2), jnp.float32)
    x3 = jax.random.normal(k3, (n, in_ch3, H // 4, W // 4), jnp.float32)
    params = init_params(kp, out_ch, in_ch2, in_ch3)

    out = jax.block_until_ready(apf_forward(x1, x2, x3, params))
    ref = jax.block_until_ready(apf_reference(x1, x2, x3, params))

    assert out.shape == (n, out_ch, H, W)
    # bf16 MXU operands through two chained convs: worst-case abs error is a
    # few 1e-2; require a loose elementwise bound plus a tight mean bound.
    o = np.asarray(out)
    r = np.asarray(ref)
    diff = np.abs(o - r)
    if not (np.allclose(o, r, rtol=5e-2, atol=5e-2) and float(diff.mean()) < 1.5e-2):
        raise AssertionError(
            f"Pallas output mismatch vs reference: max abs err={float(diff.max())}, "
            f"mean abs err={float(diff.mean())}")

    print("KERNEL_OK")
</pallas_src>

<mosaic_0001>
module attributes {stable_mosaic.version = 11 : i64} {
  func.func @kernel(%arg0: i32, %arg1: memref<1x288x288xbf16, #tpu.memory_space<vmem>>, %arg2: memref<1x288x192xbf16, #tpu.memory_space<vmem>>, %arg3: memref<3x288x128xbf16, #tpu.memory_space<vmem>>, %arg4: memref<3x192x128xbf16, #tpu.memory_space<vmem>>, %arg5: memref<1x256x128xbf16, #tpu.memory_space<vmem>>, %arg6: memref<1x256x128xbf16, #tpu.memory_space<vmem>>, %arg7: memref<1x4x128xf32, #tpu.memory_space<vmem>>) attributes {dimension_semantics = [#tpu.dimension_semantics<parallel>], iteration_bounds = array<i64: 2>, scalar_prefetch = 0 : i64, scratch_operands = 0 : i64, tpu.core_type = #tpu.core_type<tc>, window_params = [{transform_indices = @transform_0, window_bounds = array<i64: 1, 288, 288>}, {transform_indices = @transform_1, window_bounds = array<i64: 1, 288, 192>}, {pipeline_mode = #tpu.pipeline_mode<synchronous>, transform_indices = @transform_2, window_bounds = array<i64: 3, 288, 128>}, {pipeline_mode = #tpu.pipeline_mode<synchronous>, transform_indices = @transform_3, window_bounds = array<i64: 3, 192, 128>}, {transform_indices = @transform_4, window_bounds = array<i64: 1, 256, 128>}, {transform_indices = @transform_5, window_bounds = array<i64: 1, 256, 128>}, {transform_indices = @transform_6, window_bounds = array<i64: 1, 4, 128>}]} {
    %c0 = arith.constant 0 : index
    %c0_0 = arith.constant 0 : index
    %c0_1 = arith.constant 0 : index
    %0 = vector.load %arg1[%c0, %c0_0, %c0_1] : memref<1x288x288xbf16, #tpu.memory_space<vmem>>, vector<1x256x288xbf16>
    %1 = vector.shape_cast %0 : vector<1x256x288xbf16> to vector<256x288xbf16>
    %c0_2 = arith.constant 0 : index
    %c0_3 = arith.constant 0 : index
    %c0_4 = arith.constant 0 : index
    %2 = vector.load %arg3[%c0_2, %c0_3, %c0_4] : memref<3x288x128xbf16, #tpu.memory_space<vmem>>, vector<1x288x128xbf16>
    %3 = vector.shape_cast %2 : vector<1x288x128xbf16> to vector<288x128xbf16>
    %cst = arith.constant dense<0.000000e+00> : vector<256x128xf32>
    %4 = tpu.matmul %1, %3, %cst {dimension_numbers = #tpu.dot_dimension_numbers<[1], [0], [0], [1], [0, 0, 1, 1], [], []>} : vector<256x288xbf16>, vector<288x128xbf16>, vector<256x128xf32> -> vector<256x128xf32>
    %c0_5 = arith.constant 0 : index
    %c16 = arith.constant 16 : index
    %c0_6 = arith.constant 0 : index
    %5 = vector.load %arg1[%c0_5, %c16, %c0_6] : memref<1x288x288xbf16, #tpu.memory_space<vmem>>, vector<1x256x288xbf16>
    %6 = vector.shape_cast %5 : vector<1x256x288xbf16> to vector<256x288xbf16>
    %c1 = arith.constant 1 : index
    %c0_7 = arith.constant 0 : index
    %c0_8 = arith.constant 0 : index
    %7 = vector.load %arg3[%c1, %c0_7, %c0_8] : memref<3x288x128xbf16, #tpu.memory_space<vmem>>, vector<1x288x128xbf16>
    %8 = vector.shape_cast %7 : vector<1x288x128xbf16> to vector<288x128xbf16>
    %cst_9 = arith.constant dense<0.000000e+00> : vector<256x128xf32>
    %9 = tpu.matmul %6, %8, %cst_9 {dimension_numbers = #tpu.dot_dimension_numbers<[1], [0], [0], [1], [0, 0, 1, 1], [], []>} : vector<256x288xbf16>, vector<288x128xbf16>, vector<256x128xf32> -> vector<256x128xf32>
    %10 = arith.addf %4, %9 : vector<256x128xf32>
    %c0_10 = arith.constant 0 : index
    %c32 = arith.constant 32 : index
    %c0_11 = arith.constant 0 : index
    %11 = vector.load %arg1[%c0_10, %c32, %c0_11] : memref<1x288x288xbf16, #tpu.memory_space<vmem>>, vector<1x256x288xbf16>
    %12 = vector.shape_cast %11 : vector<1x256x288xbf16> to vector<256x288xbf16>
    %c2 = arith.constant 2 : index
    %c0_12 = arith.constant 0 : index
    %c0_13 = arith.constant 0 : index
    %13 = vector.load %arg3[%c2, %c0_12, %c0_13] : memref<3x288x128xbf16, #tpu.memory_space<vmem>>, vector<1x288x128xbf16>
    %14 = vector.shape_cast %13 : vector<1x288x128xbf16> to vector<288x128xbf16>
    %cst_14 = arith.constant dense<0.000000e+00> : vector<256x128xf32>
    %15 = tpu.matmul %12, %14, %cst_14 {dimension_numbers = #tpu.dot_dimension_numbers<[1], [0], [0], [1], [0, 0, 1, 1], [], []>} : vector<256x288xbf16>, vector<288x128xbf16>, vector<256x128xf32> -> vector<256x128xf32>
    %16 = arith.addf %10, %15 : vector<256x128xf32>
    %c0_15 = arith.constant 0 : index
    %c0_16 = arith.constant 0 : index
    %c0_17 = arith.constant 0 : index
    %17 = vector.load %arg2[%c0_15, %c0_16, %c0_17] : memref<1x288x192xbf16, #tpu.memory_space<vmem>>, vector<1x256x192xbf16>
    %18 = vector.shape_cast %17 : vector<1x256x192xbf16> to vector<256x192xbf16>
    %c0_18 = arith.constant 0 : index
    %c0_19 = arith.constant 0 : index
    %c0_20 = arith.constant 0 : index
    %19 = vector.load %arg4[%c0_18, %c0_19, %c0_20] : memref<3x192x128xbf16, #tpu.memory_space<vmem>>, vector<1x192x128xbf16>
    %20 = vector.shape_cast %19 : vector<1x192x128xbf16> to vector<192x128xbf16>
    %cst_21 = arith.constant dense<0.000000e+00> : vector<256x128xf32>
    %21 = tpu.matmul %18, %20, %cst_21 {dimension_numbers = #tpu.dot_dimension_numbers<[1], [0], [0], [1], [0, 0, 1, 1], [], []>} : vector<256x192xbf16>, vector<192x128xbf16>, vector<256x128xf32> -> vector<256x128xf32>
    %c0_22 = arith.constant 0 : index
    %c16_23 = arith.constant 16 : index
    %c0_24 = arith.constant 0 : index
    %22 = vector.load %arg2[%c0_22, %c16_23, %c0_24] : memref<1x288x192xbf16, #tpu.memory_space<vmem>>, vector<1x256x192xbf16>
    %23 = vector.shape_cast %22 : vector<1x256x192xbf16> to vector<256x192xbf16>
    %c1_25 = arith.constant 1 : index
    %c0_26 = arith.constant 0 : index
    %c0_27 = arith.constant 0 : index
    %24 = vector.load %arg4[%c1_25, %c0_26, %c0_27] : memref<3x192x128xbf16, #tpu.memory_space<vmem>>, vector<1x192x128xbf16>
    %25 = vector.shape_cast %24 : vector<1x192x128xbf16> to vector<192x128xbf16>
    %cst_28 = arith.constant dense<0.000000e+00> : vector<256x128xf32>
    %26 = tpu.matmul %23, %25, %cst_28 {dimension_numbers = #tpu.dot_dimension_numbers<[1], [0], [0], [1], [0, 0, 1, 1], [], []>} : vector<256x192xbf16>, vector<192x128xbf16>, vector<256x128xf32> -> vector<256x128xf32>
    %27 = arith.addf %21, %26 : vector<256x128xf32>
    %c0_29 = arith.constant 0 : index
    %c32_30 = arith.constant 32 : index
    %c0_31 = arith.constant 0 : index
    %28 = vector.load %arg2[%c0_29, %c32_30, %c0_31] : memref<1x288x192xbf16, #tpu.memory_space<vmem>>, vector<1x256x192xbf16>
    %29 = vector.shape_cast %28 : vector<1x256x192xbf16> to vector<256x192xbf16>
    %c2_32 = arith.constant 2 : index
    %c0_33 = arith.constant 0 : index
    %c0_34 = arith.constant 0 : index
    %30 = vector.load %arg4[%c2_32, %c0_33, %c0_34] : memref<3x192x128xbf16, #tpu.memory_space<vmem>>, vector<1x192x128xbf16>
    %31 = vector.shape_cast %30 : vector<1x192x128xbf16> to vector<192x128xbf16>
    %cst_35 = arith.constant dense<0.000000e+00> : vector<256x128xf32>
    %32 = tpu.matmul %29, %31, %cst_35 {dimension_numbers = #tpu.dot_dimension_numbers<[1], [0], [0], [1], [0, 0, 1, 1], [], []>} : vector<256x192xbf16>, vector<192x128xbf16>, vector<256x128xf32> -> vector<256x128xf32>
    %33 = arith.addf %27, %32 : vector<256x128xf32>
    %34 = arith.truncf %16 : vector<256x128xf32> to vector<256x128xbf16>
    %c0_36 = arith.constant 0 : index
    %c0_37 = arith.constant 0 : index
    %c0_38 = arith.constant 0 : index
    %35 = vector.load %arg5[%c0_36, %c0_37, %c0_38] : memref<1x256x128xbf16, #tpu.memory_space<vmem>>, vector<1x256x128xbf16>
    %36 = vector.shape_cast %35 : vector<1x256x128xbf16> to vector<256x128xbf16>
    %37 = vector.shape_cast %34 : vector<256x128xbf16> to vector<1x256x128xbf16>
    tpu.vector_store %arg5[%c0_36, %c0_37, %c0_38], %37 {strides = array<i32>} : memref<1x256x128xbf16, #tpu.memory_space<vmem>>, vector<1x256x128xbf16>,
    %38 = arith.truncf %33 : vector<256x128xf32> to vector<256x128xbf16>
    %c0_39 = arith.constant 0 : index
    %c0_40 = arith.constant 0 : index
    %c0_41 = arith.constant 0 : index
    %39 = vector.load %arg6[%c0_39, %c0_40, %c0_41] : memref<1x256x128xbf16, #tpu.memory_space<vmem>>, vector<1x256x128xbf16>
    %40 = vector.shape_cast %39 : vector<1x256x128xbf16> to vector<256x128xbf16>
    %41 = vector.shape_cast %38 : vector<256x128xbf16> to vector<1x256x128xbf16>
    tpu.vector_store %arg6[%c0_39, %c0_40, %c0_41], %41 {strides = array<i32>} : memref<1x256x128xbf16, #tpu.memory_space<vmem>>, vector<1x256x128xbf16>,
    %cst_42 = arith.constant dense<0.000000e+00> : vector<128xf32>
    %42 = vector.multi_reduction <add>, %16, %cst_42 [0] : vector<256x128xf32> to vector<128xf32>
    %43 = vector.shape_cast %42 : vector<128xf32> to vector<1x128xf32>
    %c0_43 = arith.constant 0 : index
    %c0_44 = arith.constant 0 : index
    %c0_45 = arith.constant 0 : index
    %44 = vector.load %arg7[%c0_43, %c0_44, %c0_45] : memref<1x4x128xf32, #tpu.memory_space<vmem>>, vector<1x1x128xf32>
    %45 = vector.shape_cast %44 : vector<1x1x128xf32> to vector<1x128xf32>
    %46 = vector.shape_cast %43 : vector<1x128xf32> to vector<1x1x128xf32>
    tpu.vector_store %arg7[%c0_43, %c0_44, %c0_45], %46 {strides = array<i32>} : memref<1x4x128xf32, #tpu.memory_space<vmem>>, vector<1x1x128xf32>,
    %47 = arith.mulf %16, %16 : vector<256x128xf32>
    %cst_46 = arith.constant dense<0.000000e+00> : vector<128xf32>
    %48 = vector.multi_reduction <add>, %47, %cst_46 [0] : vector<256x128xf32> to vector<128xf32>
    %49 = vector.shape_cast %48 : vector<128xf32> to vector<1x128xf32>
    %c0_47 = arith.constant 0 : index
    %c1_48 = arith.constant 1 : index
    %c0_49 = arith.constant 0 : index
    %50 = vector.load %arg7[%c0_47, %c1_48, %c0_49] : memref<1x4x128xf32, #tpu.memory_space<vmem>>, vector<1x1x128xf32>
    %51 = vector.shape_cast %50 : vector<1x1x128xf32> to vector<1x128xf32>
    %52 = vector.shape_cast %49 : vector<1x128xf32> to vector<1x1x128xf32>
    tpu.vector_store %arg7[%c0_47, %c1_48, %c0_49], %52 {strides = array<i32>} : memref<1x4x128xf32, #tpu.memory_space<vmem>>, vector<1x1x128xf32>,
    %cst_50 = arith.constant dense<0.000000e+00> : vector<128xf32>
    %53 = vector.multi_reduction <add>, %33, %cst_50 [0] : vector<256x128xf32> to vector<128xf32>
    %54 = vector.shape_cast %53 : vector<128xf32> to vector<1x128xf32>
    %c0_51 = arith.constant 0 : index
    %c2_52 = arith.constant 2 : index
    %c0_53 = arith.constant 0 : index
    %55 = vector.load %arg7[%c0_51, %c2_52, %c0_53] : memref<1x4x128xf32, #tpu.memory_space<vmem>>, vector<1x1x128xf32>
    %56 = vector.shape_cast %55 : vector<1x1x128xf32> to vector<1x128xf32>
    %57 = vector.shape_cast %54 : vector<1x128xf32> to vector<1x1x128xf32>
    tpu.vector_store %arg7[%c0_51, %c2_52, %c0_53], %57 {strides = array<i32>} : memref<1x4x128xf32, #tpu.memory_space<vmem>>, vector<1x1x128xf32>,
    %58 = arith.mulf %33, %33 : vector<256x128xf32>
    %cst_54 = arith.constant dense<0.000000e+00> : vector<128xf32>
    %59 = vector.multi_reduction <add>, %58, %cst_54 [0] : vector<256x128xf32> to vector<128xf32>
    %60 = vector.shape_cast %59 : vector<128xf32> to vector<1x128xf32>
    %c0_55 = arith.constant 0 : index
    %c3 = arith.constant 3 : index
    %c0_56 = arith.constant 0 : index
    %61 = vector.load %arg7[%c0_55, %c3, %c0_56] : memref<1x4x128xf32, #tpu.memory_space<vmem>>, vector<1x1x128xf32>
    %62 = vector.shape_cast %61 : vector<1x1x128xf32> to vector<1x128xf32>
    %63 = vector.shape_cast %60 : vector<1x128xf32> to vector<1x1x128xf32>
    tpu.vector_store %arg7[%c0_55, %c3, %c0_56], %63 {strides = array<i32>} : memref<1x4x128xf32, #tpu.memory_space<vmem>>, vector<1x1x128xf32>,
    return
  }
  func.func @transform_0(%arg0: i32) -> (i32, i32, i32) {
    %c0_i32 = arith.constant 0 : i32
    %c0_i32_0 = arith.constant 0 : i32
    %c0_i32_1 = arith.constant 0 : i32
    return %arg0, %c0_i32, %c0_i32_0 : i32, i32, i32
  }
  func.func @transform_1(%arg0: i32) -> (i32, i32, i32) {
    %c0_i32 = arith.constant 0 : i32
    %c0_i32_0 = arith.constant 0 : i32
    %c0_i32_1 = arith.constant 0 : i32
    return %arg0, %c0_i32, %c0_i32_0 : i32, i32, i32
  }
  func.func @transform_2(%arg0: i32) -> (i32, i32, i32) {
    %c0_i32 = arith.constant 0 : i32
    %c0_i32_0 = arith.constant 0 : i32
    %c0_i32_1 = arith.constant 0 : i32
    %c0_i32_2 = arith.constant 0 : i32
    return %c0_i32, %c0_i32_0, %c0_i32_1 : i32, i32, i32
  }
  func.func @transform_3(%arg0: i32) -> (i32, i32, i32) {
    %c0_i32 = arith.constant 0 : i32
    %c0_i32_0 = arith.constant 0 : i32
    %c0_i32_1 = arith.constant 0 : i32
    %c0_i32_2 = arith.constant 0 : i32
    return %c0_i32, %c0_i32_0, %c0_i32_1 : i32, i32, i32
  }
  func.func @transform_4(%arg0: i32) -> (i32, i32, i32) {
    %c0_i32 = arith.constant 0 : i32
    %c0_i32_0 = arith.constant 0 : i32
    %c0_i32_1 = arith.constant 0 : i32
    return %arg0, %c0_i32, %c0_i32_0 : i32, i32, i32
  }
  func.func @transform_5(%arg0: i32) -> (i32, i32, i32) {
    %c0_i32 = arith.constant 0 : i32
    %c0_i32_0 = arith.constant 0 : i32
    %c0_i32_1 = arith.constant 0 : i32
    return %arg0, %c0_i32, %c0_i32_0 : i32, i32, i32
  }
  func.func @transform_6(%arg0: i32) -> (i32, i32, i32) {
    %c0_i32 = arith.constant 0 : i32
    %c0_i32_0 = arith.constant 0 : i32
    %c0_i32_1 = arith.constant 0 : i32
    return %arg0, %c0_i32, %c0_i32_0 : i32, i32, i32
  }
}

module attributes {stable_mosaic.version = 11 : i64} {
  func.func @_fuse_eca_kernel(%arg0: i32, %arg1: memref<1x256x128xbf16, #tpu.memory_space<vmem>>, %arg2: memref<1x256x128xbf16, #tpu.memory_space<vmem>>, %arg3: memref<1x256x128xbf16, #tpu.memory_space<vmem>>, %arg4: memref<9x128xf32, #tpu.memory_space<vmem>>, %arg5: memref<384x128xbf16, #tpu.memory_space<vmem>>, %arg6: memref<1x256x128xf32, #tpu.memory_space<vmem>>) attributes {dimension_semantics = [#tpu.dimension_semantics<parallel>], iteration_bounds = array<i64: 2>, scalar_prefetch = 0 : i64, scratch_operands = 0 : i64, tpu.core_type = #tpu.core_type<tc>, window_params = [{transform_indices = @transform_0, window_bounds = array<i64: 1, 256, 128>}, {transform_indices = @transform_1, window_bounds = array<i64: 1, 256, 128>}, {transform_indices = @transform_2, window_bounds = array<i64: 1, 256, 128>}, {pipeline_mode = #tpu.pipeline_mode<synchronous>, transform_indices = @transform_3, window_bounds = array<i64: 9, 128>}, {pipeline_mode = #tpu.pipeline_mode<synchronous>, transform_indices = @transform_4, window_bounds = array<i64: 384, 128>}, {transform_indices = @transform_5, window_bounds = array<i64: 1, 256, 128>}]} {
    %c0 = arith.constant 0 : index
    %c0_0 = arith.constant 0 : index
    %0 = vector.load %arg4[%c0, %c0_0] : memref<9x128xf32, #tpu.memory_space<vmem>>, vector<9x128xf32>
    %c0_1 = arith.constant 0 : index
    %c0_2 = arith.constant 0 : index
    %c0_3 = arith.constant 0 : index
    %1 = vector.load %arg2[%c0_1, %c0_2, %c0_3] : memref<1x256x128xbf16, #tpu.memory_space<vmem>>, vector<1x256x128xbf16>
    %2 = vector.shape_cast %1 : vector<1x256x128xbf16> to vector<256x128xbf16>
    %3 = arith.extf %2 : vector<256x128xbf16> to vector<256x128xf32>
    %4 = vector.extract_strided_slice %0 {offsets = [0, 0], sizes = [1, 128], strides = [1, 1]} : vector<9x128xf32> to vector<1x128xf32>
    %5 = vector.broadcast %4 : vector<1x128xf32> to vector<256x128xf32>
    %6 = arith.mulf %3, %5 : vector<256x128xf32>
    %7 = vector.extract_strided_slice %0 {offsets = [1, 0], sizes = [1, 128], strides = [1, 1]} : vector<9x128xf32> to vector<1x128xf32>
    %8 = vector.broadcast %7 : vector<1x128xf32> to vector<256x128xf32>
    %9 = arith.addf %6, %8 : vector<256x128xf32>
    %cst = arith.constant 0.000000e+00 : f32
    %10 = vector.broadcast %cst : f32 to vector<256x128xf32>
    %11 = arith.maximumf %9, %10 : vector<256x128xf32>
    %c0_4 = arith.constant 0 : index
    %c0_5 = arith.constant 0 : index
    %c0_6 = arith.constant 0 : index
    %12 = vector.load %arg3[%c0_4, %c0_5, %c0_6] : memref<1x256x128xbf16, #tpu.memory_space<vmem>>, vector<1x256x128xbf16>
    %13 = vector.shape_cast %12 : vector<1x256x128xbf16> to vector<256x128xbf16>
    %14 = arith.extf %13 : vector<256x128xbf16> to vector<256x128xf32>
    %15 = vector.extract_strided_slice %0 {offsets = [2, 0], sizes = [1, 128], strides = [1, 1]} : vector<9x128xf32> to vector<1x128xf32>
    %16 = vector.broadcast %15 : vector<1x128xf32> to vector<256x128xf32>
    %17 = arith.mulf %14, %16 : vector<256x128xf32>
    %18 = vector.extract_strided_slice %0 {offsets = [3, 0], sizes = [1, 128], strides = [1, 1]} : vector<9x128xf32> to vector<1x128xf32>
    %19 = vector.broadcast %18 : vector<1x128xf32> to vector<256x128xf32>
    %20 = arith.addf %17, %19 : vector<256x128xf32>
    %cst_7 = arith.constant 0.000000e+00 : f32
    %21 = vector.broadcast %cst_7 : f32 to vector<256x128xf32>
    %22 = arith.maximumf %20, %21 : vector<256x128xf32>
    %c0_8 = arith.constant 0 : index
    %c0_9 = arith.constant 0 : index
    %c0_10 = arith.constant 0 : index
    %23 = vector.load %arg1[%c0_8, %c0_9, %c0_10] : memref<1x256x128xbf16, #tpu.memory_space<vmem>>, vector<1x256x128xbf16>
    %24 = vector.shape_cast %23 : vector<1x256x128xbf16> to vector<256x128xbf16>
    %c0_11 = arith.constant 0 : index
    %c0_12 = arith.constant 0 : index
    %25 = vector.load %arg5[%c0_11, %c0_12] : memref<384x128xbf16, #tpu.memory_space<vmem>>, vector<128x128xbf16>
    %cst_13 = arith.constant dense<0.000000e+00> : vector<256x128xf32>
    %26 = tpu.matmul %24, %25, %cst_13 {dimension_numbers = #tpu.dot_dimension_numbers<[1], [0], [0], [1], [0, 0, 1, 1], [], []>} : vector<256x128xbf16>, vector<128x128xbf16>, vector<256x128xf32> -> vector<256x128xf32>
    %27 = arith.truncf %11 : vector<256x128xf32> to vector<256x128xbf16>
    %c128 = arith.constant 128 : index
    %c0_14 = arith.constant 0 : index
    %28 = vector.load %arg5[%c128, %c0_14] : memref<384x128xbf16, #tpu.memory_space<vmem>>, vector<128x128xbf16>
    %cst_15 = arith.constant dense<0.000000e+00> : vector<256x128xf32>
    %29 = tpu.matmul %27, %28, %cst_15 {dimension_numbers = #tpu.dot_dimension_numbers<[1], [0], [0], [1], [0, 0, 1, 1], [], []>} : vector<256x128xbf16>, vector<128x128xbf16>, vector<256x128xf32> -> vector<256x128xf32>
    %30 = arith.addf %26, %29 : vector<256x128xf32>
    %31 = arith.truncf %22 : vector<256x128xf32> to vector<256x128xbf16>
    %c256 = arith.constant 256 : index
    %c0_16 = arith.constant 0 : index
    %32 = vector.load %arg5[%c256, %c0_16] : memref<384x128xbf16, #tpu.memory_space<vmem>>, vector<128x128xbf16>
    %cst_17 = arith.constant dense<0.000000e+00> : vector<256x128xf32>
    %33 = tpu.matmul %31, %32, %cst_17 {dimension_numbers = #tpu.dot_dimension_numbers<[1], [0], [0], [1], [0, 0, 1, 1], [], []>} : vector<256x128xbf16>, vector<128x128xbf16>, vector<256x128xf32> -> vector<256x128xf32>
    %34 = arith.addf %30, %33 : vector<256x128xf32>
    %35 = vector.extract_strided_slice %0 {offsets = [4, 0], sizes = [1, 128], strides = [1, 1]} : vector<9x128xf32> to vector<1x128xf32>
    %36 = vector.broadcast %35 : vector<1x128xf32> to vector<256x128xf32>
    %37 = arith.addf %34, %36 : vector<256x128xf32>
    %cst_18 = arith.constant dense<0xFF800000> : vector<128xf32>
    %38 = vector.multi_reduction <maximumf>, %37, %cst_18 [0] : vector<256x128xf32> to vector<128xf32>
    %39 = vector.shape_cast %38 : vector<128xf32> to vector<1x128xf32>
    %40 = tpu.iota {dimensions = array<i32: 0>} : vector<128x128xi32>
    %41 = tpu.iota {dimensions = array<i32: 1>} : vector<128x128xi32>
    %c1_i32 = arith.constant 1 : i32
    %42 = vector.broadcast %c1_i32 : i32 to vector<128x128xi32>
    %43 = arith.subi %41, %42 : vector<128x128xi32>
    %44 = arith.cmpi eq, %40, %43 : vector<128x128xi32>
    %45 = arith.extui %44 : vector<128x128xi1> to vector<128x128xi32>
    %46 = arith.sitofp %45 : vector<128x128xi32> to vector<128x128xf32>
    %47 = vector.extract_strided_slice %0 {offsets = [5, 0], sizes = [1, 128], strides = [1, 1]} : vector<9x128xf32> to vector<1x128xf32>
    %48 = vector.broadcast %47 : vector<1x128xf32> to vector<128x128xf32>
    %49 = arith.mulf %46, %48 : vector<128x128xf32>
    %50 = arith.cmpi eq, %40, %41 : vector<128x128xi32>
    %51 = arith.extui %50 : vector<128x128xi1> to vector<128x128xi32>
    %52 = arith.sitofp %51 : vector<128x128xi32> to vector<128x128xf32>
    %53 = vector.extract_strided_slice %0 {offsets = [6, 0], sizes = [1, 128], strides = [1, 1]} : vector<9x128xf32> to vector<1x128xf32>
    %54 = vector.broadcast %53 : vector<1x128xf32> to vector<128x128xf32>
    %55 = arith.mulf %52, %54 : vector<128x128xf32>
    %56 = arith.addf %49, %55 : vector<128x128xf32>
    %c1_i32_19 = arith.constant 1 : i32
    %57 = vector.broadcast %c1_i32_19 : i32 to vector<128x128xi32>
    %58 = arith.addi %41, %57 : vector<128x128xi32>
    %59 = arith.cmpi eq, %40, %58 : vector<128x128xi32>
    %60 = arith.extui %59 : vector<128x128xi1> to vector<128x128xi32>
    %61 = arith.sitofp %60 : vector<128x128xi32> to vector<128x128xf32>
    %62 = vector.extract_strided_slice %0 {offsets = [7, 0], sizes = [1, 128], strides = [1, 1]} : vector<9x128xf32> to vector<1x128xf32>
    %63 = vector.broadcast %62 : vector<1x128xf32> to vector<128x128xf32>
    %64 = arith.mulf %61, %63 : vector<128x128xf32>
    %65 = arith.addf %56, %64 : vector<128x128xf32>
    %cst_20 = arith.constant dense<0.000000e+00> : vector<1x128xf32>
    %66 = tpu.matmul %39, %65, %cst_20 {dimension_numbers = #tpu.dot_dimension_numbers<[1], [0], [0], [1], [0, 0, 1, 1], [], []>} : vector<1x128xf32>, vector<128x128xf32>, vector<1x128xf32> -> vector<1x128xf32>
    %67 = vector.extract_strided_slice %0 {offsets = [8, 0], sizes = [1, 128], strides = [1, 1]} : vector<9x128xf32> to vector<1x128xf32>
    %68 = arith.negf %66 : vector<1x128xf32>
    %69 = math.exp %68 : vector<1x128xf32>
    %cst_21 = arith.constant 1.000000e+00 : f32
    %70 = vector.broadcast %cst_21 : f32 to vector<1x128xf32>
    %71 = arith.addf %70, %69 : vector<1x128xf32>
    %72 = arith.divf %70, %71 : vector<1x128xf32>
    %73 = arith.mulf %67, %72 : vector<1x128xf32>
    %cst_22 = arith.constant 1.000000e+00 : f32
    %74 = vector.broadcast %cst_22 : f32 to vector<1x128xf32>
    %75 = arith.addf %74, %73 : vector<1x128xf32>
    %76 = vector.broadcast %75 : vector<1x128xf32> to vector<256x128xf32>
    %77 = arith.mulf %37, %76 : vector<256x128xf32>
    %c0_23 = arith.constant 0 : index
    %c0_24 = arith.constant 0 : index
    %c0_25 = arith.constant 0 : index
    %78 = vector.load %arg6[%c0_23, %c0_24, %c0_25] : memref<1x256x128xf32, #tpu.memory_space<vmem>>, vector<1x256x128xf32>
    %79 = vector.shape_cast %78 : vector<1x256x128xf32> to vector<256x128xf32>
    %80 = vector.shape_cast %77 : vector<256x128xf32> to vector<1x256x128xf32>
    tpu.vector_store %arg6[%c0_23, %c0_24, %c0_25], %80 {strides = array<i32>} : memref<1x256x128xf32, #tpu.memory_space<vmem>>, vector<1x256x128xf32>,
    return
  }
  func.func @transform_0(%arg0: i32) -> (i32, i32, i32) {
    %c0_i32 = arith.constant 0 : i32
    %c0_i32_0 = arith.constant 0 : i32
    %c0_i32_1 = arith.constant 0 : i32
    return %arg0, %c0_i32, %c0_i32_0 : i32, i32, i32
  }
  func.func @transform_1(%arg0: i32) -> (i32, i32, i32) {
    %c0_i32 = arith.constant 0 : i32
    %c0_i32_0 = arith.constant 0 : i32
    %c0_i32_1 = arith.constant 0 : i32
    return %arg0, %c0_i32, %c0_i32_0 : i32, i32, i32
  }
  func.func @transform_2(%arg0: i32) -> (i32, i32, i32) {
    %c0_i32 = arith.constant 0 : i32
    %c0_i32_0 = arith.constant 0 : i32
    %c0_i32_1 = arith.constant 0 : i32
    return %arg0, %c0_i32, %c0_i32_0 : i32, i32, i32
  }
  func.func @transform_3(%arg0: i32) -> (i32, i32) {
    %c0_i32 = arith.constant 0 : i32
    %c0_i32_0 = arith.constant 0 : i32
    %c0_i32_1 = arith.constant 0 : i32
    return %c0_i32, %c0_i32_0 : i32, i32
  }
  func.func @transform_4(%arg0: i32) -> (i32, i32) {
    %c0_i32 = arith.constant 0 : i32
    %c0_i32_0 = arith.constant 0 : i32
    %c0_i32_1 = arith.constant 0 : i32
    return %c0_i32, %c0_i32_0 : i32, i32
  }
  func.func @transform_5(%arg0: i32) -> (i32, i32, i32) {
    %c0_i32 = arith.constant 0 : i32
    %c0_i32_0 = arith.constant 0 : i32
    %c0_i32_1 = arith.constant 0 : i32
    return %arg0, %c0_i32, %c0_i32_0 : i32, i32, i32
  }
}

</mosaic_0001>

<bundles_post_ra>
// kernel: apf_forward.3
= control target key start
LH: loop header
LB: loop body
LE: loop exit
PB: predicated region body
PF: predicated region fallthrough
CT: control target
= control target key end

     0   :  { %10 = vsyncpa [#allocation3], 0  ;;  %s3276_s0 = inlined_call_operand.vmem [shape: bf16[2,256,128], index: 0, kind: input, shape index: {}]   ;;  %s3277_s1 = inlined_call_operand.vmem [shape: bf16[2,256,128], index: 1, kind: input, shape index: {}]   ;;  %s3278_s2 = inlined_call_operand.vmem [shape: bf16[2,256,128], index: 2, kind: input, shape index: {}]   ;;  %s3279_s3 = inlined_call_operand.vmem [shape: f32[9,128], index: 3, kind: input, shape index: {}]   ;;  %s3280_s4 = inlined_call_operand.vmem [shape: bf16[384,128], index: 4, kind: input, shape index: {}]   ;;  %s3281_s5 = inlined_call_operand.hbm [shape: f32[2,256,128], index: 5, kind: output, shape index: {}]  }
   0x1   :  { %12 = vsyncpa [#allocation3 + $0x1], 0  ;;  %s2362_s18 = smov 0   ;;  %s2364_s19 = smov 0  }
   0x2   :  { %s2366_s20 = smov 0   ;;  %s2368_s21 = smov 0  }
   0x3 LB: > { %s2383_s22 = sadd.s32 4294967295, %s2327_s21   ;;  %s1766_s23 = sadd.s32 4294967294, %s2327_s21   ;;  %s2327_s21 = sphi %s2368_s21, %s3287_s21   ;;  %s2323_s20 = sphi %s2366_s20, %s3286_s20   ;;  %s2319_s19 = sphi %s2364_s19, %s3285_s19   ;;  %s2315_s18 = sphi %s2362_s18, %s3284_s18  }
   0x4   : > { %s2387_s24 = sadd.s32 1, %s2327_s21   ;;  %s145_s25 = sadd.s32 1, %s2323_s20 }
   0x5   : > { %s142_s26 = ssub.s32 %s2327_s21, %s2387_s24  ;;  %p155_p0 = scmp.ne.s32.totalorder %s2323_s20, %s2319_s19 }
   0x6   : > { %p143_p1 = scmp.eq.s32.totalorder %s142_s26, 0  ;;  %p156_p2 = scmp.eq.s32.totalorder %s2383_s22, 1 }
   0x7   : > { %p161_p3 = scmp.ne.s32.totalorder %s2319_s19, %s2315_s18  ;;  %p162_p4 = scmp.eq.s32.totalorder %s1766_s23, 1 }
   0x8   : > { %s2398_s27 = scalar_select %p143_p1, %s2323_s20, %s145_s25  }
   0x9   : > { %p2400_p5 = por %p156_p2, %p155_p0  ;;  %p2404_p6 = por %p162_p4, %p161_p3 }
   0xa   : > { %p1769_p7 = scmp.ge.s32.totalorder %s2327_s21, 1  ;;  %p210_p8 = scmp.lt.s32.totalorder %s2327_s21, 3 }
   0xc   : > { %p211_p9 = pnand %p1769_p7, %p210_p8 }
   0xd   : > { %p248_p10 = scmp.lt.s32.totalorder (!%p211_p9), %s2383_s22, 1  ;;  %s245_s11 = sand.u32 (!%p211_p9), 1, %s2319_s19  }
   0xe   : > { %214 = sbr.rel (%p211_p9) target bundleno = 606 (0x25e), region = 40  ;;  %s1770_s12 = sshll.u32 (!%p211_p9), %s245_s11, 8 }
   0xf   : > { %s2035_s15 = sshll.u32 (!%p211_p9), %s2383_s22, 8  ;;  %s1665_s30 = scalar_lea.sflag (!%p211_p9), [#allocation3], %s245_s11 }
  0x10   : > { %s1676_s25 = scalar_lea.hbm (!%p211_p9), %s3281_s5, %s2035_s15 }
  0x11   : > { %s1679_s26 = sshll.u32 (!%p211_p9), %s1676_s25, 4  ;;  %s1680_s26 = int_to_ptr.hbm [resolvable:$true] %s1679_s26 }
  0x12   : > { %s2279_s6 = sshra.s32 (!%p211_p9), %s1680_s26, 4  ;;  %s2280_s6 = int_to_ptr.hbm [resolvable:$true] %s2279_s6 }
  0x13   : > { %v2026_v0 = vld [vmem:[%s3280_s4 + $0x78] sm:$0xff]  ;;  %v2025_v3 = vld [vmem:[%s3280_s4 + $0x70] sm:$0xff]  ;;  %s249_s13 = scalar_select %p248_p10, %s2383_s22, 1  ;;  %v2024_v6 = vld [vmem:[%s3280_s4 + $0x68] sm:$0xff] }
  0x14   : > { %v2416_v1 = vld [vmem:[%s3280_s4 + $0x38] sm:$0xff]  ;;  %717 = vmatpush.bf16.msra.mxu0 %v2026_v0  ;;  %2194 = vmatpush.bf16.msra.mxu3 %v2026_v0  ;;  %v2433_v4 = vld [vmem:[%s3280_s4 + $0x30] sm:$0xff]  ;;  %v2456_v7 = vld [vmem:[%s3280_s4 + $0x28] sm:$0xff]  ;;  %s2281_s8 = scalar_lea.hbm %s2280_s6, 256  ;;  %p2286_p0 = scmp.lt.s32.totalorder %s2280_s6, %s3281_s5 }
  0x15   : > { %v2421_v2 = vld [vmem:[%s3280_s4 + $0xb8] sm:$0xff]  ;;  %950 = vmatpush.bf16.msra.mxu1 %v2416_v1  ;;  %v2438_v5 = vld [vmem:[%s3280_s4 + $0xb0] sm:$0xff]  ;;  %s2440_s23 = sshll.u32 %s249_s13, 7  ;;  %v2461_v8 = vld [vmem:[%s3280_s4 + $0xa8] sm:$0xff]  ;;  %s3154_s13 = scalar_lea.vmem [#allocation2], %s1770_s12 }
  0x16   : > { %1119 = vmatpush.bf16.msra.mxu2 %v2421_v2  ;;  %s2449_s7 = scalar_lea.vmem %s3277_s1, %s2440_s23  ;;  %s2467_s14 = scalar_lea.vmem %s3278_s2, %s2440_s23  ;;  %v2023_v10 = vld [vmem:[%s3280_s4 + $0x60] sm:$0xff]  ;;  %v2022_v21 = vld [vmem:[%s3280_s4 + $0x58] sm:$0xff]  ;;  %v2021_v32 = vld [vmem:[%s3280_s4 + $0x50] sm:$0xff] }
  0x17   : > { %v2037_v9 = vld [vmem:[%s2449_s7] sm:$0xff]   ;;  %v2176_v12 = vld [vmem:[%s2449_s7 + $0x68] sm:$0xff]   ;;  %v2506_v25 = vld [vmem:[%s3280_s4 + $0x18] sm:$0xff]  ;;  %s2582_s9 = scalar_lea.vmem %s3276_s0, %s2440_s23  ;;  %s1677_s22 = sshll.u32 %s3154_s13, 4  ;;  %s1678_s22 = int_to_ptr.vmem [resolvable:$true] %s1677_s22 }
  0x18   : > { %718 = vmatpush.bf16.msra.mxu0 %v2025_v3  ;;  %2195 = vmatpush.bf16.msra.mxu3 %v2025_v3  ;;  %v2476_v11 = vld [vmem:[%s3279_s3] sm:$0xff]  ;;  %v2038_v16 = vunpack.c.l.bf16 %v2037_v9  ;;  %v2039_v17 = vunpack.c.h.bf16 %v2037_v9  ;;  %v2090_v19 = vunpack.c.l.bf16 %v2176_v12  ;;  %v2091_v20 = vunpack.c.h.bf16 %v2176_v12  ;;  %v2511_v26 = vld [vmem:[%s3280_s4 + $0x98] sm:$0xff]  ;;  %v2533_v36 = vld [vmem:[%s3280_s4 + $0x10] sm:$0xff]  ;;  %p2282_p11 = scmp.ne.s32.totalorder %s2280_s6, %s2281_s8 }
  0x19   : > { %951 = vmatpush.bf16.msra.mxu1 %v2433_v4  ;;  %v2484_v13 = vld [vmem:[%s3280_s4 + $0x20] sm:$0xff]  ;;  %v2493_v18 = vperm.slane %v2476_v11, 0  ;;  %v2499_v24 = vperm.slane %v2476_v11, 2  ;;  %v2514_v27 = vperm.slane %v2476_v11, 1  ;;  %v2526_v35 = vperm.slane %v2476_v11, 3  ;;  %v2538_v37 = vld [vmem:[%s3280_s4 + $0x90] sm:$0xff] }
  0x1a   : > { %1120 = vmatpush.bf16.msra.mxu2 %v2438_v5  ;;  %v2489_v14 = vld [vmem:[%s3280_s4 + $0xa0] sm:$0xff]  ;;  %v2020_v42 = vld [vmem:[%s3280_s4 + $0x48] sm:$0xff]  ;;  %v2177_v55 = vld [vmem:[%s2449_s7 + $0x70] sm:$0xff]   ;;  %p2283_p12 = pnand %p2282_p11, %p2400_p5 }
  0x1b   : > { %v2101_v15 = vld [vmem:[%s2467_s14] sm:$0xff]   ;;  %v330_v28 = vmul.f32 %v2038_v16, %v2493_v18  ;;  %v331_v29 = vmul.f32 %v2039_v17, %v2493_v18  ;;  %v356_v30 = vmul.f32 %v2090_v19, %v2493_v18  ;;  %v357_v31 = vmul.f32 %v2091_v20, %v2493_v18  ;;  %v2554_v45 = vld [vmem:[%s3280_s4 + $0x8] sm:$0xff] }
  0x1c   : > { %719 = vmatpush.bf16.msra.mxu0 %v2024_v6  ;;  %2196 = vmatpush.bf16.msra.mxu3 %v2024_v6  ;;  %v2102_v22 = vunpack.c.l.bf16 %v2101_v15  ;;  %v2103_v23 = vunpack.c.h.bf16 %v2101_v15  ;;  %v2559_v46 = vld [vmem:[%s3280_s4 + $0x88] sm:$0xff]  ;;  %v2019_v52 = vld [vmem:[%s3280_s4 + $0x40] sm:$0xff]  ;;  %v2094_v63 = vunpack.c.l.bf16 %v2177_v55  ;;  %v2095_v0 = vunpack.c.h.bf16 %v2177_v55  ;;  %p2284_p13 = pneg %p2283_p12 }
  0x1d   : > { %952 = vmatpush.bf16.msra.mxu1 %v2456_v7  ;;  %v363_v38 = vadd.f32 %v2514_v27, %v330_v28  ;;  %v364_v39 = vadd.f32 %v2514_v27, %v331_v29  ;;  %v389_v40 = vadd.f32 %v2514_v27, %v356_v30  ;;  %v390_v41 = vadd.f32 %v2514_v27, %v357_v31  ;;  %v2164_v51 = vld [vmem:[%s2449_s7 + $0x8] sm:$0xff]   ;;  %v2571_v56 = vld [vmem:[%s3280_s4] sm:$0xff] }
  0x1e   : > { %1121 = vmatpush.bf16.msra.mxu2 %v2461_v8  ;;  %v492_v33 = vmul.f32 %v2102_v22, %v2499_v24  ;;  %v493_v34 = vmul.f32 %v2103_v23, %v2499_v24  ;;  %v2576_v57 = vld [vmem:[%s3280_s4 + $0x80] sm:$0xff]  ;;  %v2179_v58 = vld [vmem:[%s2467_s14 + $0x8] sm:$0xff]   ;;  %v2042_v59 = vunpack.c.l.bf16 %v2164_v51  ;;  %v2043_v60 = vunpack.c.h.bf16 %v2164_v51 }
  0x1f   : > { %v395_v47 = vmax.f32 %v363_v38, 0.0  ;;  %v396_v48 = vmax.f32 %v364_v39, 0.0  ;;  %v421_v49 = vmax.f32 %v389_v40, 0.0  ;;  %v422_v50 = vmax.f32 %v390_v41, 0.0  ;;  %v1995_v3 = vld [vmem:[%s2582_s9] sm:$0xff]  ;;  %v2178_v39 = vld [vmem:[%s2449_s7 + $0x78] sm:$0xff]  }
  0x20   : > { %720 = vmatpush.bf16.msra.mxu0 %v2023_v10  ;;  %2197 = vmatpush.bf16.msra.mxu3 %v2023_v10  ;;  %v525_v43 = vadd.f32 %v2526_v35, %v492_v33  ;;  %v526_v44 = vadd.f32 %v2526_v35, %v493_v34  ;;  %v2106_v9 = vunpack.c.l.bf16 %v2179_v58  ;;  %v2107_v10 = vunpack.c.h.bf16 %v2179_v58  ;;  %v2165_v33 = vld [vmem:[%s2449_s7 + $0x10] sm:$0xff]  }
  0x21   : > { %953 = vmatpush.bf16.msra.mxu1 %v2484_v13  ;;  %v637_v61 = vpack.c.bf16 %v396_v48, %v395_v47  ;;  %v650_v62 = vpack.c.bf16 %v422_v50, %v421_v49  ;;  %v332_v12 = vmul.f32 %v2042_v59, %v2493_v18  ;;  %v333_v15 = vmul.f32 %v2043_v60, %v2493_v18  ;;  %v2180_v40 = vld [vmem:[%s2467_s14 + $0x10] sm:$0xff]   ;;  %v1996_v49 = vld [vmem:[%s2582_s9 + $0x8] sm:$0xff] }
  0x22   : > { %1122 = vmatpush.bf16.msra.mxu2 %v2489_v14  ;;  %v557_v53 = vmax.f32 %v525_v43, 0.0  ;;  %v558_v54 = vmax.f32 %v526_v44, 0.0  ;;  %v358_v16 = vmul.f32 %v2094_v63, %v2493_v18  ;;  %v359_v17 = vmul.f32 %v2095_v0, %v2493_v18 }
  0x23   : > { %v494_v19 = vmul.f32 %v2106_v9, %v2499_v24  ;;  %v495_v20 = vmul.f32 %v2107_v10, %v2499_v24  ;;  %v2046_v41 = vunpack.c.l.bf16 %v2165_v33  ;;  %v2098_v47 = vunpack.c.l.bf16 %v2178_v39 }
  0x24   : > { %721 = vmatpush.bf16.msra.mxu0 %v2022_v21  ;;  %2198 = vmatpush.bf16.msra.mxu3 %v2022_v21  ;;  %v1039_v6 = vpack.c.bf16 %v558_v54, %v557_v53  ;;  %v366_v21 = vadd.f32 %v2514_v27, %v333_v15  ;;  %v391_v22 = vadd.f32 %v2514_v27, %v358_v16  ;;  %v2099_v48 = vunpack.c.h.bf16 %v2178_v39  ;;  %v2181_v15 = vld [vmem:[%s2467_s14 + $0x18] sm:$0xff]   ;;  %v2167_v39 = vld [vmem:[%s2449_s7 + $0x20] sm:$0xff]  }
  0x25   : > { %954 = vmatpush.bf16.msra.mxu1 %v2506_v25  ;;  %v392_v23 = vadd.f32 %v2514_v27, %v359_v17  ;;  %v527_v28 = vadd.f32 %v2526_v35, %v494_v19  ;;  %v528_v29 = vadd.f32 %v2526_v35, %v495_v20  ;;  %v2110_v50 = vunpack.c.l.bf16 %v2180_v40 }
  0x26   : > { %1123 = vmatpush.bf16.msra.mxu2 %v2511_v26  ;;  %v398_v31 = vmax.f32 %v366_v21, 0.0  ;;  %v2111_v51 = vunpack.c.h.bf16 %v2180_v40  ;;  %v361_v54 = vmul.f32 %v2099_v48, %v2493_v18  ;;  %v2182_v40 = vld [vmem:[%s2467_s14 + $0x20] sm:$0xff]  }
  0x27   : > { %v559_v34 = vmax.f32 %v527_v28, 0.0  ;;  %v560_v38 = vmax.f32 %v528_v29, 0.0  ;;  %v496_v55 = vmul.f32 %v2110_v50, %v2499_v24  ;;  %v2118_v48 = vunpack.c.l.bf16 %v2182_v40 }
  0x28   : > { %722 = vmatpush.bf16.msra.mxu0 %v2021_v32  ;;  %2199 = vmatpush.bf16.msra.mxu3 %v2021_v32  ;;  %v423_v32 = vmax.f32 %v391_v22, 0.0  ;;  %v497_v58 = vmul.f32 %v2111_v51, %v2499_v24  ;;  %v2114_v22 = vunpack.c.l.bf16 %v2181_v15 }
  0x29   : > { %955 = vmatpush.bf16.msra.mxu1 %v2533_v36 }
  0x2a   : > { %1124 = vmatpush.bf16.msra.mxu2 %v2538_v37  ;;  %v530_v63 = vadd.f32 %v2526_v35, %v497_v58 }
  0x2c   : > { %723 = vmatpush.bf16.msra.mxu0 %v2020_v42  ;;  %2200 = vmatpush.bf16.msra.mxu3 %v2020_v42  ;;  %v2047_v42 = vunpack.c.h.bf16 %v2165_v33  ;;  %v562_v10 = vmax.f32 %v530_v63, 0.0  ;;  %v1999_v63 = vld [vmem:[%s2582_s9 + $0x20] sm:$0xff] }
  0x2d   : > { %956 = vmatpush.bf16.msra.mxu1 %v2554_v45 }
  0x2e   : > { %1125 = vmatpush.bf16.msra.mxu2 %v2559_v46  ;;  %v335_v53 = vmul.f32 %v2047_v42, %v2493_v18  ;;  %v2054_v42 = vunpack.c.l.bf16 %v2167_v39 }
  0x30   : > { %724 = vmatpush.bf16.msra.mxu0 %v2019_v52  ;;  %2201 = vmatpush.bf16.msra.mxu3 %v2019_v52  ;;  %v334_v52 = vmul.f32 %v2046_v41, %v2493_v18  ;;  %v368_v59 = vadd.f32 %v2514_v27, %v335_v53  ;;  %v2008_v41 = vld [vmem:[%s2582_s9 + $0x68] sm:$0xff] }
  0x31   : > { %957 = vmatpush.bf16.msra.mxu1 %v2571_v56 }
  0x32   : > { %1126 = vmatpush.bf16.msra.mxu2 %v2576_v57 }
  0x33   : > { %725 = vmatmul.bf16.vlgmr.msra.gmra.mxu0 %v637_v61  ;;  %790 = vmatmul.bf16.vlgmr.msra.gmra.mxu3 %v650_v62  ;;  %v394_v61 = vadd.f32 %v2514_v27, %v361_v54  ;;  %v529_v62 = vadd.f32 %v2526_v35, %v496_v55 }
  0x34   : > { %2202 = vmatpush.bf16.msrb.mxu3 %v2416_v1  ;;  %958 = vmatmul.bf16.vlgmr.msra.gmra.mxu1 %v1995_v3  ;;  %v365_v1 = vadd.f32 %v2514_v27, %v332_v12  ;;  %v400_v3 = vmax.f32 %v368_v59, 0.0  ;;  %v2166_v12 = vld [vmem:[%s2449_s7 + $0x18] sm:$0xff]   ;;  %v2183_v59 = vld [vmem:[%s2467_s14 + $0x28] sm:$0xff]  }
  0x35   : > { %1127 = vmatmul.bf16.vlgmr.msra.gmra.mxu2 %v1039_v6  ;;  %v426_v9 = vmax.f32 %v394_v61, 0.0  ;;  %v2050_v19 = vunpack.c.l.bf16 %v2166_v12  ;;  %v2051_v20 = vunpack.c.h.bf16 %v2166_v12 }
  0x36   : > { %v397_v30 = vmax.f32 %v365_v1, 0.0  ;;  %v1997_v1 = vld [vmem:[%s2582_s9 + $0x10] sm:$0xff] }
  0x37   : > { %v337_v28 = vmul.f32 %v2051_v20, %v2493_v18  ;;  %v2169_v20 = vld [vmem:[%s2449_s7 + $0x30] sm:$0xff]  }
  0x38   : > { %2203 = vmatpush.bf16.msrb.mxu3 %v2433_v4  ;;  %v424_v4 = vmax.f32 %v392_v23, 0.0  ;;  %v638_v43 = vpack.c.bf16 %v398_v31, %v397_v30  ;;  %v336_v23 = vmul.f32 %v2050_v19, %v2493_v18 }
  0x39   : > { %v370_v30 = vadd.f32 %v2514_v27, %v337_v28 }
  0x3a   : > { %v651_v44 = vpack.c.bf16 %v424_v4, %v423_v32 }
  0x3b   : > { %v402_v33 = vmax.f32 %v370_v30, 0.0 }
  0x3c   : > { %2204 = vmatpush.bf16.msrb.mxu3 %v2456_v7  ;;  %v1040_v7 = vpack.c.bf16 %v560_v38, %v559_v34 }
  0x40   : > { %2205 = vmatpush.bf16.msrb.mxu3 %v2484_v13  ;;  %v360_v13 = vmul.f32 %v2098_v47, %v2493_v18 }
  0x42   : > { %v393_v60 = vadd.f32 %v2514_v27, %v360_v13 }
  0x43   : > { %730 = vmatmul.bf16.gmra.mxu0 %v638_v43  ;;  %795 = vmatmul.bf16.gmra.mxu3 %v651_v44  ;;  %v2055_v43 = vunpack.c.h.bf16 %v2167_v39  ;;  %v1998_v44 = vld [vmem:[%s2582_s9 + $0x18] sm:$0xff] }
  0x44   : > { %2206 = vmatpush.bf16.msrb.mxu3 %v2506_v25  ;;  %963 = vmatmul.bf16.gmra.mxu1 %v1996_v49  ;;  %v367_v25 = vadd.f32 %v2514_v27, %v334_v52  ;;  %v425_v6 = vmax.f32 %v393_v60, 0.0  ;;  %v2119_v49 = vunpack.c.h.bf16 %v2182_v40  ;;  %v2009_v60 = vld [vmem:[%s2582_s9 + $0x70] sm:$0xff] }
  0x45   : > { %1132 = vmatmul.bf16.gmra.mxu2 %v1040_v7  ;;  %v339_v7 = vmul.f32 %v2055_v43, %v2493_v18 }
  0x46   : > { %v399_v0 = vmax.f32 %v367_v25, 0.0  ;;  %v652_v17 = vpack.c.bf16 %v426_v9, %v425_v6  ;;  %v501_v50 = vmul.f32 %v2119_v49, %v2499_v24  ;;  %v2168_v25 = vld [vmem:[%s2449_s7 + $0x28] sm:$0xff]   ;;  %v2123_v6 = vunpack.c.h.bf16 %v2183_v59 }
  0x47   : > { %v2058_v61 = vunpack.c.l.bf16 %v2168_v25 }
  0x48   : > { %2207 = vmatpush.bf16.msrb.mxu3 %v2533_v36  ;;  %v561_v36 = vmax.f32 %v529_v62, 0.0  ;;  %v639_v16 = vpack.c.bf16 %v400_v3, %v399_v0  ;;  %v534_v53 = vadd.f32 %v2526_v35, %v501_v50  ;;  %v2059_v62 = vunpack.c.h.bf16 %v2168_v25 }
  0x49   : > { %v2122_v3 = vunpack.c.l.bf16 %v2183_v59 }
  0x4a   : > { %v1041_v21 = vpack.c.bf16 %v562_v10, %v561_v36  ;;  %v566_v58 = vmax.f32 %v534_v53, 0.0  ;;  %v341_v9 = vmul.f32 %v2059_v62, %v2493_v18  ;;  %v503_v36 = vmul.f32 %v2123_v6, %v2499_v24  ;;  %v2192_v53 = vld [vmem:[%s2467_s14 + $0x70] sm:$0xff]  }
  0x4b   : > { %v2158_v59 = vunpack.c.l.bf16 %v2192_v53 }
  0x4c   : > { %2208 = vmatpush.bf16.msrb.mxu3 %v2554_v45  ;;  %v2115_v45 = vunpack.c.h.bf16 %v2181_v15  ;;  %v374_v12 = vadd.f32 %v2514_v27, %v341_v9 }
  0x4d   : > { %v520_v6 = vmul.f32 %v2158_v59, %v2499_v24 }
  0x4e   : > { %v499_v29 = vmul.f32 %v2115_v45, %v2499_v24  ;;  %v406_v19 = vmax.f32 %v374_v12, 0.0  ;;  %v2184_v45 = vld [vmem:[%s2467_s14 + $0x30] sm:$0xff]  }
  0x4f   : > { %v553_v12 = vadd.f32 %v2526_v35, %v520_v6 }
  0x50   : > { %2209 = vmatpush.bf16.msrb.mxu3 %v2571_v56  ;;  %v498_v56 = vmul.f32 %v2114_v22, %v2499_v24  ;;  %v532_v32 = vadd.f32 %v2526_v35, %v499_v29  ;;  %v2191_v22 = vld [vmem:[%s2467_s14 + $0x68] sm:$0xff]   ;;  %v2063_v29 = vunpack.c.h.bf16 %v2169_v20 }
  0x51   : > { %v2155_v30 = vunpack.c.h.bf16 %v2191_v22 }
  0x52   : > { %v531_v31 = vadd.f32 %v2526_v35, %v498_v56  ;;  %v564_v38 = vmax.f32 %v532_v32, 0.0  ;;  %v2010_v56 = vld [vmem:[%s2582_s9 + $0x78] sm:$0xff] }
  0x53   : > { %735 = vmatmul.bf16.gmra.mxu0 %v639_v16  ;;  %800 = vmatmul.bf16.gmra.mxu3 %v652_v17  ;;  %v536_v16 = vadd.f32 %v2526_v35, %v503_v36  ;;  %v519_v40 = vmul.f32 %v2155_v30, %v2499_v24 }
  0x54   : > { %2210 = vmatpush.bf16.msra.mxu3 %v2421_v2  ;;  %968 = vmatmul.bf16.gmra.mxu1 %v1997_v1  ;;  %v369_v2 = vadd.f32 %v2514_v27, %v336_v23  ;;  %v563_v34 = vmax.f32 %v531_v31, 0.0  ;;  %v2062_v23 = vunpack.c.l.bf16 %v2169_v20  ;;  %v2000_v31 = vld [vmem:[%s2582_s9 + $0x28] sm:$0xff] }
  0x55   : > { %1137 = vmatmul.bf16.gmra.mxu2 %v1041_v21  ;;  %v568_v21 = vmax.f32 %v536_v16, 0.0 }
  0x56   : > { %v401_v4 = vmax.f32 %v369_v2, 0.0  ;;  %v1042_v47 = vpack.c.bf16 %v564_v38, %v563_v34  ;;  %v2154_v2 = vunpack.c.l.bf16 %v2191_v22  ;;  %v342_v34 = vmul.f32 %v2062_v23, %v2493_v18  ;;  %v2171_v22 = vld [vmem:[%s2449_s7 + $0x40] sm:$0xff]  }
  0x57   : > { %v343_v38 = vmul.f32 %v2063_v29, %v2493_v18 }
  0x58   : > { %2211 = vmatpush.bf16.msra.mxu3 %v2438_v5  ;;  %v640_v5 = vpack.c.bf16 %v402_v33, %v401_v4  ;;  %v2126_v4 = vunpack.c.l.bf16 %v2184_v45  ;;  %v2127_v33 = vunpack.c.h.bf16 %v2184_v45  ;;  %v518_v39 = vmul.f32 %v2154_v2, %v2499_v24 }
  0x59   : > { %v376_v43 = vadd.f32 %v2514_v27, %v343_v38  ;;  %v2070_v2 = vunpack.c.l.bf16 %v2171_v22 }
  0x5c   : > { %2212 = vmatpush.bf16.msra.mxu3 %v2461_v8  ;;  %v338_v8 = vmul.f32 %v2054_v42, %v2493_v18  ;;  %v375_v42 = vadd.f32 %v2514_v27, %v342_v34 }
  0x5e   : > { %v371_v51 = vadd.f32 %v2514_v27, %v338_v8  ;;  %v407_v8 = vmax.f32 %v375_v42, 0.0 }
  0x60   : > { %2213 = vmatpush.bf16.msra.mxu3 %v2489_v14  ;;  %v500_v14 = vmul.f32 %v2118_v48, %v2499_v24  ;;  %v403_v13 = vmax.f32 %v371_v51, 0.0  ;;  %v2170_v51 = vld [vmem:[%s2449_s7 + $0x38] sm:$0xff]  }
  0x62   : > { %v533_v52 = vadd.f32 %v2526_v35, %v500_v14 }
  0x63   : > { %740 = vmatmul.bf16.gmra.mxu0 %v640_v5  ;;  %1023 = vmatmul.bf16.vlgmr.msrb.gmra.mxu3 %v2008_v41  ;;  %v504_v5 = vmul.f32 %v2126_v4, %v2499_v24  ;;  %v505_v41 = vmul.f32 %v2127_v33, %v2499_v24  ;;  %v2002_v33 = vld [vmem:[%s2582_s9 + $0x38] sm:$0xff] }
  0x64   : > { %2214 = vmatpush.bf16.msra.mxu3 %v2511_v26  ;;  %973 = vmatmul.bf16.gmra.mxu1 %v1998_v44  ;;  %v372_v26 = vadd.f32 %v2514_v27, %v339_v7  ;;  %v565_v55 = vmax.f32 %v533_v52, 0.0  ;;  %v551_v44 = vadd.f32 %v2526_v35, %v518_v39  ;;  %v408_v7 = vmax.f32 %v376_v43, 0.0 }
  0x65   : > { %1142 = vmatmul.bf16.gmra.mxu2 %v1042_v47  ;;  %v552_v47 = vadd.f32 %v2526_v35, %v519_v40  ;;  %v537_v48 = vadd.f32 %v2526_v35, %v504_v5  ;;  %v538_v49 = vadd.f32 %v2526_v35, %v505_v41  ;;  %v346_v40 = vmul.f32 %v2070_v2, %v2493_v18  ;;  %v2188_v2 = vld [vmem:[%s2467_s14 + $0x50] sm:$0xff]  }
  0x66   : > { %v404_v54 = vmax.f32 %v372_v26, 0.0  ;;  %v1043_v0 = vpack.c.bf16 %v566_v58, %v565_v55  ;;  %v583_v14 = vmax.f32 %v551_v44, 0.0  ;;  %v2067_v55 = vunpack.c.h.bf16 %v2170_v51 }
  0x67   : > { %v584_v50 = vmax.f32 %v552_v47, 0.0  ;;  %v569_v26 = vmax.f32 %v537_v48, 0.0  ;;  %v570_v52 = vmax.f32 %v538_v49, 0.0  ;;  %v643_v58 = vpack.c.bf16 %v408_v7, %v407_v8 }
  0x68   : > { %2215 = vmatpush.bf16.msra.mxu3 %v2538_v37  ;;  %v641_v37 = vpack.c.bf16 %v404_v54, %v403_v13  ;;  %v2185_v13 = vld [vmem:[%s2467_s14 + $0x38] sm:$0xff]   ;;  %v2066_v54 = vunpack.c.l.bf16 %v2170_v51  ;;  %v379_v47 = vadd.f32 %v2514_v27, %v346_v40 }
  0x69   : > { %v1052_v25 = vpack.c.bf16 %v584_v50, %v583_v14  ;;  %v2130_v62 = vunpack.c.l.bf16 %v2185_v13 }
  0x6a   : > { %v411_v50 = vmax.f32 %v379_v47, 0.0 }
  0x6b   : > { %v506_v9 = vmul.f32 %v2130_v62, %v2499_v24 }
  0x6c   : > { %2216 = vmatpush.bf16.msra.mxu3 %v2559_v46  ;;  %v340_v46 = vmul.f32 %v2058_v61, %v2493_v18  ;;  %v1045_v61 = vpack.c.bf16 %v570_v52, %v569_v26 }
  0x6d   : > { %v539_v16 = vadd.f32 %v2526_v35, %v506_v9 }
  0x6e   : > { %v373_v10 = vadd.f32 %v2514_v27, %v340_v46 }
  0x6f   : > { %v571_v45 = vmax.f32 %v539_v16, 0.0 }
  0x70   : > { %2217 = vmatpush.bf16.msra.mxu3 %v2576_v57  ;;  %v502_v57 = vmul.f32 %v2122_v3, %v2499_v24  ;;  %v405_v17 = vmax.f32 %v373_v10, 0.0  ;;  %v345_v3 = vmul.f32 %v2067_v55, %v2493_v18  ;;  %v2187_v55 = vld [vmem:[%s2467_s14 + $0x48] sm:$0xff]  }
  0x72   : > { %v535_v15 = vadd.f32 %v2526_v35, %v502_v57  ;;  %v642_v28 = vpack.c.bf16 %v406_v19, %v405_v17  ;;  %v378_v10 = vadd.f32 %v2514_v27, %v345_v3 }
  0x73   : > { %745 = vmatmul.bf16.gmra.mxu0 %v641_v37  ;;  %1028 = vmatmul.bf16.gmra.mxu3 %v2009_v60  ;;  %v2159_v37 = vunpack.c.h.bf16 %v2192_v53  ;;  %v2001_v60 = vld [vmem:[%s2582_s9 + $0x30] sm:$0xff] }
  0x74   : > { %978 = vmatmul.bf16.gmra.mxu1 %v1999_v63  ;;  %v567_v1 = vmax.f32 %v535_v15, 0.0  ;;  %v2131_v63 = vunpack.c.h.bf16 %v2185_v13  ;;  %v410_v20 = vmax.f32 %v378_v10, 0.0 }
  0x75   : > { %1147 = vmatmul.bf16.gmra.mxu2 %v1043_v0  ;;  %v344_v0 = vmul.f32 %v2066_v54, %v2493_v18  ;;  %v521_v46 = vmul.f32 %v2159_v37, %v2499_v24  ;;  %v2172_v54 = vld [vmem:[%s2449_s7 + $0x48] sm:$0xff]  }
  0x76   : > { %v1044_v32 = vpack.c.bf16 %v568_v21, %v567_v1  ;;  %v507_v57 = vmul.f32 %v2131_v63, %v2499_v24  ;;  %v585_v1 = vmax.f32 %v553_v12, 0.0  ;;  %v2074_v59 = vunpack.c.l.bf16 %v2172_v54 }
  0x77   : > { %v377_v36 = vadd.f32 %v2514_v27, %v344_v0  ;;  %v554_v15 = vadd.f32 %v2526_v35, %v521_v46  ;;  %v2075_v37 = vunpack.c.h.bf16 %v2172_v54  ;;  %v2138_v63 = vunpack.c.l.bf16 %v2187_v55 }
  0x78   : > { %v540_v17 = vadd.f32 %v2526_v35, %v507_v57  ;;  %v2139_v0 = vunpack.c.h.bf16 %v2187_v55  ;;  %v348_v46 = vmul.f32 %v2074_v59, %v2493_v18 }
  0x79   : > { %v409_v19 = vmax.f32 %v377_v36, 0.0  ;;  %v586_v21 = vmax.f32 %v554_v15, 0.0  ;;  %v349_v9 = vmul.f32 %v2075_v37, %v2493_v18  ;;  %v510_v57 = vmul.f32 %v2138_v63, %v2499_v24  ;;  %v2174_v37 = vld [vmem:[%s2449_s7 + $0x58] sm:$0xff]  }
  0x7a   : > { %v572_v23 = vmax.f32 %v540_v17, 0.0  ;;  %v511_v36 = vmul.f32 %v2139_v0, %v2499_v24  ;;  %v381_v15 = vadd.f32 %v2514_v27, %v348_v46  ;;  %v2082_v0 = vunpack.c.l.bf16 %v2174_v37 }
  0x7b   : > { %v644_v29 = vpack.c.bf16 %v410_v20, %v409_v19  ;;  %v1053_v30 = vpack.c.bf16 %v586_v21, %v585_v1  ;;  %v382_v16 = vadd.f32 %v2514_v27, %v349_v9  ;;  %v543_v20 = vadd.f32 %v2526_v35, %v510_v57  ;;  %v2005_v9 = vld [vmem:[%s2582_s9 + $0x50] sm:$0xff] }
  0x7c   : > { %v1046_v34 = vpack.c.bf16 %v572_v23, %v571_v45  ;;  %v544_v1 = vadd.f32 %v2526_v35, %v511_v36  ;;  %v413_v45 = vmax.f32 %v381_v15, 0.0 }
  0x7d   : > { %v414_v23 = vmax.f32 %v382_v16, 0.0 }
  0x83   : > { %750 = vmatmul.bf16.gmra.mxu0 %v642_v28  ;;  %1033 = vmatmul.bf16.gmra.mxu3 %v2010_v56  ;;  %v2193_v28 = vld [vmem:[%s2467_s14 + $0x78] sm:$0xff]   ;;  %v2186_v56 = vld [vmem:[%s2467_s14 + $0x40] sm:$0xff]  }
  0x84   : > { %983 = vmatmul.bf16.gmra.mxu1 %v2000_v31  ;;  %v2071_v31 = vunpack.c.h.bf16 %v2171_v22  ;;  %v2163_v4 = vunpack.c.h.bf16 %v2193_v28  ;;  %v2134_v38 = vunpack.c.l.bf16 %v2186_v56  ;;  %v2135_v39 = vunpack.c.h.bf16 %v2186_v56 }
  0x85   : > { %1152 = vmatmul.bf16.gmra.mxu2 %v1044_v32  ;;  %v2162_v32 = vunpack.c.l.bf16 %v2193_v28  ;;  %v575_v28 = vmax.f32 %v543_v20, 0.0  ;;  %v576_v56 = vmax.f32 %v544_v1, 0.0 }
  0x86   : > { %v347_v5 = vmul.f32 %v2071_v31, %v2493_v18  ;;  %v523_v42 = vmul.f32 %v2163_v4, %v2499_v24  ;;  %v508_v43 = vmul.f32 %v2134_v38, %v2499_v24  ;;  %v509_v44 = vmul.f32 %v2135_v39, %v2499_v24  ;;  %v2004_v39 = vld [vmem:[%s2582_s9 + $0x48] sm:$0xff] }
  0x87   : > { %v522_v41 = vmul.f32 %v2162_v32, %v2499_v24  ;;  %v646_v32 = vpack.c.bf16 %v414_v23, %v413_v45  ;;  %v1048_v40 = vpack.c.bf16 %v576_v56, %v575_v28 }
  0x88   : > { %v380_v48 = vadd.f32 %v2514_v27, %v347_v5  ;;  %v556_v8 = vadd.f32 %v2526_v35, %v523_v42  ;;  %v541_v7 = vadd.f32 %v2526_v35, %v508_v43  ;;  %v542_v14 = vadd.f32 %v2526_v35, %v509_v44 }
  0x89   : > { %v555_v49 = vadd.f32 %v2526_v35, %v522_v41  ;;  %v2142_v5 = vunpack.c.l.bf16 %v2188_v2  ;;  %v2143_v41 = vunpack.c.h.bf16 %v2188_v2 }
  0x8a   : > { %v412_v51 = vmax.f32 %v380_v48, 0.0  ;;  %v588_v52 = vmax.f32 %v556_v8, 0.0  ;;  %v573_v53 = vmax.f32 %v541_v7, 0.0  ;;  %v574_v13 = vmax.f32 %v542_v14, 0.0 }
  0x8b   : > { %v587_v26 = vmax.f32 %v555_v49, 0.0  ;;  %v512_v48 = vmul.f32 %v2142_v5, %v2499_v24  ;;  %v513_v49 = vmul.f32 %v2143_v41, %v2499_v24  ;;  %v2175_v5 = vld [vmem:[%s2449_s7 + $0x60] sm:$0xff]  }
  0x8c   : > { %v1047_v62 = vpack.c.bf16 %v574_v13, %v573_v53  ;;  %v2190_v41 = vld [vmem:[%s2467_s14 + $0x60] sm:$0xff]  }
  0x8d   : > { %v546_v53 = vadd.f32 %v2526_v35, %v513_v49 }
  0x8f   : > { %v578_v59 = vmax.f32 %v546_v53, 0.0 }
  0x93   : > { %755 = vmatmul.bf16.gmra.mxu0 %v643_v58  ;;  %1192 = vmatmul.bf16.vlgmr.msra.gmra.mxu3 %v1052_v25  ;;  %v645_v58 = vpack.c.bf16 %v412_v51, %v411_v50  ;;  %v1054_v25 = vpack.c.bf16 %v588_v52, %v587_v26  ;;  %v545_v52 = vadd.f32 %v2526_v35, %v512_v48  ;;  %v2087_v48 = vunpack.c.h.bf16 %v2175_v5 }
  0x94   : > { %988 = vmatmul.bf16.gmra.mxu1 %v2001_v60 }
  0x95   : > { %1157 = vmatmul.bf16.gmra.mxu2 %v1045_v61  ;;  %v2003_v61 = vld [vmem:[%s2582_s9 + $0x40] sm:$0xff] }
  0xa3   : > { %760 = vmatmul.bf16.gmra.mxu0 %v644_v29  ;;  %1197 = vmatmul.bf16.gmra.mxu3 %v1053_v30  ;;  %v2173_v29 = vld [vmem:[%s2449_s7 + $0x50] sm:$0xff]   ;;  %s2285_s7 = scalar_lea.hbm %s3281_s5, 512 }
  0xa4   : > { %993 = vmatmul.bf16.gmra.mxu1 %v2002_v33  ;;  %v2078_v4 = vunpack.c.l.bf16 %v2173_v29  ;;  %v2079_v33 = vunpack.c.h.bf16 %v2173_v29  ;;  %p2287_p1 = scmp.lt.s32.totalorder %s2285_s7, %s2281_s8 }
  0xa5   : > { %1162 = vmatmul.bf16.gmra.mxu2 %v1046_v34 }
  0xa6   : > { %v350_v44 = vmul.f32 %v2078_v4, %v2493_v18  ;;  %v351_v47 = vmul.f32 %v2079_v33, %v2493_v18  ;;  %p2288_p2 = por %p2287_p1, %p2286_p0 }
  0xa8   : > { %v383_v14 = vadd.f32 %v2514_v27, %v350_v44  ;;  %v384_v50 = vadd.f32 %v2514_v27, %v351_v47  ;;  %v2086_v47 = vunpack.c.l.bf16 %v2175_v5  ;;  %p2289_p3 = pnand %p2288_p2, %p2284_p13 }
  0xaa   : > { %v415_v55 = vmax.f32 %v383_v14, 0.0  ;;  %v2006_v14 = vld [vmem:[%s2582_s9 + $0x58] sm:$0xff] }
  0xb0   : > { %v726_v60 = vpop.f32.mrf.mxu0 }
  0xb1   : > { %v959_v3 = vpop.f32.mrf.mxu1 }
  0xb2   : > { %v960_v6 = vadd.f32 %v959_v3, %v726_v60  ;;  %v2189_v60 = vld [vmem:[%s2467_s14 + $0x58] sm:$0xff]   ;;  %v2083_v3 = vunpack.c.h.bf16 %v2174_v37 }
  0xb3   : > { %765 = vmatmul.bf16.gmra.mxu0 %v645_v58  ;;  %1202 = vmatmul.bf16.gmra.mxu3 %v1054_v25  ;;  %v416_v58 = vmax.f32 %v384_v50, 0.0  ;;  %v577_v25 = vmax.f32 %v545_v52, 0.0  ;;  %v2146_v36 = vunpack.c.l.bf16 %v2189_v60  ;;  %v2151_v52 = vunpack.c.h.bf16 %v2190_v41 }
  0xb4   : > { %998 = vmatmul.bf16.gmra.mxu1 %v2003_v61  ;;  %v353_v20 = vmul.f32 %v2083_v3, %v2493_v18 }
  0xb5   : > { %1167 = vmatmul.bf16.gmra.mxu2 %v1047_v62  ;;  %v647_v63 = vpack.c.bf16 %v416_v58, %v415_v55  ;;  %v1049_v57 = vpack.c.bf16 %v578_v59, %v577_v25  ;;  %v514_v1 = vmul.f32 %v2146_v36, %v2499_v24  ;;  %v355_v55 = vmul.f32 %v2087_v48, %v2493_v18 }
  0xb6   : > { %v2723_v10 = vpop.f32.mrf.mxu3  ;;  %v386_v28 = vadd.f32 %v2514_v27, %v353_v20  ;;  %v517_v25 = vmul.f32 %v2151_v52, %v2499_v24 }
  0xb7   : > { %v547_v2 = vadd.f32 %v2526_v35, %v514_v1 }
  0xb8   : > { %v1128_v12 = vpop.f32.mrf.mxu2  ;;  %v728_v19 = vpop.f32.mrf.mxu0 }
  0xb9   : > { %v2727_v17 = vadd.f32 %v1128_v12, %v960_v6  ;;  %v961_v21 = vpop.f32.mrf.mxu1  ;;  %v2147_v12 = vunpack.c.h.bf16 %v2189_v60 }
  0xba   : > { %v962_v22 = vadd.f32 %v961_v21, %v728_v19  ;;  %v352_v19 = vmul.f32 %v2082_v0, %v2493_v18 }
  0xbb   : > { %v515_v21 = vmul.f32 %v2147_v12, %v2499_v24 }
  0xbc   : > { %v385_v23 = vadd.f32 %v2514_v27, %v352_v19 }
  0xbe   : > { %v2733_v30 = vpop.f32.mrf.mxu3  ;;  %v417_v33 = vmax.f32 %v385_v23, 0.0 }
  0xc0   : > { %v1130_v31 = vpop.f32.mrf.mxu2  ;;  %v731_v38 = vpop.f32.mrf.mxu0 }
  0xc1   : > { %v2735_v34 = vadd.f32 %v1130_v31, %v962_v22  ;;  %v964_v42 = vpop.f32.mrf.mxu1  ;;  %v548_v31 = vadd.f32 %v2526_v35, %v515_v21 }
  0xc2   : > { %v965_v43 = vadd.f32 %v964_v42, %v731_v38  ;;  %v418_v38 = vmax.f32 %v386_v28, 0.0 }
  0xc3   : > { %770 = vmatmul.bf16.gmra.mxu0 %v646_v32 }
  0xc4   : > { %1003 = vmatmul.bf16.gmra.mxu1 %v2004_v39  ;;  %v579_v39 = vmax.f32 %v547_v2, 0.0  ;;  %v648_v44 = vpack.c.bf16 %v418_v38, %v417_v33 }
  0xc5   : > { %1172 = vmatmul.bf16.gmra.mxu2 %v1048_v40  ;;  %v580_v40 = vmax.f32 %v548_v31, 0.0 }
  0xc6   : > { %v2742_v8 = vpop.f32.mrf.mxu3 }
  0xc7   : > { %v1050_v50 = vpack.c.bf16 %v580_v40, %v579_v39 }
  0xc8   : > { %v1133_v7 = vpop.f32.mrf.mxu2  ;;  %v733_v26 = vpop.f32.mrf.mxu0 }
  0xc9   : > { %v2746_v51 = vadd.f32 %v1133_v7, %v965_v43  ;;  %v966_v13 = vpop.f32.mrf.mxu1 }
  0xca   : > { %v967_v54 = vadd.f32 %v966_v13, %v733_v26  ;;  %v2150_v26 = vunpack.c.l.bf16 %v2190_v41 }
  0xcc   : > { %v516_v58 = vmul.f32 %v2150_v26, %v2499_v24 }
  0xce   : > { %v2752_v61 = vpop.f32.mrf.mxu3 }
  0xd0   : > { %v1135_v62 = vpop.f32.mrf.mxu2  ;;  %v736_v46 = vpop.f32.mrf.mxu0 }
  0xd1   : > { %v2754_v6 = vadd.f32 %v1135_v62, %v967_v54  ;;  %v969_v15 = vpop.f32.mrf.mxu1  ;;  %v354_v54 = vmul.f32 %v2086_v47, %v2493_v18  ;;  %v549_v18 = vadd.f32 %v2526_v35, %v516_v58 }
  0xd2   : > { %v970_v16 = vadd.f32 %v969_v15, %v736_v46  ;;  %v550_v46 = vadd.f32 %v2526_v35, %v517_v25 }
  0xd3   : > { %775 = vmatmul.bf16.gmra.mxu0 %v647_v63  ;;  %v387_v62 = vadd.f32 %v2514_v27, %v354_v54  ;;  %v388_v63 = vadd.f32 %v2514_v27, %v355_v55  ;;  %v581_v12 = vmax.f32 %v549_v18, 0.0  ;;  %v2007_v27 = vld [vmem:[%s2582_s9 + $0x60] sm:$0xff] }
  0xd4   : > { %1008 = vmatmul.bf16.gmra.mxu1 %v2005_v9  ;;  %v582_v15 = vmax.f32 %v550_v46, 0.0 }
  0xd5   : > { %1177 = vmatmul.bf16.gmra.mxu2 %v1049_v57  ;;  %v419_v36 = vmax.f32 %v387_v62, 0.0  ;;  %v420_v24 = vmax.f32 %v388_v63, 0.0 }
  0xd6   : > { %v2761_v22 = vpop.f32.mrf.mxu3  ;;  %v1051_v21 = vpack.c.bf16 %v582_v15, %v581_v12 }
  0xd7   : > { %v649_v19 = vpack.c.bf16 %v420_v24, %v419_v36 }
  0xd8   : > { %v1138_v45 = vpop.f32.mrf.mxu2  ;;  %v738_v29 = vpop.f32.mrf.mxu0 }
  0xd9   : > { %v2765_v56 = vadd.f32 %v1138_v45, %v970_v16  ;;  %v971_v32 = vpop.f32.mrf.mxu1 }
  0xda   : > { %v972_v4 = vadd.f32 %v971_v32, %v738_v29 }
  0xde   : > { %v2771_v42 = vpop.f32.mrf.mxu3 }
  0xe0   : > { %v1140_v43 = vpop.f32.mrf.mxu2  ;;  %v741_v7 = vpop.f32.mrf.mxu0 }
  0xe1   : > { %v2773_v49 = vadd.f32 %v1140_v43, %v972_v4  ;;  %v974_v53 = vpop.f32.mrf.mxu1 }
  0xe2   : > { %v975_v13 = vadd.f32 %v974_v53, %v741_v7 }
  0xe3   : > { %780 = vmatmul.bf16.gmra.mxu0 %v648_v44 }
  0xe4   : > { %1013 = vmatmul.bf16.gmra.mxu1 %v2006_v14  ;;  %v2797_v14 = vperm.slane %v2476_v11, 4 }
  0xe5   : > { %1182 = vmatmul.bf16.gmra.mxu2 %v1050_v50 }
  0xe6   : > { %v1024_v59 = vpop.f32.mrf.mxu3  ;;  %v2803_v52 = vadd.f32 %v2797_v14, %v2735_v34  ;;  %v2807_v55 = vadd.f32 %v2797_v14, %v2727_v17  ;;  %v2811_v58 = vadd.f32 %v2797_v14, %v2746_v51  ;;  %v2827_v51 = vadd.f32 %v2797_v14, %v2773_v49 }
  0xe7   : > { %v2781_v37 = vadd.f32 %v1024_v59, %v2723_v10  ;;  %v2817_v59 = vadd.f32 %v2797_v14, %v2754_v6 }
  0xe8   : > { %v1143_v60 = vpop.f32.mrf.mxu2  ;;  %v743_v3 = vpop.f32.mrf.mxu0  ;;  %v1273_v25 = vmax.f32 %v2807_v55, %v2803_v52 }
  0xe9   : > { %v1214_v0 = vadd.f32 %v1143_v60, %v975_v13  ;;  %v976_v9 = vpop.f32.mrf.mxu1  ;;  %v2822_v60 = vadd.f32 %v2797_v14, %v2765_v56 }
  0xea   : > { %v977_v57 = vadd.f32 %v976_v9, %v743_v3  ;;  %v1274_v34 = vmax.f32 %v2811_v58, %v1273_v25 }
  0xeb   : > { %v2831_v9 = vadd.f32 %v2797_v14, %v1214_v0 }
  0xec   : > { %v1275_v63 = vmax.f32 %v2817_v59, %v1274_v34 }
  0xee   : > { %v2787_v10 = vpop.f32.mrf.mxu3  ;;  %v1276_v6 = vmax.f32 %v2822_v60, %v1275_v63 }
  0xf0   : > { %v1145_v16 = vpop.f32.mrf.mxu2  ;;  %v746_v1 = vpop.f32.mrf.mxu0 }
  0xf1   : > { %v1215_v20 = vadd.f32 %v1145_v16, %v977_v57  ;;  %v979_v45 = vpop.f32.mrf.mxu1  ;;  %v1277_v57 = vmax.f32 %v2827_v51, %v1276_v6 }
  0xf2   : > { %v980_v23 = vadd.f32 %v979_v45, %v746_v1 }
  0xf3   : > { %785 = vmatmul.bf16.gmra.mxu0 %v649_v19  ;;  %v2835_v56 = vadd.f32 %v2797_v14, %v1215_v20  ;;  %v1278_v36 = vmax.f32 %v2831_v9, %v1277_v57 }
  0xf4   : > { %1018 = vmatmul.bf16.gmra.mxu1 %v2007_v27 }
  0xf5   : > { %1187 = vmatmul.bf16.gmra.mxu2 %v1051_v21  ;;  %v1279_v15 = vmax.f32 %v2835_v56, %v1278_v36 }
  0xf6   : > { %v2790_v35 = vpop.f32.mrf.mxu3 }
  0xf7   : > { %v1030_v25 = vadd.f32 %v2790_v35, %v2742_v8 }
  0xf8   : > { %v1148_v28 = vpop.f32.mrf.mxu2  ;;  %v748_v2 = vpop.f32.mrf.mxu0 }
  0xf9   : > { %v1216_v29 = vadd.f32 %v1148_v28, %v980_v23  ;;  %v981_v31 = vpop.f32.mrf.mxu1 }
  0xfa   : > { %v982_v32 = vadd.f32 %v981_v31, %v748_v2 }
  0xfb   : > { %v2839_v24 = vadd.f32 %v2797_v14, %v1216_v29 }
  0xfd   : > { %v1280_v1 = vmax.f32 %v2839_v24, %v1279_v15 }
  0xfe   : > { %v2792_v4 = vpop.f32.mrf.mxu3 }
  0xff   : > { %v1032_v6 = vadd.f32 %v2792_v4, %v2752_v61 }
 0x100   : > { %v1150_v33 = vpop.f32.mrf.mxu2  ;;  %v751_v39 = vpop.f32.mrf.mxu0 }
 0x101   : > { %v1217_v38 = vadd.f32 %v1150_v33, %v982_v32  ;;  %v984_v40 = vpop.f32.mrf.mxu1 }
 0x102   : > { %v985_v5 = vadd.f32 %v984_v40, %v751_v39 }
 0x103   : > { %v2843_v16 = vadd.f32 %v2797_v14, %v1217_v38 }
 0x105   : > { %v1281_v20 = vmax.f32 %v2843_v16, %v1280_v1 }
 0x106   : > { %v2794_v41 = vpop.f32.mrf.mxu3 }
 0x107   : > { %v1035_v1 = vadd.f32 %v2794_v41, %v2761_v22 }
 0x108   : > { %v1153_v43 = vpop.f32.mrf.mxu2  ;;  %v753_v47 = vpop.f32.mrf.mxu0 }
 0x109   : > { %v1218_v44 = vadd.f32 %v1153_v43, %v985_v5  ;;  %v986_v48 = vpop.f32.mrf.mxu1  ;;  %v1027_v43 = vadd.f32 %v2787_v10, %v2733_v30 }
 0x10a   : > { %v987_v7 = vadd.f32 %v986_v48, %v753_v47 }
 0x10b   : > { %v2847_v27 = vadd.f32 %v2797_v14, %v1218_v44 }
 0x10d   : > { %v1282_v45 = vmax.f32 %v2847_v27, %v1281_v20 }
 0x10e   : > { %v2799_v50 = vpop.f32.mrf.mxu3 }
 0x10f   : > { %v1037_v22 = vadd.f32 %v2799_v50, %v2771_v42 }
 0x110   : > { %v1155_v26 = vpop.f32.mrf.mxu2  ;;  %v756_v13 = vpop.f32.mrf.mxu0 }
 0x111   : > { %v1219_v53 = vadd.f32 %v1155_v26, %v987_v7  ;;  %v989_v54 = vpop.f32.mrf.mxu1 }
 0x112   : > { %v990_v11 = vadd.f32 %v989_v54, %v756_v13 }
 0x113   : > { %v2851_v21 = vadd.f32 %v2797_v14, %v1219_v53 }
 0x115   : > { %v1283_v31 = vmax.f32 %v2851_v21, %v1282_v45 }
 0x116   : > { %v1193_v17 = vpop.f32.mrf.mxu3 }
 0x117   : > { %v1234_v32 = vadd.f32 %v1193_v17, %v2781_v37 }
 0x118   : > { %v1158_v62 = vpop.f32.mrf.mxu2  ;;  %v758_v18 = vpop.f32.mrf.mxu0 }
 0x119   : > { %v1220_v3 = vadd.f32 %v1158_v62, %v990_v11  ;;  %v991_v46 = vpop.f32.mrf.mxu1  ;;  %v2863_v44 = vadd.f32 %v2797_v14, %v1234_v32 }
 0x11a   : > { %v992_v28 = vadd.f32 %v991_v46, %v758_v18 }
 0x11b   : > { %v2855_v23 = vadd.f32 %v2797_v14, %v1220_v3 }
 0x11d   : > { %v1284_v40 = vmax.f32 %v2855_v23, %v1283_v31 }
 0x11e   : > { %v1195_v49 = vpop.f32.mrf.mxu3 }
 0x11f   : > { %v1285_v48 = vmax.f32 %v2863_v44, %v1284_v40  ;;  %v1235_v7 = vadd.f32 %v1195_v49, %v1027_v43  ;;  %v1310_v40 = vlaneseq }
 0x120   : > { %v1160_v12 = vpop.f32.mrf.mxu2  ;;  %v761_v19 = vpop.f32.mrf.mxu0 }
 0x121   : > { %v994_v0 = vpop.f32.mrf.mxu1  ;;  %v1221_v33 = vadd.f32 %v1160_v12, %v992_v28  ;;  %v2873_v30 = vadd.f32 %v2797_v14, %v1235_v7 }
 0x122   : > { %v995_v5 = vadd.f32 %v994_v0, %v761_v19 }
 0x123   : > { %v2866_v47 = vadd.f32 %v2797_v14, %v1221_v33 }
 0x125   : > { %v1286_v13 = vmax.f32 %v2866_v47, %v1285_v48 }
 0x126   : > { %v1198_v29 = vpop.f32.mrf.mxu3 }
 0x127   : > { %v1287_v17 = vmax.f32 %v2873_v30, %v1286_v13  ;;  %v1236_v62 = vadd.f32 %v1198_v29, %v1030_v25 }
 0x128   : > { %v1163_v2 = vpop.f32.mrf.mxu2  ;;  %v763_v38 = vpop.f32.mrf.mxu0 }
 0x129   : > { %v996_v39 = vpop.f32.mrf.mxu1  ;;  %v1222_v26 = vadd.f32 %v1163_v2, %v995_v5  ;;  %v2883_v8 = vadd.f32 %v2797_v14, %v1236_v62 }
 0x12a   : > { %v997_v34 = vadd.f32 %v996_v39, %v763_v38 }
 0x12b   : > { %v2876_v10 = vadd.f32 %v2797_v14, %v1222_v26  ;;  %v2909_v26 = vshrl.u32 %v1310_v40, 7 }
 0x12d   : > { %v1288_v3 = vmax.f32 %v2876_v10, %v1287_v17  ;;  %v1326_v50 = vadd.s32 120, %v2909_v26 }
 0x12e   : > { %v1200_v53 = vpop.f32.mrf.mxu3 }
 0x12f   : > { %v1289_v12 = vmax.f32 %v2883_v8, %v1288_v3  ;;  %v1237_v15 = vadd.f32 %v1200_v53, %v1032_v6 }
 0x130   : > { %v1165_v37 = vpop.f32.mrf.mxu2  ;;  %v766_v54 = vpop.f32.mrf.mxu0 }
 0x131   : > { %v999_v11 = vpop.f32.mrf.mxu1  ;;  %v1223_v63 = vadd.f32 %v1165_v37, %v997_v34  ;;  %v2893_v61 = vadd.f32 %v2797_v14, %v1237_v15  ;;  %v2911_v37 = vand.u32 127, %v1310_v40  ;;  %v2264_v34 = vld [vmem:[%s3279_s3] sm:$0xff] }
 0x132   : > { %v1000_v18 = vadd.f32 %v999_v11, %v766_v54  ;;  %v2925_v17 = vperm.slane %v2264_v34, 5 }
 0x133   : > { %v2886_v35 = vadd.f32 %v2797_v14, %v1223_v63  ;;  %v2916_v54 = vadd.s32 4294967295, %v2911_v37  ;;  %vm1410_vm1 = vcmp.eq.s32.totalorder %v1326_v50, %v2911_v37  ;;  %v2329_v63 = vmov 0.0  }
 0x135   : > { %v1290_v0 = vmax.f32 %v2886_v35, %v1289_v12  ;;  %vm1345_vm0 = vcmp.eq.s32.totalorder %v1326_v50, %v2916_v54 }
 0x136   : > { %v1203_v36 = vpop.f32.mrf.mxu3  ;;  %v1953_v3 = vsel %vm1345_vm0, 1.0, %v2329_v63 }
 0x137   : > { %v1291_v28 = vmax.f32 %v2893_v61, %v1290_v0  ;;  %v1238_v29 = vadd.f32 %v1203_v36, %v1035_v1  ;;  %v1394_v6 = vmul.f32 %v1953_v3, %v2925_v17  ;;  %v2937_v36 = vperm.slane %v2264_v34, 7 }
 0x138   : > { %v1168_v46 = vpop.f32.mrf.mxu2  ;;  %v768_v57 = vpop.f32.mrf.mxu0  ;;  %v1324_v0 = vadd.s32 104, %v2909_v26  ;;  %v1323_v3 = vadd.s32 96, %v2909_v26 }
 0x139   : > { %v1001_v49 = vpop.f32.mrf.mxu1  ;;  %v1224_v19 = vadd.f32 %v1168_v46, %v1000_v18  ;;  %v2903_v41 = vadd.f32 %v2797_v14, %v1238_v29  ;;  %v1969_v18 = vsel %vm1410_vm1, 1.0, %v2329_v63  ;;  %v2931_v46 = vperm.slane %v2264_v34, 6 }
 0x13a   : > { %v1002_v20 = vadd.f32 %v1001_v49, %v768_v57  ;;  %v2935_v57 = vadd.s32 1, %v2911_v37  ;;  %v1325_v49 = vadd.s32 112, %v2909_v26  ;;  %vm1343_vm6 = vcmp.eq.s32.totalorder %v1324_v0, %v2916_v54 }
 0x13b   : > { %v2896_v4 = vadd.f32 %v2797_v14, %v1224_v19  ;;  %v1459_v19 = vmul.f32 %v1969_v18, %v2931_v46  ;;  %vm1408_vm7 = vcmp.eq.s32.totalorder %v1324_v0, %v2911_v37  ;;  %vm1342_vm9 = vcmp.eq.s32.totalorder %v1323_v3, %v2916_v54 }
 0x13c   : > { %vm1492_vm2 = vcmp.eq.s32.totalorder %v1326_v50, %v2935_v57  ;;  %vm1344_vm3 = vcmp.eq.s32.totalorder %v1325_v49, %v2916_v54  ;;  %vm1409_vm4 = vcmp.eq.s32.totalorder %v1325_v49, %v2911_v37  ;;  %vm1491_vm5 = vcmp.eq.s32.totalorder %v1325_v49, %v2935_v57 }
 0x13d   : > { %v1295_v33 = vmax.f32 %v1291_v28, %v2896_v4  ;;  %v1475_v28 = vadd.f32 %v1459_v19, %v1394_v6  ;;  %v1985_v29 = vsel %vm1492_vm2, 1.0, %v2329_v63  ;;  %vm1490_vm8 = vcmp.eq.s32.totalorder %v1324_v0, %v2935_v57 }
 0x13e   : > { %v1205_v38 = vpop.f32.mrf.mxu3  ;;  %v1967_v50 = vsel %vm1408_vm7, 1.0, %v2329_v63  ;;  %v1322_v49 = vadd.s32 88, %v2909_v26  ;;  %vm1407_vm10 = vcmp.eq.s32.totalorder %v1323_v3, %v2911_v37  ;;  %vm1489_vm11 = vcmp.eq.s32.totalorder %v1323_v3, %v2935_v57 }
 0x13f   : > { %v1299_v5 = vmax.f32 %v1295_v33, %v2903_v41  ;;  %v1239_v43 = vadd.f32 %v1205_v38, %v1037_v22  ;;  %v1968_v38 = vsel %vm1409_vm4, 1.0, %v2329_v63  ;;  %v1984_v22 = vsel %vm1491_vm5, 1.0, %v2329_v63 }
 0x140   : > { %v1170_v45 = vpop.f32.mrf.mxu2  ;;  %v771_v31 = vpop.f32.mrf.mxu0  ;;  %v1457_v34 = vmul.f32 %v1967_v50, %v2931_v46  ;;  %vm1341_vm12 = vcmp.eq.s32.totalorder %v1322_v49, %v2916_v54  ;;  %vm1406_vm13 = vcmp.eq.s32.totalorder %v1322_v49, %v2911_v37  ;;  %vm1488_vm14 = vcmp.eq.s32.totalorder %v1322_v49, %v2935_v57 }
 0x141   : > { %v1225_v2 = vadd.f32 %v1170_v45, %v1002_v20  ;;  %v1004_v32 = vpop.f32.mrf.mxu1  ;;  %v2919_v11 = vadd.f32 %v2797_v14, %v1239_v43  ;;  %v1458_v43 = vmul.f32 %v1968_v38, %v2931_v46  ;;  %v1981_v50 = vsel %vm1488_vm14, 1.0, %v2329_v63 }
 0x142   : > { %v1005_v48 = vadd.f32 %v1004_v32, %v771_v31  ;;  %v1541_v32 = vmul.f32 %v1985_v29, %v2937_v36  ;;  %v1982_v29 = vsel %vm1489_vm11, 1.0, %v2329_v63 }
 0x143   : > { %v2906_v39 = vadd.f32 %v2797_v14, %v1225_v2  ;;  %v1952_v2 = vsel %vm1344_vm3, 1.0, %v2329_v63  ;;  %v1538_v38 = vmul.f32 %v1982_v29, %v2937_v36 }
 0x144   : > { %v1393_v33 = vmul.f32 %v1952_v2, %v2925_v17 }
 0x145   : > { %v1292_v53 = vmax.f32 %v2906_v39, %v1299_v5 }
 0x147   : > { %v1296_v62 = vmax.f32 %v1292_v53, %v2919_v11 }
 0x148   : > { %v1173_v7 = vpop.f32.mrf.mxu2  ;;  %v773_v13 = vpop.f32.mrf.mxu0 }
 0x149   : > { %v1006_v42 = vpop.f32.mrf.mxu1  ;;  %v1226_v25 = vadd.f32 %v1173_v7, %v1005_v48  ;;  %v1540_v48 = vmul.f32 %v1984_v22, %v2937_v36  ;;  %v1557_v7 = vadd.f32 %v1541_v32, %v1475_v28  ;;  %v1966_v28 = vsel %vm1407_vm10, 1.0, %v2329_v63 }
 0x14a   : > { %v1007_v15 = vadd.f32 %v1006_v42, %v773_v13  ;;  %v1474_v13 = vadd.f32 %v1458_v43, %v1393_v33  ;;  %v1951_v42 = vsel %vm1343_vm6, 1.0, %v2329_v63  ;;  %v1456_v33 = vmul.f32 %v1966_v28, %v2931_v46 }
 0x14b   : > { %v2941_v12 = vadd.f32 %v2797_v14, %v1226_v25  ;;  %1558 = vmatpush.msrb.mxu3 %v1557_v7  ;;  %v1392_v25 = vmul.f32 %v1951_v42, %v2925_v17  ;;  %v1949_v7 = vsel %vm1341_vm12, 1.0, %v2329_v63 }
 0x14c   : > { %v1556_v18 = vadd.f32 %v1540_v48, %v1474_v13  ;;  %v1390_v42 = vmul.f32 %v1949_v7, %v2925_v17 }
 0x14d   : > { %v2956_v40 = vmax.f32 %v1296_v62, %v2941_v12  ;;  %v1983_v62 = vsel %vm1490_vm8, 1.0, %v2329_v63  ;;  %v1473_v0 = vadd.f32 %v1457_v34, %v1392_v25  ;;  %v1537_v34 = vmul.f32 %v1981_v50, %v2937_v36 }
 0x14e   : > { %v1539_v6 = vmul.f32 %v1983_v62, %v2937_v36  ;;  %1559 = vmatpush.msrb.mxu3 %v1556_v18 }
 0x150   : > { %v1175_v1 = vpop.f32.mrf.mxu2  ;;  %v776_v45 = vpop.f32.mrf.mxu0 }
 0x151   : > { %v1227_v20 = vadd.f32 %v1175_v1, %v1007_v15  ;;  %v1009_v31 = vpop.f32.mrf.mxu1  ;;  %v1321_v15 = vadd.s32 80, %v2909_v26 }
 0x152   : > { %v1010_v53 = vadd.f32 %v1009_v31, %v776_v45  ;;  %v1950_v45 = vsel %vm1342_vm9, 1.0, %v2329_v63  ;;  %v1555_v31 = vadd.f32 %v1539_v6, %v1473_v0 }
 0x153   : > { %v2959_v5 = vadd.f32 %v2797_v14, %v1227_v20  ;;  %v1391_v32 = vmul.f32 %v1950_v45, %v2925_v17  ;;  %vm1340_vm15 = vcmp.eq.s32.totalorder %v1321_v15, %v2916_v54  ;;  %vm1405_vm0 = vcmp.eq.s32.totalorder %v1321_v15, %v2911_v37 }
 0x154   : > { %1560 = vmatpush.msrb.mxu3 %v1555_v31  ;;  %v1948_v3 = vsel %vm1340_vm15, 1.0, %v2329_v63  ;;  %v1964_v18 = vsel %vm1405_vm0, 1.0, %v2329_v63  ;;  %vm1487_vm1 = vcmp.eq.s32.totalorder %v1321_v15, %v2935_v57 }
 0x155   : > { %v1302_v22 = vmax.f32 %v2959_v5, %v2956_v40  ;;  %v1472_v48 = vadd.f32 %v1456_v33, %v1391_v32  ;;  %v1389_v49 = vmul.f32 %v1948_v3, %v2925_v17  ;;  %v1980_v0 = vsel %vm1487_vm1, 1.0, %v2329_v63 }
 0x156   : > { %v1536_v29 = vmul.f32 %v1980_v0, %v2937_v36 }
 0x157   : > { %v1554_v25 = vadd.f32 %v1538_v38, %v1472_v48 }
 0x158   : > { %v1178_v19 = vpop.f32.mrf.mxu2  ;;  %v778_v20 = vpop.f32.mrf.mxu0 }
 0x159   : > { %v1228_v1 = vadd.f32 %v1178_v19, %v1010_v53  ;;  %v1011_v2 = vpop.f32.mrf.mxu1  ;;  %v1965_v53 = vsel %vm1406_vm13, 1.0, %v2329_v63  ;;  %1561 = vmatpush.msrb.mxu3 %v1554_v25  ;;  %v1454_v19 = vmul.f32 %v1964_v18, %v2931_v46 }
 0x15a   : > { %v1012_v13 = vadd.f32 %v1011_v2, %v778_v20  ;;  %v1455_v40 = vmul.f32 %v1965_v53, %v2931_v46  ;;  %v1319_v2 = vadd.s32 64, %v2909_v26 }
 0x15b   : > { %v2987_v43 = vadd.f32 %v2797_v14, %v1228_v1  ;;  %v1320_v1 = vadd.s32 72, %v2909_v26  ;;  %v1470_v32 = vadd.f32 %v1454_v19, %v1389_v49 }
 0x15c   : > { %v1471_v62 = vadd.f32 %v1455_v40, %v1390_v42  ;;  %vm1338_vm5 = vcmp.eq.s32.totalorder %v1319_v2, %v2916_v54  ;;  %vm1403_vm6 = vcmp.eq.s32.totalorder %v1319_v2, %v2911_v37  ;;  %vm1485_vm7 = vcmp.eq.s32.totalorder %v1319_v2, %v2935_v57 }
 0x15d   : > { %vm1339_vm2 = vcmp.eq.s32.totalorder %v1320_v1, %v2916_v54  ;;  %vm1404_vm3 = vcmp.eq.s32.totalorder %v1320_v1, %v2911_v37  ;;  %vm1486_vm4 = vcmp.eq.s32.totalorder %v1320_v1, %v2935_v57  ;;  %v3013_v15 = vmax.f32 %v2987_v43, %v1302_v22 }
 0x15e   : > { %v1553_v28 = vadd.f32 %v1537_v34, %v1471_v62  ;;  %v1947_v38 = vsel %vm1339_vm2, 1.0, %v2329_v63  ;;  %v1963_v48 = vsel %vm1404_vm3, 1.0, %v2329_v63  ;;  %v1552_v7 = vadd.f32 %v1536_v29, %v1470_v32 }
 0x15f   : > { %v1388_v53 = vmul.f32 %v1947_v38, %v2925_v17  ;;  %v1979_v42 = vsel %vm1486_vm4, 1.0, %v2329_v63  ;;  %v1946_v25 = vsel %vm1338_vm5, 1.0, %v2329_v63  ;;  %v1962_v34 = vsel %vm1403_vm6, 1.0, %v2329_v63 }
 0x160   : > { %v1180_v6 = vpop.f32.mrf.mxu2  ;;  %v781_v45 = vpop.f32.mrf.mxu0  ;;  %1562 = vmatpush.msrb.mxu3 %v1553_v28  ;;  %v1535_v50 = vmul.f32 %v1979_v42, %v2937_v36  ;;  %v1387_v62 = vmul.f32 %v1946_v25, %v2925_v17  ;;  %v1452_v3 = vmul.f32 %v1962_v34, %v2931_v46  ;;  %v1978_v18 = vsel %vm1485_vm7, 1.0, %v2329_v63 }
 0x161   : > { %v1229_v20 = vadd.f32 %v1180_v6, %v1012_v13  ;;  %v1014_v31 = vpop.f32.mrf.mxu1  ;;  %v1453_v13 = vmul.f32 %v1963_v48, %v2931_v46  ;;  %v1318_v6 = vadd.s32 56, %v2909_v26  ;;  %v1534_v0 = vmul.f32 %v1978_v18, %v2937_v36 }
 0x162   : > { %v1015_v40 = vadd.f32 %v1014_v31, %v781_v45  ;;  %1563 = vmatpush.msrb.mxu3 %v1552_v7  ;;  %v1317_v1 = vadd.s32 48, %v2909_v26  ;;  %v1468_v29 = vadd.f32 %v1452_v3, %v1387_v62 }
 0x163   : > { %v3016_v33 = vadd.f32 %v2797_v14, %v1229_v20  ;;  %v1469_v22 = vadd.f32 %v1453_v13, %v1388_v53  ;;  %v1316_v20 = vadd.s32 40, %v2909_v26  ;;  %vm1337_vm8 = vcmp.eq.s32.totalorder %v1318_v6, %v2916_v54 }
 0x164   : > { %vm1402_vm9 = vcmp.eq.s32.totalorder %v1318_v6, %v2911_v37  ;;  %v1945_v31 = vsel %vm1337_vm8, 1.0, %v2329_v63  ;;  %vm1484_vm10 = vcmp.eq.s32.totalorder %v1318_v6, %v2935_v57  ;;  %vm1336_vm11 = vcmp.eq.s32.totalorder %v1317_v1, %v2916_v54 }
 0x165   : > { %v1551_v19 = vadd.f32 %v1535_v50, %v1469_v22  ;;  %v1961_v32 = vsel %vm1402_vm9, 1.0, %v2329_v63  ;;  %v1297_v38 = vmax.f32 %v3013_v15, %v3016_v33  ;;  %v1550_v7 = vadd.f32 %v1534_v0, %v1468_v29 }
 0x166   : > { %v1386_v53 = vmul.f32 %v1945_v31, %v2925_v17  ;;  %v1451_v13 = vmul.f32 %v1961_v32, %v2931_v46  ;;  %v1977_v42 = vsel %vm1484_vm10, 1.0, %v2329_v63  ;;  %vm1401_vm12 = vcmp.eq.s32.totalorder %v1317_v1, %v2911_v37 }
 0x167   : > { %1564 = vmatpush.msrb.mxu3 %v1551_v19  ;;  %v1533_v22 = vmul.f32 %v1977_v42, %v2937_v36  ;;  %v1960_v25 = vsel %vm1401_vm12, 1.0, %v2329_v63  ;;  %vm1483_vm13 = vcmp.eq.s32.totalorder %v1317_v1, %v2935_v57  ;;  %vm1335_vm14 = vcmp.eq.s32.totalorder %v1316_v20, %v2916_v54 }
 0x168   : > { %v1183_v49 = vpop.f32.mrf.mxu2  ;;  %v783_v28 = vpop.f32.mrf.mxu0  ;;  %v1467_v34 = vadd.f32 %v1451_v13, %v1386_v53  ;;  %v1450_v62 = vmul.f32 %v1960_v25, %v2931_v46  ;;  %v1976_v3 = vsel %vm1483_vm13, 1.0, %v2329_v63  ;;  %v1943_v18 = vsel %vm1335_vm14, 1.0, %v2329_v63 }
 0x169   : > { %v1230_v45 = vadd.f32 %v1183_v49, %v1015_v40  ;;  %v1016_v2 = vpop.f32.mrf.mxu1  ;;  %v1944_v40 = vsel %vm1336_vm11, 1.0, %v2329_v63  ;;  %1565 = vmatpush.msrb.mxu3 %v1550_v7  ;;  %vm1400_vm15 = vcmp.eq.s32.totalorder %v1316_v20, %v2911_v37  ;;  %vm1482_vm0 = vcmp.eq.s32.totalorder %v1316_v20, %v2935_v57 }
 0x16a   : > { %v1017_v50 = vadd.f32 %v1016_v2, %v783_v28  ;;  %v1385_v15 = vmul.f32 %v1944_v40, %v2925_v17  ;;  %v1549_v49 = vadd.f32 %v1533_v22, %v1467_v34  ;;  %v1532_v0 = vmul.f32 %v1976_v3, %v2937_v36 }
 0x16b   : > { %v3045_v48 = vadd.f32 %v2797_v14, %v1230_v45  ;;  %v1384_v45 = vmul.f32 %v1943_v18, %v2925_v17  ;;  %v1959_v1 = vsel %vm1400_vm15, 1.0, %v2329_v63  ;;  %v1975_v2 = vsel %vm1482_vm0, 1.0, %v2329_v63 }
 0x16c   : > { %v1466_v19 = vadd.f32 %v1450_v62, %v1385_v15  ;;  %v1315_v31 = vadd.s32 32, %v2909_v26  ;;  %1566 = vmatpush.msrb.mxu3 %v1549_v49  ;;  %v1449_v20 = vmul.f32 %v1959_v1, %v2931_v46  ;;  %v1531_v53 = vmul.f32 %v1975_v2, %v2937_v36 }
 0x16d   : > { %v1314_v13 = vadd.s32 24, %v2909_v26  ;;  %v3071_v42 = vmax.f32 %v3045_v48, %v1297_v38  ;;  %v1313_v1 = vadd.s32 16, %v2909_v26  ;;  %vm1330_vm13 = vcmp.eq.s32.totalorder %v2909_v26, %v2916_v54 }
 0x16e   : > { %v1548_v7 = vadd.f32 %v1532_v0, %v1466_v19  ;;  %vm1334_vm1 = vcmp.eq.s32.totalorder %v1315_v31, %v2916_v54  ;;  %vm1399_vm2 = vcmp.eq.s32.totalorder %v1315_v31, %v2911_v37  ;;  %vm1481_vm3 = vcmp.eq.s32.totalorder %v1315_v31, %v2935_v57 }
 0x16f   : > { %v1942_v22 = vsel %vm1334_vm1, 1.0, %v2329_v63  ;;  %v1958_v15 = vsel %vm1399_vm2, 1.0, %v2329_v63  ;;  %v1974_v62 = vsel %vm1481_vm3, 1.0, %v2329_v63  ;;  %vm1333_vm4 = vcmp.eq.s32.totalorder %v1314_v13, %v2916_v54 }
 0x170   : > { %v1185_v6 = vpop.f32.mrf.mxu2  ;;  %v786_v29 = vpop.f32.mrf.mxu0  ;;  %1567 = vmatpush.msrb.mxu3 %v1548_v7  ;;  %v1383_v34 = vmul.f32 %v1942_v22, %v2925_v17  ;;  %v1448_v38 = vmul.f32 %v1958_v15, %v2931_v46  ;;  %v1530_v18 = vmul.f32 %v1974_v62, %v2937_v36  ;;  %vm1398_vm5 = vcmp.eq.s32.totalorder %v1314_v13, %v2911_v37 }
 0x171   : > { %v1231_v28 = vadd.f32 %v1185_v6, %v1017_v50  ;;  %v1019_v32 = vpop.f32.mrf.mxu1  ;;  %v1465_v50 = vadd.f32 %v1449_v20, %v1384_v45  ;;  %v1941_v49 = vsel %vm1333_vm4, 1.0, %v2329_v63  ;;  %v1957_v19 = vsel %vm1398_vm5, 1.0, %v2329_v63 }
 0x172   : > { %v1020_v25 = vadd.f32 %v1019_v32, %v786_v29  ;;  %v1464_v6 = vadd.f32 %v1448_v38, %v1383_v34  ;;  %vm1480_vm6 = vcmp.eq.s32.totalorder %v1314_v13, %v2935_v57  ;;  %v1382_v45 = vmul.f32 %v1941_v49, %v2925_v17 }
 0x173   : > { %v3074_v40 = vadd.f32 %v2797_v14, %v1231_v28  ;;  %v1547_v3 = vadd.f32 %v1531_v53, %v1465_v50  ;;  %v1447_v28 = vmul.f32 %v1957_v19, %v2931_v46  ;;  %v1973_v29 = vsel %vm1480_vm6, 1.0, %v2329_v63 }
 0x174   : > { %v1546_v31 = vadd.f32 %v1530_v18, %v1464_v6  ;;  %v1529_v32 = vmul.f32 %v1973_v29, %v2937_v36  ;;  %v1312_v7 = vadd.s32 8, %v2909_v26  ;;  %vm1332_vm7 = vcmp.eq.s32.totalorder %v1313_v1, %v2916_v54 }
 0x175   : > { %1568 = vmatpush.msrb.mxu3 %v1547_v3  ;;  %v1463_v50 = vadd.f32 %v1447_v28, %v1382_v45  ;;  %vm1397_vm8 = vcmp.eq.s32.totalorder %v1313_v1, %v2911_v37  ;;  %vm1479_vm9 = vcmp.eq.s32.totalorder %v1313_v1, %v2935_v57  ;;  %v1298_v13 = vmax.f32 %v3071_v42, %v3074_v40 }
 0x176   : > { %v1940_v15 = vsel %vm1332_vm7, 1.0, %v2329_v63  ;;  %v1972_v3 = vsel %vm1479_vm9, 1.0, %v2329_v63  ;;  %vm1331_vm10 = vcmp.eq.s32.totalorder %v1312_v7, %v2916_v54  ;;  %vm1396_vm11 = vcmp.eq.s32.totalorder %v1312_v7, %v2911_v37 }
 0x177   : > { %1569 = vmatpush.msrb.mxu3 %v1546_v31  ;;  %v1545_v34 = vadd.f32 %v1529_v32, %v1463_v50  ;;  %v1381_v38 = vmul.f32 %v1940_v15, %v2925_v17  ;;  %v1528_v6 = vmul.f32 %v1972_v3, %v2937_v36  ;;  %v1939_v49 = vsel %vm1331_vm10, 1.0, %v2329_v63 }
 0x178   : > { %v1188_v0 = vpop.f32.mrf.mxu2  ;;  %v788_v20 = vpop.f32.mrf.mxu0  ;;  %v1955_v19 = vsel %vm1396_vm11, 1.0, %v2329_v63  ;;  %vm1478_vm12 = vcmp.eq.s32.totalorder %v1312_v7, %v2935_v57  ;;  %v1938_v31 = vsel %vm1330_vm13, 1.0, %v2329_v63  ;;  %vm1395_vm14 = vcmp.eq.s32.totalorder %v2909_v26, %v2911_v37 }
 0x179   : > { %v1232_v2 = vadd.f32 %v1188_v0, %v1020_v25  ;;  %v1021_v53 = vpop.f32.mrf.mxu1  ;;  %v1956_v25 = vsel %vm1397_vm8, 1.0, %v2329_v63  ;;  %1570 = vmatpush.msrb.mxu3 %v1545_v34  ;;  %v1380_v0 = vmul.f32 %v1939_v49, %v2925_v17  ;;  %v1445_v45 = vmul.f32 %v1955_v19, %v2931_v46 }
 0x17a   : > { %v1446_v62 = vmul.f32 %v1956_v25, %v2931_v46  ;;  %v1022_v18 = vadd.f32 %v1021_v53, %v788_v20  ;;  %v1971_v28 = vsel %vm1478_vm12, 1.0, %v2329_v63  ;;  %v1379_v20 = vmul.f32 %v1938_v31, %v2925_v17 }
 0x17b   : > { %v3102_v22 = vadd.f32 %v2797_v14, %v1232_v2  ;;  %v1527_v2 = vmul.f32 %v1971_v28, %v2937_v36  ;;  %v1461_v7 = vadd.f32 %v1445_v45, %v1380_v0  ;;  %v1954_v53 = vsel %vm1395_vm14, 1.0, %v2329_v63 }
 0x17c   : > { %v1462_v42 = vadd.f32 %v1446_v62, %v1381_v38  ;;  %v1444_v50 = vmul.f32 %v1954_v53, %v2931_v46  ;;  %vm1477_vm15 = vcmp.eq.s32.totalorder %v2909_v26, %v2935_v57 }
 0x17d   : > { %v1301_v54 = vmax.f32 %v3102_v22, %v1298_v13  ;;  %v1543_v25 = vadd.f32 %v1527_v2, %v1461_v7  ;;  %v1970_v37 = vsel %vm1477_vm15, 1.0, %v2329_v63 }
 0x17e   : > { %v1544_v1 = vadd.f32 %v1528_v6, %v1462_v42  ;;  %v1460_v34 = vadd.f32 %v1444_v50, %v1379_v20  ;;  %v1526_v38 = vmul.f32 %v1970_v37, %v2937_v36 }
 0x180   : > { %v1190_v29 = vpop.f32.mrf.mxu2  ;;  %1571 = vmatpush.msrb.mxu3 %v1544_v1  ;;  %v1542_v62 = vadd.f32 %v1526_v38, %v1460_v34  ;;  %v264_v1 = vld [vmem:[%s3279_s3 + $0x8] sm:$0x1] }
 0x181   : > { %v1233_v32 = vadd.f32 %v1190_v29, %v1022_v18 }
 0x182   : > { %1572 = vmatpush.msrb.mxu3 %v1543_v25 }
 0x183   : > { %v3131_v15 = vadd.f32 %v2797_v14, %v1233_v32 }
 0x184   : > { %1573 = vmatpush.msrb.mxu3 %v1542_v62 }
 0x185   : > { %v1303_v17 = vmax.f32 %v1301_v54, %v3131_v15 }
 0x187   : > { %v1304_v3 = vrot.slane %v1303_v17, 4 }
 0x189   : > { %v1305_v46 = vmax.f32 %v1303_v17, %v1304_v3 }
 0x18b   : > { %v1306_v18 = vrot.slane %v1305_v46, 2 }
 0x18d   : > { %v1307_v26 = vmax.f32 %v1305_v46, %v1306_v18 }
 0x18f   : > { %v1308_v57 = vrot.slane %v1307_v26, 1 }
 0x191   : > { %v1309_v13 = vmax.f32 %v1307_v26, %v1308_v57 }
 0x193   : > { %1574 = vmatmul.f32.vlgmr.msrb.gmra.mxu3 %v1309_v13 }
 0x216   : > { %v1575_v14 = vpop.f32.mrf.mxu3 }
 0x217   : > { %v1986_v6 = vmul.f32 -1.442695, %v1575_v14 }
 0x219   : > { %2260 = vpow2.f32 %v1986_v6 }
 0x21f   : > { %v2261_v42 = vpop.eup %2260 }
 0x220   : > { %v1581_v63 = vadd.f32 1.0, %v2261_v42 }
 0x222   : > { %2262 = vrcp.f32 %v1581_v63  ;;  %v1593_v0 = vand.u32 2147483648, %v1581_v63  ;;  %v1591_v28 = vand.u32 2147483647, %v1581_v63  ;;  %vm1587_vm1 = vweird.f32 %v1581_v63 }
 0x224   : > { %v1594_v2 = vor.u32 1.1754944e-38, %v1593_v0  ;;  %vm1592_vm3 = vcmp.eq.f32.partialorder %v1591_v28, 8.507059e+37 }
 0x228   : > { %v2263_v36 = vpop.eup %2262 }
 0x229   : > { %v1583_v49 = vmul.f32 %v2263_v36, %v1581_v63  ;;  %vm1588_vm0 = vweird.f32 %v2263_v36 }
 0x22a   : > { %vm1589_vm2 = vmor %vm1587_vm1, %vm1588_vm0 }
 0x22b   : > { %v1584_v19 = vsub.f32 1.0, %v1583_v49 }
 0x22d   : > { %v1585_v45 = vmul.f32 %v2263_v36, %v1584_v19 }
 0x22f   : > { %v1586_v29 = vadd.f32 %v2263_v36, %v1585_v45 }
 0x231   : > { %v1590_v31 = vsel %vm1589_vm2, %v2263_v36, %v1586_v29 }
 0x232   : > { %v1595_v32 = vsel %vm1592_vm3, %v1594_v2, %v1590_v31 }
 0x233   : > { %v1597_v7 = vmul.f32 %v1595_v32, %v264_v1 }
 0x235   : > { %v1598_v20 = vadd.f32 1.0, %v1597_v7 }
 0x237   : > { %v3142_v53 = vperm.slane %v1598_v20, 0 }
 0x239   : > { %v1600_v50 = vmul.f32 %v3142_v53, %v2807_v55  ;;  %v1601_v54 = vmul.f32 %v3142_v53, %v2803_v52  ;;  %v1602_v25 = vmul.f32 %v3142_v53, %v2811_v58  ;;  %v1603_v37 = vmul.f32 %v3142_v53, %v2817_v59 }
 0x23a   : > { %v1604_v34 = vmul.f32 %v3142_v53, %v2822_v60  ;;  %v1605_v52 = vmul.f32 %v3142_v53, %v2827_v51  ;;  %v1606_v55 = vmul.f32 %v3142_v53, %v2831_v9  ;;  %v1607_v58 = vmul.f32 %v3142_v53, %v2835_v56 }
 0x23b   : > { %1632 = vst [vmem:[%s3154_s13] sm:$0xff] %v1600_v50  ;;  %v1608_v59 = vmul.f32 %v3142_v53, %v2839_v24  ;;  %v1609_v60 = vmul.f32 %v3142_v53, %v2843_v16  ;;  %v1610_v51 = vmul.f32 %v3142_v53, %v2847_v27  ;;  %v1611_v9 = vmul.f32 %v3142_v53, %v2851_v21 }
 0x23c   : > { %1633 = vst [vmem:[%s3154_s13 + $0x8] sm:$0xff] %v1601_v54  ;;  %v1612_v56 = vmul.f32 %v3142_v53, %v2855_v23  ;;  %v1613_v24 = vmul.f32 %v3142_v53, %v2866_v47  ;;  %v1614_v16 = vmul.f32 %v3142_v53, %v2876_v10  ;;  %v1615_v27 = vmul.f32 %v3142_v53, %v2886_v35 }
 0x23d   : > { %1634 = vst [vmem:[%s3154_s13 + $0x10] sm:$0xff] %v1602_v25  ;;  %v1616_v21 = vmul.f32 %v3142_v53, %v2896_v4  ;;  %v1617_v23 = vmul.f32 %v3142_v53, %v2906_v39  ;;  %v1618_v47 = vmul.f32 %v3142_v53, %v2941_v12  ;;  %v1619_v10 = vmul.f32 %v3142_v53, %v2959_v5 }
 0x23e   : > { %1635 = vst [vmem:[%s3154_s13 + $0x18] sm:$0xff] %v1603_v37  ;;  %v1620_v35 = vmul.f32 %v3142_v53, %v2987_v43  ;;  %v1621_v4 = vmul.f32 %v3142_v53, %v3016_v33  ;;  %v1622_v39 = vmul.f32 %v3142_v53, %v3045_v48  ;;  %v1623_v12 = vmul.f32 %v3142_v53, %v3074_v40 }
 0x23f   : > { %1636 = vst [vmem:[%s3154_s13 + $0x20] sm:$0xff] %v1604_v34  ;;  %v1624_v5 = vmul.f32 %v3142_v53, %v3102_v22  ;;  %v1625_v43 = vmul.f32 %v3142_v53, %v3131_v15  ;;  %v1626_v33 = vmul.f32 %v3142_v53, %v2863_v44  ;;  %v1627_v48 = vmul.f32 %v3142_v53, %v2873_v30 }
 0x240   : > { %1637 = vst [vmem:[%s3154_s13 + $0x28] sm:$0xff] %v1605_v52  ;;  %v1628_v40 = vmul.f32 %v3142_v53, %v2883_v8  ;;  %v1629_v44 = vmul.f32 %v3142_v53, %v2893_v61  ;;  %v1630_v22 = vmul.f32 %v3142_v53, %v2903_v41  ;;  %v1631_v30 = vmul.f32 %v3142_v53, %v2919_v11 }
 0x241   : > { %1638 = vst [vmem:[%s3154_s13 + $0x30] sm:$0xff] %v1606_v55 }
 0x242   : > { %1639 = vst [vmem:[%s3154_s13 + $0x38] sm:$0xff] %v1607_v58 }
 0x243   : > { %1640 = vst [vmem:[%s3154_s13 + $0x40] sm:$0xff] %v1608_v59 }
 0x244   : > { %1641 = vst [vmem:[%s3154_s13 + $0x48] sm:$0xff] %v1609_v60 }
 0x245   : > { %1642 = vst [vmem:[%s3154_s13 + $0x50] sm:$0xff] %v1610_v51 }
 0x246   : > { %1643 = vst [vmem:[%s3154_s13 + $0x58] sm:$0xff] %v1611_v9 }
 0x247   : > { %1644 = vst [vmem:[%s3154_s13 + $0x60] sm:$0xff] %v1612_v56 }
 0x248   : > { %1645 = vst [vmem:[%s3154_s13 + $0x68] sm:$0xff] %v1613_v24 }
 0x249   : > { %1646 = vst [vmem:[%s3154_s13 + $0x70] sm:$0xff] %v1614_v16 }
 0x24a   : > { %1647 = vst [vmem:[%s3154_s13 + $0x78] sm:$0xff] %v1615_v27 }
 0x24b   : > { %1648 = vst [vmem:[%s3154_s13 + $0x80] sm:$0xff] %v1616_v21 }
 0x24c   : > { %1649 = vst [vmem:[%s3154_s13 + $0x88] sm:$0xff] %v1617_v23 }
 0x24d   : > { %1650 = vst [vmem:[%s3154_s13 + $0x90] sm:$0xff] %v1618_v47 }
 0x24e   : > { %1651 = vst [vmem:[%s3154_s13 + $0x98] sm:$0xff] %v1619_v10 }
 0x24f   : > { %1652 = vst [vmem:[%s3154_s13 + $0xa0] sm:$0xff] %v1620_v35 }
 0x250   : > { %1653 = vst [vmem:[%s3154_s13 + $0xa8] sm:$0xff] %v1621_v4 }
 0x251   : > { %1654 = vst [vmem:[%s3154_s13 + $0xb0] sm:$0xff] %v1622_v39 }
 0x252   : > { %1655 = vst [vmem:[%s3154_s13 + $0xb8] sm:$0xff] %v1623_v12 }
 0x253   : > { %1656 = vst [vmem:[%s3154_s13 + $0xc0] sm:$0xff] %v1624_v5 }
 0x254   : > { %1657 = vst [vmem:[%s3154_s13 + $0xc8] sm:$0xff] %v1625_v43 }
 0x255   : > { %1658 = vst [vmem:[%s3154_s13 + $0xd0] sm:$0xff] %v1626_v33 }
 0x256   : > { %1659 = vst [vmem:[%s3154_s13 + $0xd8] sm:$0xff] %v1627_v48 }
 0x257   : > { %1660 = vst [vmem:[%s3154_s13 + $0xe0] sm:$0xff] %v1628_v40 }
 0x258   : > { %1661 = vst [vmem:[%s3154_s13 + $0xe8] sm:$0xff] %v1629_v44 }
 0x259   : > { %1662 = vst [vmem:[%s3154_s13 + $0xf0] sm:$0xff] %v1630_v22 }
 0x25a   : > { %1663 = vst [vmem:[%s3154_s13 + $0xf8] sm:$0xff] %v1631_v30 }
 0x25b   : > { %2292 = shalt.err (!%p2289_p3)
}
 0x25c   : > { %s2330_s11 = smov 128   ;;  %s2331_s12 = smov 8  }
 0x25d   : > { %2218 = dma.vmem_to_hbm [thread:$0]  (%p2400_p5), %s1678_s22, 4096, %s1680_s26, %s1665_s30, %s2330_s11, %s2330_s11, %s2331_s12  }
 0x25e PF: > { %p2224_p4 = scmp.ge.s32.totalorder %s2327_s21, 2  ;;  %s1694_s13 = sand.u32 1, %s2315_s18  }
 0x25f   : > { %s1695_s15 = scalar_lea.sflag [#allocation3], %s1694_s13 }
 0x260   : > { %p2221_p7 = pnand %p2224_p4, %p2404_p6 }
 0x262   : > { %p2222_p8 = pneg %p2221_p7 }
 0x264   : > { %2310 = dma.done.wait (%p2222_p8), %s1695_s15, 4096  }
 0x265   : > { %2312 = vsyncadd (%p2222_p8), %s1695_s15, 4294963200  ;;  %p15_p9 = scmp.ge.s32.totalorder %s2387_s24, 4   ;;  %s3284_s18 = smov %s2319_s19 }
 0x266   : > { %s3285_s19 = smov %s2323_s20  ;;  %s3286_s20 = smov %s2398_s27 }
 0x267   : > { %s3287_s21 = smov %s2387_s24  ;;  %17 = sbr.rel (!%p15_p9) target bundleno = 3 (0x3), region = 81 }
 0x26c   :  { %1701 = vsyncpa [#allocation3], 1 }
 0x26d   :  { %1703 = vsyncpa [#allocation3 + $0x1], 1 }

// kernel: apf_forward.2
= control target key start
LH: loop header
LB: loop body
LE: loop exit
PB: predicated region body
PF: predicated region fallthrough
CT: control target
= control target key end

     0   :  { %s5852_s21 = smov 0   ;;  %s7582_s0 = inlined_call_operand.vmem [shape: bf16[2,288,288], index: 0, kind: input, shape index: {}]   ;;  %s7583_s1 = inlined_call_operand.vmem [shape: bf16[2,288,192], index: 1, kind: input, shape index: {}]   ;;  %s7584_s2 = inlined_call_operand.vmem [shape: bf16[3,288,128], index: 2, kind: input, shape index: {}]   ;;  %s7585_s3 = inlined_call_operand.vmem [shape: bf16[3,192,128], index: 3, kind: input, shape index: {}]   ;;  %s7586_s4 = inlined_call_operand.vmem [shape: bf16[2,256,128], index: 4, kind: output, shape index: {0}]   ;;  %s7587_s5 = inlined_call_operand.vmem [shape: bf16[2,256,128], index: 5, kind: output, shape index: {1}]   ;;  %s7588_s6 = inlined_call_operand.vmem [shape: f32[2,4,128], index: 6, kind: output, shape index: {2}]  }
   0x1 LB: > { %s4084_s22 = sadd.s32 4294967295, %s5815_s21   ;;  %p4088_p0 = scmp.ge.s32.totalorder %s5815_s21, 1  ;;  %s5815_s21 = sphi %s5852_s21, %s17_s21  }
   0x2   : > { %p227_p1 = scmp.lt.s32.totalorder %s5815_s21, 3 }
   0x4   : > { %p228_p2 = pnand %p4088_p0, %p227_p1 }
   0x6   : > { %231 = sbr.rel (%p228_p2) target bundleno = 1157 (0x485), region = 36 }
   0xb   : > { %v5412_v0 = vld [vmem:[%s7584_s2 + $0xc8] sm:$0xff]  ;;  %v5871_v2 = vld [vmem:[%s7584_s2 + $0x118] sm:$0xff]  ;;  %p271_p3 = scmp.lt.s32.totalorder %s4084_s22, 1  ;;  %v5411_v3 = vld [vmem:[%s7584_s2 + $0xc0] sm:$0xff]  ;;  %vm785_vm0 = vcmask 261120   ;;  %vm2589_vm1 = vcmask 523264  }
   0xc   : > { %v5866_v1 = vld [vmem:[%s7584_s2 + $0x108] sm:$0xff]  ;;  %834 = vmatpush.bf16.msra.mxu0 %v5412_v0  ;;  %5781 = vmatpush.bf16.msra.mxu3 %v5412_v0  ;;  %v5883_v4 = vld [vmem:[%s7584_s2 + $0x100] sm:$0xff]  ;;  %v5888_v5 = vld [vmem:[%s7584_s2 + $0x110] sm:$0xff] }
   0xd   : > { %s7752_s22 = smov (!%p271_p3, %s4084_s22), 1  ;;  %923 = vmatpush.bf16.msra.mxu1 %v5866_v1  ;;  %1018 = vmatpush.bf16.msra.mxu2 %v5871_v2  ;;  %v5399_v6 = vld [vmem:[%s7584_s2 + $0x78] sm:$0xff]  ;;  %v5398_v12 = vld [vmem:[%s7584_s2 + $0x70] sm:$0xff]  ;;  %v5408_v15 = vld [vmem:[%s7584_s2 + $0xa8] sm:$0xff] }
   0xe   : > { %s5799_s11 = smul.u32 432, %s7752_s22  ;;  %v5410_v7 = vld [vmem:[%s7584_s2 + $0xb8] sm:$0xff]  ;;  %v5409_v13 = vld [vmem:[%s7584_s2 + $0xb0] sm:$0xff]  ;;  %v5416_v16 = vld [vmem:[%s7584_s2 + $0xe8] sm:$0xff]  ;;  %s5334_s7 = sshll.u32 %s7752_s22, 7 }
   0xf   : > { %v5909_v10 = vld [vmem:[%s7584_s2 + $0xf8] sm:$0xff]  ;;  %v5925_v14 = vld [vmem:[%s7584_s2 + $0xf0] sm:$0xff]  ;;  %v5407_v17 = vld [vmem:[%s7584_s2 + $0xa0] sm:$0xff]  ;;  %s5800_s17 = smul.u32 288, %s7752_s22  ;;  %s7020_s10 = scalar_lea.vmem %s7586_s4, %s5334_s7 }
  0x10   : > { %835 = vmatpush.bf16.msra.mxu0 %v5411_v3  ;;  %5782 = vmatpush.bf16.msra.mxu3 %v5411_v3  ;;  %s5897_s16 = scalar_lea.vmem %s7582_s0, %s5799_s11  ;;  %v5415_v18 = vld [vmem:[%s7584_s2 + $0xe0] sm:$0xff]  ;;  %v5406_v22 = vld [vmem:[%s7584_s2 + $0x98] sm:$0xff]  ;;  %v5405_v24 = vld [vmem:[%s7584_s2 + $0x90] sm:$0xff]  ;;  %s7451_s9 = scalar_lea.vmem %s7587_s5, %s5334_s7 }
  0x11   : > { %924 = vmatpush.bf16.msra.mxu1 %v5883_v4  ;;  %1019 = vmatpush.bf16.msra.mxu2 %v5888_v5  ;;  %v4142_v8 = vld [vmem:[%s5897_s16 + $0x20] sm:$0xf]  ;;  %v5341_v9 = vld [vmem:[%s5897_s16 + $0x28] sm:$0xf0]  ;;  %v4154_v19 = vld [vmem:[%s5897_s16 + $0x38] sm:$0xf]  ;;  %s6655_s20 = scalar_lea.vmem %s7583_s1, %s5800_s17 }
  0x12   : > { %v5911_v11 = vor.u32 %v5341_v9, %v4142_v8  ;;  %v5344_v20 = vld [vmem:[%s5897_s16 + $0x40] sm:$0xf0]  ;;  %v5414_v23 = vld [vmem:[%s7584_s2 + $0xd8] sm:$0xff]  ;;  %v5956_v25 = vld [vmem:[%s7584_s2 + $0xd0] sm:$0xff] }
  0x13   : > { %v5942_v21 = vor.u32 %v5344_v20, %v4154_v19  ;;  %v4134_v26 = vld [vmem:[%s5897_s16 + $0x18] sm:$0xf]  ;;  %v5340_v27 = vld [vmem:[%s5897_s16 + $0x20] sm:$0xf0]  ;;  %v5339_v30 = vld [vmem:[%s5897_s16 + $0x1c] sm:$0xf] }
  0x14   : > { %4396 = vmatmul.msk.bf16.vlgmr.msra.gmra.mxu2 %vm785_vm0, %v5911_v11  ;;  %836 = vmatpush.bf16.msra.mxu0 %v5410_v7  ;;  %v4278_v28 = vld [vmem:[%s5897_s16 + $0x138] sm:$0xf]  ;;  %v5376_v29 = vld [vmem:[%s5897_s16 + $0x140] sm:$0xf0]  ;;  %v4136_v31 = vld [vmem:[%s5897_s16 + $0x24] sm:$0xf0]  ;;  %v5972_v34 = vor.u32 %v5340_v27, %v4134_v26 }
  0x15   : > { %1316 = vmatpush.bf16.msrb.mxu2 %v5399_v6  ;;  %5783 = vmatpush.bf16.msra.mxu3 %v5410_v7  ;;  %v5401_v32 = vld [vmem:[%s7584_s2 + $0x88] sm:$0xff]  ;;  %v5478_v33 = vld [vmem:[%s7584_s2 + $0x158] sm:$0xff]  ;;  %v5974_v35 = vor.u32 %v5376_v29, %v4278_v28  ;;  %v5976_v36 = vor.u32 %v5339_v30, %v4136_v31  ;;  %v5477_v38 = vld [vmem:[%s7584_s2 + $0x150] sm:$0xff] }
  0x16   : > { %925 = vmatpush.bf16.msra.mxu1 %v5909_v10  ;;  %v5397_v37 = vld [vmem:[%s7584_s2 + $0x68] sm:$0xff]  ;;  %v4166_v39 = vld [vmem:[%s5897_s16 + $0x50] sm:$0xf]  ;;  %v5347_v40 = vld [vmem:[%s5897_s16 + $0x58] sm:$0xf0] }
  0x17   : > { %7615 = vst [vmem:[#allocation2_spill] sm:$0xff] %v5974_v35  ;;  %v5992_v41 = vor.u32 %v5347_v40, %v4166_v39  ;;  %v4146_v42 = vld [vmem:[%s5897_s16 + $0x30] sm:$0xf]  ;;  %v5343_v43 = vld [vmem:[%s5897_s16 + $0x38] sm:$0xf0]  ;;  %v5396_v57 = vld [vmem:[%s7584_s2 + $0x60] sm:$0xff] }
  0x18   : > { %837 = vmatpush.bf16.msra.mxu0 %v5409_v13  ;;  %v4290_v44 = vld [vmem:[%s5897_s16 + $0x150] sm:$0xf]  ;;  %v5379_v45 = vld [vmem:[%s5897_s16 + $0x158] sm:$0xf0]  ;;  %v5342_v46 = vld [vmem:[%s5897_s16 + $0x34] sm:$0xf]  ;;  %v6003_v48 = vor.u32 %v5343_v43, %v4146_v42 }
  0x19   : > { %1317 = vmatpush.bf16.msrb.mxu2 %v5398_v12  ;;  %5784 = vmatpush.bf16.msra.mxu3 %v5409_v13  ;;  %v4148_v47 = vld [vmem:[%s5897_s16 + $0x3c] sm:$0xf0]  ;;  %v6006_v49 = vor.u32 %v5379_v45, %v4290_v44  ;;  %v4178_v51 = vld [vmem:[%s5897_s16 + $0x68] sm:$0xf]  ;;  %v5350_v52 = vld [vmem:[%s5897_s16 + $0x70] sm:$0xf0] }
  0x1a   : > { %926 = vmatpush.bf16.msra.mxu1 %v5925_v14  ;;  %v6008_v50 = vor.u32 %v5342_v46, %v4148_v47  ;;  %v6015_v53 = vor.u32 %v5350_v52, %v4178_v51  ;;  %v4158_v54 = vld [vmem:[%s5897_s16 + $0x48] sm:$0xf]  ;;  %v5346_v55 = vld [vmem:[%s5897_s16 + $0x50] sm:$0xf0]  ;;  %v5345_v60 = vld [vmem:[%s5897_s16 + $0x4c] sm:$0xf] }
  0x1b   : > { %7616 = vst [vmem:[#allocation3_spill] sm:$0xff] %v6006_v49  ;;  %v4302_v56 = vld [vmem:[%s5897_s16 + $0x168] sm:$0xf]  ;;  %v5382_v59 = vld [vmem:[%s5897_s16 + $0x170] sm:$0xf0]  ;;  %v6031_v62 = vor.u32 %v5346_v55, %v4158_v54  ;;  %v5400_v43 = vld [vmem:[%s7584_s2 + $0x80] sm:$0xff] }
  0x1c   : > { %838 = vmatpush.bf16.msra.mxu0 %v5408_v15  ;;  %v5476_v58 = vld [vmem:[%s7584_s2 + $0x148] sm:$0xff]  ;;  %v4160_v61 = vld [vmem:[%s5897_s16 + $0x54] sm:$0xf0]  ;;  %v6034_v63 = vor.u32 %v5382_v59, %v4302_v56  ;;  %v4170_v6 = vld [vmem:[%s5897_s16 + $0x60] sm:$0xf] }
  0x1d   : > { %5785 = vmatpush.bf16.msra.mxu3 %v5408_v15  ;;  %1318 = vmatpush.bf16.msrb.mxu2 %v5397_v37  ;;  %v6036_v0 = vor.u32 %v5345_v60, %v4160_v61  ;;  %v5353_v3 = vld [vmem:[%s5897_s16 + $0x88] sm:$0xf0]  ;;  %v5348_v9 = vld [vmem:[%s5897_s16 + $0x64] sm:$0xf]  ;;  %v4202_v15 = vld [vmem:[%s5897_s16 + $0x98] sm:$0xf] }
  0x1e   : > { %927 = vmatpush.bf16.msra.mxu1 %v5416_v16  ;;  %7617 = vst [vmem:[#allocation4_spill] sm:$0xff] %v6034_v63  ;;  %v5349_v7 = vld [vmem:[%s5897_s16 + $0x68] sm:$0xf0]  ;;  %v5352_v19 = vld [vmem:[%s5897_s16 + $0x80] sm:$0xf0]  ;;  %v5474_v44 = vld [vmem:[%s7584_s2 + $0x138] sm:$0xff] }
  0x1f   : > { %v5403_v8 = vld [vmem:[%s5897_s16 + $0x188] sm:$0xf0]  ;;  %v6055_v12 = vor.u32 %v5349_v7, %v4170_v6  ;;  %v5351_v20 = vld [vmem:[%s5897_s16 + $0x7c] sm:$0xf]  ;;  %v4214_v29 = vld [vmem:[%s5897_s16 + $0xb0] sm:$0xf] }
  0x20   : > { %839 = vmatpush.bf16.msra.mxu0 %v5407_v17  ;;  %v5359_v30 = vld [vmem:[%s5897_s16 + $0xb8] sm:$0xf0]  ;;  %v5354_v37 = vld [vmem:[%s5897_s16 + $0x94] sm:$0xf]  ;;  %v4292_v40 = vld [vmem:[%s5897_s16 + $0x15c] sm:$0xf0] }
  0x21   : > { %5786 = vmatpush.bf16.msra.mxu3 %v5407_v17  ;;  %1319 = vmatpush.bf16.msrb.mxu2 %v5396_v57  ;;  %v6090_v31 = vor.u32 %v5359_v30, %v4214_v29  ;;  %v5378_v39 = vld [vmem:[%s5897_s16 + $0x154] sm:$0xf]  ;;  %v4226_v47 = vld [vmem:[%s5897_s16 + $0xc8] sm:$0xf]  ;;  %v5357_v57 = vld [vmem:[%s5897_s16 + $0xac] sm:$0xf] }
  0x22   : > { %928 = vmatpush.bf16.msra.mxu1 %v5415_v18  ;;  %v6110_v46 = vor.u32 %v5378_v39, %v4292_v40  ;;  %v5362_v51 = vld [vmem:[%s5897_s16 + $0xd0] sm:$0xf0]  ;;  %v4206_v55 = vld [vmem:[%s5897_s16 + $0xa8] sm:$0xf]  ;;  %v5381_v59 = vld [vmem:[%s5897_s16 + $0x16c] sm:$0xf] }
  0x23   : > { %v5394_v52 = vld [vmem:[%s7584_s2 + $0x50] sm:$0xff]  ;;  %v6120_v54 = vor.u32 %v5362_v51, %v4226_v47  ;;  %v4304_v60 = vld [vmem:[%s5897_s16 + $0x174] sm:$0xf0]  ;;  %v4238_v7 = vld [vmem:[%s5897_s16 + $0xe0] sm:$0xf] }
  0x24   : > { %4397 = vmatmul.msk.bf16.gmra.mxu2 %vm785_vm0, %v5942_v21  ;;  %840 = vmatpush.bf16.msra.mxu0 %v5406_v22  ;;  %7619 = vst [vmem:[#allocation6_spill] sm:$0xff] %v6110_v46  ;;  %v5358_v56 = vld [vmem:[%s5897_s16 + $0xb0] sm:$0xf0]  ;;  %v5391_v6 = vld [vmem:[%s7584_s2 + $0x38] sm:$0xff]  ;;  %v5364_v47 = vld [vmem:[%s5897_s16 + $0xe0] sm:$0xf0] }
  0x25   : > { %5787 = vmatpush.bf16.msra.mxu3 %v5406_v22  ;;  %v5395_v22 = vld [vmem:[%s7584_s2 + $0x58] sm:$0xff]  ;;  %v6130_v61 = vor.u32 %v5358_v56, %v4206_v55  ;;  %v5386_v39 = vld [vmem:[%s7584_s2 + $0x10] sm:$0xff] }
  0x26   : > { %929 = vmatpush.bf16.msra.mxu1 %v5414_v23  ;;  %1320 = vmatpush.bf16.msrb.mxu2 %v5395_v22  ;;  %v5387_v30 = vld [vmem:[%s7584_s2 + $0x18] sm:$0xff]  ;;  %v4310_v55 = vld [vmem:[%s5897_s16 + $0x170] sm:$0xf] }
  0x27   : > { %v5363_v51 = vld [vmem:[%s5897_s16 + $0xdc] sm:$0xf] }
  0x28   : > { %841 = vmatpush.bf16.msra.mxu0 %v5405_v24  ;;  %v5383_v56 = vld [vmem:[%s5897_s16 + $0x178] sm:$0xf0] }
  0x29   : > { %5788 = vmatpush.bf16.msra.mxu3 %v5405_v24  ;;  %v5375_v24 = vld [vmem:[%s5897_s16 + $0x13c] sm:$0xf] }
  0x2a   : > { %930 = vmatpush.bf16.msra.mxu1 %v5956_v25  ;;  %1321 = vmatpush.bf16.msrb.mxu2 %v5394_v52  ;;  %v4232_v52 = vld [vmem:[%s5897_s16 + $0xe4] sm:$0xf0] }
  0x2b   : > { %842 = vmatmul.bf16.vlgmr.msra.gmra.mxu0 %v5972_v34 }
  0x2c   : > { %1411 = vmatpush.bf16.msrb.mxu0 %v5401_v32  ;;  %902 = vmatmul.bf16.vlgmr.msra.gmra.mxu3 %v5974_v35  ;;  %v4194_v32 = vld [vmem:[%s5897_s16 + $0x90] sm:$0xf] }
  0x2d   : > { %5789 = vmatpush.bf16.msrb.mxu3 %v5866_v1  ;;  %931 = vmatmul.bf16.vlgmr.msra.gmra.mxu1 %v5976_v36  ;;  %v4190_v1 = vld [vmem:[%s5897_s16 + $0x80] sm:$0xf] }
  0x2e   : > { %1991 = vmatpush.bf16.msrb.mxu1 %v5478_v33  ;;  %v5355_v33 = vld [vmem:[%s5897_s16 + $0x98] sm:$0xf0] }
  0x2f   : > { %v6100_v42 = vor.u32 %v5355_v33, %v4194_v32  ;;  %v5393_v32 = vld [vmem:[%s7584_s2 + $0x48] sm:$0xff]  ;;  %v4250_v33 = vld [vmem:[%s5897_s16 + $0xf8] sm:$0xf] }
  0x30   : > { %1412 = vmatpush.bf16.msrb.mxu0 %v5400_v43  ;;  %1322 = vmatpush.bf16.msrb.mxu2 %v5393_v32  ;;  %v5385_v43 = vld [vmem:[%s7584_s2 + $0x8] sm:$0xff]  ;;  %v5367_v32 = vld [vmem:[%s5897_s16 + $0xf8] sm:$0xf0] }
  0x31   : > { %5790 = vmatpush.bf16.msrb.mxu3 %v5883_v4  ;;  %v6045_v4 = vor.u32 %v5353_v3, %v4190_v1  ;;  %v6134_v3 = vor.u32 %v5381_v59, %v4304_v60  ;;  %v5384_v59 = vld [vmem:[%s7584_s2] sm:$0xff] }
  0x32   : > { %1992 = vmatpush.bf16.msrb.mxu1 %v5477_v38  ;;  %v4196_v38 = vld [vmem:[%s5897_s16 + $0x9c] sm:$0xf0] }
  0x33   : > { %v6108_v45 = vor.u32 %v5354_v37, %v4196_v38  ;;  %7620 = vst [vmem:[#allocation7_spill] sm:$0xff] %v6134_v3  ;;  %v5368_v37 = vld [vmem:[%s5897_s16 + $0x100] sm:$0xf0] }
  0x34   : > { %4398 = vmatmul.msk.bf16.gmra.mxu2 %vm785_vm0, %v5992_v41  ;;  %v6183_v40 = vor.u32 %v5368_v37, %v4250_v33  ;;  %v4244_v37 = vld [vmem:[%s5897_s16 + $0xfc] sm:$0xf0] }
  0x35   : > { %5791 = vmatpush.bf16.msrb.mxu3 %v5909_v10  ;;  %v4172_v10 = vld [vmem:[%s5897_s16 + $0x6c] sm:$0xf0] }
  0x36   : > { %1993 = vmatpush.bf16.msrb.mxu1 %v5476_v58  ;;  %v6057_v13 = vor.u32 %v5348_v9, %v4172_v10  ;;  %v4208_v58 = vld [vmem:[%s5897_s16 + $0xb4] sm:$0xf0]  ;;  %v5473_v10 = vld [vmem:[%s7584_s2 + $0x130] sm:$0xff] }
  0x37   : > { %v6132_v1 = vor.u32 %v5357_v57, %v4208_v58 }
  0x39   : > { %5792 = vmatpush.bf16.msrb.mxu3 %v5925_v14  ;;  %v5475_v14 = vld [vmem:[%s7584_s2 + $0x140] sm:$0xff] }
  0x3a   : > { %1994 = vmatpush.bf16.msrb.mxu1 %v5475_v14  ;;  %v4218_v14 = vld [vmem:[%s5897_s16 + $0xc0] sm:$0xf] }
  0x3b   : > { %847 = vmatmul.bf16.gmra.mxu0 %v6003_v48 }
  0x3c   : > { %907 = vmatmul.bf16.gmra.mxu3 %v6006_v49 }
  0x3d   : > { %5793 = vmatpush.bf16.msrb.mxu3 %v5416_v16  ;;  %936 = vmatmul.bf16.gmra.mxu1 %v6008_v50  ;;  %v5356_v16 = vld [vmem:[%s5897_s16 + $0xa0] sm:$0xf0] }
  0x3e   : > { %v6066_v17 = vor.u32 %v5356_v16, %v4202_v15  ;;  %1995 = vmatpush.bf16.msrb.mxu1 %v5474_v44  ;;  %v5361_v15 = vld [vmem:[%s5897_s16 + $0xc8] sm:$0xf0]  ;;  %v5360_v16 = vld [vmem:[%s5897_s16 + $0xc4] sm:$0xf]  ;;  %v4230_v44 = vld [vmem:[%s5897_s16 + $0xd8] sm:$0xf] }
  0x3f   : > { %v6196_v58 = vor.u32 %v5364_v47, %v4230_v44 }
  0x41   : > { %5794 = vmatpush.bf16.msrb.mxu3 %v5415_v18  ;;  %v4182_v18 = vld [vmem:[%s5897_s16 + $0x78] sm:$0xf] }
  0x42   : > { %v6079_v26 = vor.u32 %v5352_v19, %v4182_v18  ;;  %1996 = vmatpush.bf16.msrb.mxu1 %v5473_v10  ;;  %v4220_v18 = vld [vmem:[%s5897_s16 + $0xcc] sm:$0xf0]  ;;  %v5402_v19 = vld [vmem:[%s5897_s16 + $0x184] sm:$0xf]  ;;  %v5472_v10 = vld [vmem:[%s7584_s2 + $0x128] sm:$0xff] }
  0x44   : > { %4399 = vmatmul.msk.bf16.gmra.mxu2 %vm785_vm0, %v6015_v53 }
  0x45   : > { %5795 = vmatpush.bf16.msrb.mxu3 %v5414_v23  ;;  %v4184_v23 = vld [vmem:[%s5897_s16 + $0x84] sm:$0xf0] }
  0x46   : > { %v6081_v27 = vor.u32 %v5351_v20, %v4184_v23  ;;  %v4316_v20 = vld [vmem:[%s5897_s16 + $0x18c] sm:$0xf0]  ;;  %v6163_v23 = vor.u32 %v5361_v15, %v4218_v14  ;;  %v5371_v15 = vld [vmem:[%s5897_s16 + $0x118] sm:$0xf0]  ;;  %1997 = vmatpush.bf16.msrb.mxu1 %v5472_v10  ;;  %v5374_v10 = vld [vmem:[%s5897_s16 + $0x130] sm:$0xf0] }
  0x47   : > { %v4319_v29 = vor.u32 %v5402_v19, %v4316_v20  ;;  %v4262_v14 = vld [vmem:[%s5897_s16 + $0x110] sm:$0xf] }
  0x48   : > { %v6218_v20 = vor.u32 %v5371_v15, %v4262_v14 }
  0x49   : > { %5796 = vmatpush.bf16.msrb.mxu3 %v5956_v25  ;;  %v4280_v25 = vld [vmem:[%s5897_s16 + $0x144] sm:$0xf0] }
  0x4a   : > { %v6083_v28 = vor.u32 %v5375_v24, %v4280_v25  ;;  %v5388_v24 = vld [vmem:[%s7584_s2 + $0x20] sm:$0xff]  ;;  %v6168_v25 = vor.u32 %v5360_v16, %v4220_v18  ;;  %7622 = vst [vmem:[#allocation9_spill] sm:$0xff] %v6218_v20 }
  0x4b   : > { %852 = vmatmul.bf16.gmra.mxu0 %v6031_v62 }
  0x4c   : > { %912 = vmatmul.bf16.gmra.mxu3 %v6034_v63  ;;  %7618 = vst [vmem:[#allocation5_spill] sm:$0xff] %v6083_v28 }
  0x4d   : > { %5797 = vmatpush.bf16.msra.mxu3 %v5871_v2  ;;  %941 = vmatmul.bf16.gmra.mxu1 %v6036_v0  ;;  %v4314_v2 = vld [vmem:[%s5897_s16 + $0x180] sm:$0xf] }
  0x51   : > { %5798 = vmatpush.bf16.msra.mxu3 %v5888_v5  ;;  %v4315_v5 = vor.u32 %v5403_v8, %v4314_v2  ;;  %v5365_v2 = vld [vmem:[%s5897_s16 + $0xe8] sm:$0xf0]  ;;  %v5390_v8 = vld [vmem:[%s7584_s2 + $0x30] sm:$0xff] }
  0x52   : > { %v6147_v9 = vor.u32 %v5365_v2, %v4238_v7  ;;  %v6203_v7 = vor.u32 %v5383_v56, %v4310_v55 }
  0x54   : > { %4400 = vmatmul.msk.bf16.gmra.mxu2 %vm785_vm0, %v6045_v4  ;;  %7621 = vst [vmem:[#allocation8_spill] sm:$0xff] %v6203_v7 }
  0x5b   : > { %857 = vmatmul.bf16.gmra.mxu0 %v6055_v12 }
  0x5c   : > { %917 = vmatmul.bf16.gmra.mxu3 %v4315_v5  ;;  %v5389_v5 = vld [vmem:[%s7584_s2 + $0x28] sm:$0xff] }
  0x5d   : > { %946 = vmatmul.bf16.gmra.mxu1 %v6057_v13 }
  0x64   : > { %4401 = vmatmul.msk.bf16.gmra.mxu2 %vm785_vm0, %v6066_v17 }
  0x6b   : > { %862 = vmatmul.bf16.gmra.mxu0 %v6079_v26 }
  0x6c   : > { %991 = vmatmul.bf16.vlgmr.msrb.gmra.mxu3 %v6083_v28 }
  0x6d   : > { %951 = vmatmul.bf16.gmra.mxu1 %v6081_v27  ;;  %1227 = vmatpush.bf16.msrb.mxu3 %v5391_v6  ;;  %v6201_v6 = vor.u32 %v5363_v51, %v4232_v52  ;;  %v5392_v52 = vld [vmem:[%s7584_s2 + $0x40] sm:$0xff] }
  0x6e   : > { %1323 = vmatpush.bf16.msrb.mxu2 %v5392_v52  ;;  %v4414_v52 = vld [vmem:[%s5897_s16] sm:$0xf] }
  0x71   : > { %1228 = vmatpush.bf16.msrb.mxu3 %v5390_v8 }
  0x74   : > { %4402 = vmatmul.msk.bf16.gmra.mxu2 %vm785_vm0, %v6090_v31 }
  0x75   : > { %1229 = vmatpush.bf16.msrb.mxu3 %v5389_v5 }
  0x79   : > { %1230 = vmatpush.bf16.msrb.mxu3 %v5388_v24 }
  0x7b   : > { %867 = vmatmul.bf16.gmra.mxu0 %v6100_v42 }
  0x7c   : > { %996 = vmatmul.bf16.gmra.mxu3 %v6110_v46 }
  0x7d   : > { %956 = vmatmul.bf16.gmra.mxu1 %v6108_v45  ;;  %1231 = vmatpush.bf16.msrb.mxu3 %v5387_v30  ;;  %v4242_v30 = vld [vmem:[%s5897_s16 + $0xf0] sm:$0xf] }
  0x7e   : > { %v6232_v51 = vor.u32 %v5367_v32, %v4242_v30  ;;  %v5471_v32 = vld [vmem:[%s7584_s2 + $0x120] sm:$0xff] }
  0x7f   : > { %1998 = vmatpush.bf16.msrb.mxu1 %v5471_v32  ;;  %v5377_v32 = vld [vmem:[%s5897_s16 + $0x148] sm:$0xf0] }
  0x81   : > { %1232 = vmatpush.bf16.msrb.mxu3 %v5386_v39  ;;  %v4322_v39 = vld [vmem:[%s5897_s16 + $0x188] sm:$0xf] }
  0x84   : > { %4403 = vmatmul.msk.bf16.gmra.mxu2 %vm785_vm0, %v6120_v54 }
  0x85   : > { %1233 = vmatpush.bf16.msrb.mxu3 %v5385_v43  ;;  %v5404_v43 = vld [vmem:[%s5897_s16 + $0x190] sm:$0xf0] }
  0x89   : > { %1234 = vmatpush.bf16.msrb.mxu3 %v5384_v59  ;;  %v4323_v59 = vor.u32 %v5404_v43, %v4322_v39  ;;  %v4256_v43 = vld [vmem:[%s5897_s16 + $0x114] sm:$0xf0] }
  0x8b   : > { %872 = vmatmul.bf16.gmra.mxu0 %v6130_v61 }
  0x8c   : > { %1001 = vmatmul.bf16.gmra.mxu3 %v6134_v3 }
  0x8d   : > { %961 = vmatmul.bf16.gmra.mxu1 %v6132_v1 }
  0x94   : > { %4404 = vmatmul.msk.bf16.gmra.mxu2 %vm785_vm0, %v6147_v9 }
  0x97   : > { %v1021_v22 = vpop.f32.mrf.mxu2 }
  0x9b   : > { %877 = vmatmul.bf16.gmra.mxu0 %v6163_v23 }
  0x9c   : > { %1006 = vmatmul.bf16.gmra.mxu3 %v4319_v29 }
  0x9d   : > { %966 = vmatmul.bf16.gmra.mxu1 %v6168_v25 }
  0x9f   : > { %v1023_v38 = vpop.f32.mrf.mxu2 }
  0xa4   : > { %4405 = vmatmul.msk.bf16.gmra.mxu2 %vm785_vm0, %v6183_v40 }
  0xa7   : > { %v1026_v57 = vpop.f32.mrf.mxu2 }
  0xa8   : > { %v843_v60 = vpop.f32.mrf.mxu0 }
  0xaa   : > { %v932_v2 = vpop.f32.mrf.mxu1 }
  0xab   : > { %v933_v8 = vadd.f32 %v932_v2, %v843_v60  ;;  %882 = vmatmul.bf16.gmra.mxu0 %v6196_v58 }
  0xac   : > { %4410 = vmatmul.msk.bf16.vlgmr.msra.gmra.mxu3 %vm785_vm0, %v6203_v7 }
  0xad   : > { %971 = vmatmul.bf16.gmra.mxu1 %v6201_v6  ;;  %v6212_v5 = vadd.f32 %v1021_v22, %v933_v8  ;;  %v5366_v22 = vld [vmem:[%s5897_s16 + $0xf4] sm:$0xf]  ;;  %v4274_v8 = vld [vmem:[%s5897_s16 + $0x128] sm:$0xf] }
  0xae   : > { %v6237_v56 = vor.u32 %v5366_v22, %v4244_v37  ;;  %v5370_v22 = vld [vmem:[%s5897_s16 + $0x110] sm:$0xf0]  ;;  %v5369_v37 = vld [vmem:[%s5897_s16 + $0x10c] sm:$0xf] }
  0xaf   : > { %v6216_v16 = vpop.f32.mrf.mxu3  ;;  %v1028_v18 = vpop.f32.mrf.mxu2 }
  0xb0   : > { %v845_v19 = vpop.f32.mrf.mxu0  ;;  %7623 = vst [vmem:[#allocation10_spill] sm:$0xff] %v6237_v56 }
  0xb2   : > { %v934_v24 = vpop.f32.mrf.mxu1 }
  0xb3   : > { %v935_v29 = vadd.f32 %v934_v24, %v845_v19  ;;  %v6248_v24 = vor.u32 %v5374_v10, %v4274_v8  ;;  %v6267_v10 = vor.u32 %v5369_v37, %v4256_v43 }
  0xb4   : > { %4406 = vmatmul.msk.bf16.gmra.mxu2 %vm785_vm0, %v6218_v20 }
  0xb5   : > { %v6225_v33 = vadd.f32 %v1023_v38, %v935_v29  ;;  %7624 = vst [vmem:[#allocation11_spill] sm:$0xff] %v6248_v24 }
  0xb6   : > { %7625 = vst [vmem:[#allocation12_spill] sm:$0xff] %v6267_v10 }
  0xb7   : > { %v6230_v44 = vpop.f32.mrf.mxu3  ;;  %v1031_v47 = vpop.f32.mrf.mxu2 }
  0xb8   : > { %v848_v55 = vpop.f32.mrf.mxu0 }
  0xba   : > { %v937_v38 = vpop.f32.mrf.mxu1 }
  0xbb   : > { %v938_v60 = vadd.f32 %v937_v38, %v848_v55  ;;  %887 = vmatmul.bf16.gmra.mxu0 %v6232_v51  ;;  %v5337_v55 = vld [vmem:[%s5897_s16 + $0x8] sm:$0xf0] }
  0xbc   : > { %4411 = vmatmul.msk.bf16.gmra.mxu3 %vm785_vm0, %v4323_v59 }
  0xbd   : > { %976 = vmatmul.bf16.gmra.mxu1 %v6237_v56  ;;  %v6242_v2 = vadd.f32 %v1026_v57, %v938_v60  ;;  %v4254_v57 = vld [vmem:[%s5897_s16 + $0x108] sm:$0xf] }
  0xbe   : > { %v6265_v60 = vor.u32 %v5370_v22, %v4254_v57 }
  0xbf   : > { %v6246_v14 = vpop.f32.mrf.mxu3  ;;  %v1033_v15 = vpop.f32.mrf.mxu2 }
  0xc0   : > { %v850_v19 = vpop.f32.mrf.mxu0 }
  0xc2   : > { %v939_v29 = vpop.f32.mrf.mxu1 }
  0xc3   : > { %v940_v30 = vadd.f32 %v939_v29, %v850_v19  ;;  %v4415_v19 = vor.u32 %v5337_v55, %v4414_v52 }
  0xc4   : > { %4407 = vmatmul.msk.bf16.gmra.mxu2 %vm785_vm0, %v6248_v24 }
  0xc5   : > { %v6258_v39 = vadd.f32 %v1028_v18, %v940_v30  ;;  %v4286_v30 = vld [vmem:[%s5897_s16 + $0x140] sm:$0xf] }
  0xc6   : > { %v6277_v43 = vor.u32 %v5377_v32, %v4286_v30  ;;  %v5372_v30 = vld [vmem:[%s5897_s16 + $0x124] sm:$0xf]  ;;  %v4268_v32 = vld [vmem:[%s5897_s16 + $0x12c] sm:$0xf0] }
  0xc7   : > { %v6263_v59 = vpop.f32.mrf.mxu3  ;;  %v1036_v38 = vpop.f32.mrf.mxu2  ;;  %v6297_v28 = vor.u32 %v5372_v30, %v4268_v32 }
  0xc8   : > { %v853_v8 = vpop.f32.mrf.mxu0  ;;  %7626 = vst [vmem:[#allocation13_spill] sm:$0xff] %v6277_v43 }
  0xc9   : > { %7627 = vst [vmem:[#allocation14_spill] sm:$0xff] %v6297_v28 }
  0xca   : > { %v942_v29 = vpop.f32.mrf.mxu1 }
  0xcb   : > { %v943_v3 = vadd.f32 %v942_v29, %v853_v8  ;;  %892 = vmatmul.bf16.gmra.mxu0 %v6265_v60  ;;  %v5486_v8 = vld [vmem:[%s7584_s2 + $0x198] sm:$0xff] }
  0xcc   : > { %1235 = vmatmul.bf16.vlgmr.msrb.gmra.mxu3 %v4415_v19  ;;  %v5488_v19 = vld [vmem:[%s7584_s2 + $0x1a8] sm:$0xff] }
  0xcd   : > { %981 = vmatmul.bf16.gmra.mxu1 %v6267_v10  ;;  %v6271_v18 = vadd.f32 %v1031_v47, %v943_v3  ;;  %v4266_v3 = vld [vmem:[%s5897_s16 + $0x120] sm:$0xf]  ;;  %v5373_v47 = vld [vmem:[%s5897_s16 + $0x128] sm:$0xf0]  ;;  %2080 = vmatpush.bf16.msra.mxu3 %v5486_v8 }
  0xce   : > { %2175 = vmatpush.bf16.msra.mxu2 %v5488_v19  ;;  %v6295_v7 = vor.u32 %v5373_v47, %v4266_v3  ;;  %v5380_v47 = vld [vmem:[%s5897_s16 + $0x160] sm:$0xf0] }
  0xcf   : > { %v6275_v57 = vpop.f32.mrf.mxu3  ;;  %v1038_v22 = vpop.f32.mrf.mxu2 }
  0xd0   : > { %v855_v37 = vpop.f32.mrf.mxu0 }
  0xd2   : > { %v944_v52 = vpop.f32.mrf.mxu1 }
  0xd3   : > { %v945_v55 = vadd.f32 %v944_v52, %v855_v37 }
  0xd4   : > { %4408 = vmatmul.msk.bf16.gmra.mxu2 %vm785_vm0, %v6277_v43 }
  0xd5   : > { %v6289_v29 = vadd.f32 %v1033_v15, %v945_v55  ;;  %v5542_v15 = vld [vmem:[%s7585_s3 + $0x98] sm:$0xff] }
  0xd6   : > { %v5546_v55 = vld [vmem:[%s7585_s3 + $0xb8] sm:$0xff]  ;;  %2638 = vmatpush.bf16.msra.mxu0 %v5542_v15 }
  0xd7   : > { %v6293_v37 = vpop.f32.mrf.mxu3  ;;  %v1041_v52 = vpop.f32.mrf.mxu2  ;;  %2731 = vmatpush.bf16.msra.mxu1 %v5546_v55  ;;  %v5424_v15 = vld [vmem:[%s5897_s16 + $0x38] sm:$0xf0] }
  0xd8   : > { %v858_v46 = vpop.f32.mrf.mxu0 }
  0xda   : > { %v947_v8 = vpop.f32.mrf.mxu1 }
  0xdb   : > { %v948_v63 = vadd.f32 %v947_v8, %v858_v46  ;;  %897 = vmatmul.bf16.gmra.mxu0 %v6295_v7  ;;  %v4298_v46 = vld [vmem:[%s5897_s16 + $0x158] sm:$0xf] }
  0xdc   : > { %1240 = vmatmul.bf16.gmra.mxu3 %v5972_v34  ;;  %v6314_v8 = vor.u32 %v5380_v47, %v4298_v46  ;;  %v4422_v34 = vld [vmem:[%s5897_s16 + $0x8] sm:$0xf] }
  0xdd   : > { %986 = vmatmul.bf16.gmra.mxu1 %v6297_v28  ;;  %v6308_v3 = vadd.f32 %v1036_v38, %v948_v63  ;;  %v5338_v63 = vld [vmem:[%s5897_s16 + $0x10] sm:$0xf0]  ;;  %v4550_v28 = vld [vmem:[%s5897_s16 + $0x30] sm:$0xf] }
  0xde   : > { %7628 = vst [vmem:[#allocation15_spill] sm:$0xff] %v6314_v8  ;;  %v4423_v10 = vor.u32 %v5338_v63, %v4422_v34  ;;  %v4551_v46 = vor.u32 %v5424_v15, %v4550_v28 }
  0xdf   : > { %v6312_v19 = vpop.f32.mrf.mxu3  ;;  %v1043_v30 = vpop.f32.mrf.mxu2 }
  0xe0   : > { %v860_v32 = vpop.f32.mrf.mxu0 }
  0xe2   : > { %v949_v43 = vpop.f32.mrf.mxu1 }
  0xe3   : > { %v950_v49 = vadd.f32 %v949_v43, %v860_v32 }
  0xe4   : > { %4409 = vmatmul.msk.bf16.gmra.mxu2 %vm785_vm0, %v6314_v8 }
  0xe5   : > { %v6320_v38 = vadd.f32 %v1038_v22, %v950_v49  ;;  %v5336_v49 = vld [vmem:[%s5897_s16 + $0x4] sm:$0xf]  ;;  %v4416_v22 = vld [vmem:[%s5897_s16 + $0xc] sm:$0xf0] }
  0xe6   : > { %v4419_v28 = vor.u32 %v5336_v49, %v4416_v22 }
  0xe7   : > { %v6324_v55 = vpop.f32.mrf.mxu3  ;;  %v1046_v24 = vpop.f32.mrf.mxu2 }
  0xe8   : > { %v863_v35 = vpop.f32.mrf.mxu0 }
  0xea   : > { %v952_v47 = vpop.f32.mrf.mxu1 }
  0xeb   : > { %v953_v20 = vadd.f32 %v952_v47, %v863_v35  ;;  %4496 = vmatmul.msk.bf16.vlgmr.msrb.gmra.mxu0 %vm785_vm0, %v4423_v10 }
  0xec   : > { %1245 = vmatmul.bf16.gmra.mxu3 %v6003_v48  ;;  %v5485_v48 = vld [vmem:[%s7584_s2 + $0x190] sm:$0xff] }
  0xed   : > { %1999 = vmatmul.bf16.vlgmr.msrb.gmra.mxu1 %v4551_v46  ;;  %v6328_v43 = vadd.f32 %v1041_v52, %v953_v20  ;;  %2081 = vmatpush.bf16.msra.mxu3 %v5485_v48  ;;  %v4562_v20 = vld [vmem:[%s5897_s16 + $0x48] sm:$0xf]  ;;  %v5427_v52 = vld [vmem:[%s5897_s16 + $0x50] sm:$0xf0] }
  0xef   : > { %v992_v32 = vpop.f32.mrf.mxu3  ;;  %v1048_v8 = vpop.f32.mrf.mxu2 }
  0xf0   : > { %v6333_v56 = vadd.f32 %v992_v32, %v6216_v16  ;;  %v865_v34 = vpop.f32.mrf.mxu0  ;;  %v4563_v32 = vor.u32 %v5427_v52, %v4562_v20 }
  0xf2   : > { %v954_v63 = vpop.f32.mrf.mxu1 }
  0xf3   : > { %v955_v35 = vadd.f32 %v954_v63, %v865_v34  ;;  %v5541_v34 = vld [vmem:[%s7585_s3 + $0x90] sm:$0xff] }
  0xf4   : > { %1324 = vmatmul.bf16.vlgmr.msrb.gmra.mxu2 %v4419_v28  ;;  %2639 = vmatpush.bf16.msra.mxu0 %v5541_v34 }
  0xf5   : > { %v6338_v10 = vadd.f32 %v1043_v30, %v955_v35 }
  0xf7   : > { %v994_v15 = vpop.f32.mrf.mxu3  ;;  %v1051_v46 = vpop.f32.mrf.mxu2 }
  0xf8   : > { %v6343_v47 = vadd.f32 %v994_v15, %v6230_v44  ;;  %v868_v16 = vpop.f32.mrf.mxu0  ;;  %v4574_v15 = vld [vmem:[%s5897_s16 + $0x60] sm:$0xf] }
  0xfa   : > { %v957_v49 = vpop.f32.mrf.mxu1 }
  0xfb   : > { %v958_v22 = vadd.f32 %v957_v49, %v868_v16  ;;  %4497 = vmatmul.msk.bf16.gmra.mxu0 %vm785_vm0, %v5911_v11  ;;  %v5430_v11 = vld [vmem:[%s5897_s16 + $0x68] sm:$0xf0] }
  0xfc   : > { %1250 = vmatmul.bf16.gmra.mxu3 %v6031_v62  ;;  %v4575_v49 = vor.u32 %v5430_v11, %v4574_v15  ;;  %v5433_v15 = vld [vmem:[%s5897_s16 + $0x80] sm:$0xf0] }
  0xfd   : > { %2004 = vmatmul.bf16.gmra.mxu1 %v4563_v32  ;;  %v6351_v30 = vadd.f32 %v1046_v24, %v958_v22 }
  0xff   : > { %v997_v44 = vpop.f32.mrf.mxu3  ;;  %v1053_v28 = vpop.f32.mrf.mxu2 }
 0x100   : > { %v6354_v63 = vadd.f32 %v997_v44, %v6246_v14  ;;  %v870_v35 = vpop.f32.mrf.mxu0 }
 0x102   : > { %v959_v48 = vpop.f32.mrf.mxu1 }
 0x103   : > { %v960_v20 = vadd.f32 %v959_v48, %v870_v35 }
 0x104   : > { %1329 = vmatmul.bf16.gmra.mxu2 %v5976_v36 }
 0x105   : > { %v6357_v52 = vadd.f32 %v1048_v8, %v960_v20  ;;  %v5484_v20 = vld [vmem:[%s7584_s2 + $0x188] sm:$0xff] }
 0x106   : > { %2082 = vmatpush.bf16.msra.mxu3 %v5484_v20 }
 0x107   : > { %v999_v16 = vpop.f32.mrf.mxu3  ;;  %v1056_v62 = vpop.f32.mrf.mxu2 }
 0x108   : > { %v6362_v24 = vadd.f32 %v999_v16, %v6263_v59  ;;  %v873_v32 = vpop.f32.mrf.mxu0 }
 0x10a   : > { %v962_v22 = vpop.f32.mrf.mxu1 }
 0x10b   : > { %v963_v14 = vadd.f32 %v962_v22, %v873_v32  ;;  %4498 = vmatmul.msk.bf16.gmra.mxu0 %vm785_vm0, %v5942_v21 }
 0x10c   : > { %1255 = vmatmul.bf16.gmra.mxu3 %v6055_v12  ;;  %v4586_v12 = vld [vmem:[%s5897_s16 + $0x78] sm:$0xf] }
 0x10d   : > { %2009 = vmatmul.bf16.gmra.mxu1 %v4575_v49  ;;  %v6367_v36 = vadd.f32 %v1051_v46, %v963_v14  ;;  %v5540_v14 = vld [vmem:[%s7585_s3 + $0x88] sm:$0xff] }
 0x10e   : > { %2640 = vmatpush.bf16.msra.mxu0 %v5540_v14 }
 0x10f   : > { %v1002_v8 = vpop.f32.mrf.mxu3  ;;  %v1058_v34 = vpop.f32.mrf.mxu2 }
 0x110   : > { %v1003_v44 = vadd.f32 %v1002_v8, %v6275_v57  ;;  %v875_v59 = vpop.f32.mrf.mxu0  ;;  %v4587_v57 = vor.u32 %v5433_v15, %v4586_v12  ;;  %v4598_v15 = vld [vmem:[%s5897_s16 + $0x90] sm:$0xf] }
 0x112   : > { %v964_v35 = vpop.f32.mrf.mxu1 }
 0x113   : > { %v965_v48 = vadd.f32 %v964_v35, %v875_v59 }
 0x114   : > { %1334 = vmatmul.bf16.gmra.mxu2 %v6008_v50  ;;  %v5545_v50 = vld [vmem:[%s7585_s3 + $0xb0] sm:$0xff] }
 0x115   : > { %v6374_v21 = vadd.f32 %v1053_v28, %v965_v48  ;;  %2732 = vmatpush.bf16.msra.mxu1 %v5545_v50 }
 0x117   : > { %v1004_v46 = vpop.f32.mrf.mxu3  ;;  %v1061_v11 = vpop.f32.mrf.mxu2 }
 0x118   : > { %v1005_v16 = vadd.f32 %v1004_v46, %v6293_v37  ;;  %v878_v32 = vpop.f32.mrf.mxu0 }
 0x11a   : > { %v967_v49 = vpop.f32.mrf.mxu1 }
 0x11b   : > { %v968_v22 = vadd.f32 %v967_v49, %v878_v32  ;;  %4499 = vmatmul.msk.bf16.gmra.mxu0 %vm785_vm0, %v5992_v41  ;;  %v5436_v41 = vld [vmem:[%s5897_s16 + $0x98] sm:$0xf0] }
 0x11c   : > { %1260 = vmatmul.bf16.gmra.mxu3 %v6079_v26 }
 0x11d   : > { %2014 = vmatmul.bf16.gmra.mxu1 %v4587_v57  ;;  %v6388_v37 = vadd.f32 %v1056_v62, %v968_v22  ;;  %v4599_v57 = vor.u32 %v5436_v41, %v4598_v15 }
 0x11f   : > { %v1007_v28 = vpop.f32.mrf.mxu3  ;;  %v1063_v8 = vpop.f32.mrf.mxu2 }
 0x120   : > { %v1008_v59 = vadd.f32 %v1007_v28, %v6312_v19  ;;  %v880_v35 = vpop.f32.mrf.mxu0 }
 0x122   : > { %v969_v48 = vpop.f32.mrf.mxu1 }
 0x123   : > { %v970_v20 = vadd.f32 %v969_v48, %v880_v35  ;;  %v5483_v35 = vld [vmem:[%s7584_s2 + $0x180] sm:$0xff]  ;;  %v5439_v48 = vld [vmem:[%s5897_s16 + $0xb0] sm:$0xf0] }
 0x124   : > { %1339 = vmatmul.bf16.gmra.mxu2 %v6036_v0  ;;  %2083 = vmatpush.bf16.msra.mxu3 %v5483_v35  ;;  %v5442_v35 = vld [vmem:[%s5897_s16 + $0xc8] sm:$0xf0] }
 0x125   : > { %v6392_v12 = vadd.f32 %v1058_v34, %v970_v20 }
 0x127   : > { %v1009_v46 = vpop.f32.mrf.mxu3  ;;  %v1066_v26 = vpop.f32.mrf.mxu2 }
 0x128   : > { %v1010_v62 = vadd.f32 %v1009_v46, %v6324_v55  ;;  %v883_v32 = vpop.f32.mrf.mxu0 }
 0x12a   : > { %v972_v49 = vpop.f32.mrf.mxu1 }
 0x12b   : > { %v973_v22 = vadd.f32 %v972_v49, %v883_v32  ;;  %4500 = vmatmul.msk.bf16.gmra.mxu0 %vm785_vm0, %v6015_v53 }
 0x12c   : > { %1265 = vmatmul.bf16.gmra.mxu3 %v6100_v42  ;;  %v4610_v42 = vld [vmem:[%s5897_s16 + $0xa8] sm:$0xf] }
 0x12d   : > { %2019 = vmatmul.bf16.gmra.mxu1 %v4599_v57  ;;  %v6400_v0 = vadd.f32 %v1061_v11, %v973_v22  ;;  %v4611_v41 = vor.u32 %v5439_v48, %v4610_v42  ;;  %v5539_v57 = vld [vmem:[%s7585_s3 + $0x80] sm:$0xff] }
 0x12e   : > { %2641 = vmatpush.bf16.msra.mxu0 %v5539_v57 }
 0x12f   : > { %v1068_v19 = vpop.f32.mrf.mxu2  ;;  %v1091_v34 = vpop.f32.mrf.mxu3 }
 0x130   : > { %v6402_v14 = vadd.f32 %v1091_v34, %v1003_v44  ;;  %v885_v50 = vpop.f32.mrf.mxu0 }
 0x132   : > { %v974_v55 = vpop.f32.mrf.mxu1 }
 0x133   : > { %v975_v28 = vadd.f32 %v974_v55, %v885_v50 }
 0x134   : > { %1344 = vmatmul.bf16.gmra.mxu2 %v6057_v13 }
 0x135   : > { %v6408_v53 = vadd.f32 %v1063_v8, %v975_v28  ;;  %v4622_v28 = vld [vmem:[%s5897_s16 + $0xc0] sm:$0xf] }
 0x136   : > { %v4623_v48 = vor.u32 %v5442_v35, %v4622_v28 }
 0x137   : > { %v1071_v11 = vpop.f32.mrf.mxu2  ;;  %v1093_v20 = vpop.f32.mrf.mxu3 }
 0x138   : > { %v6412_v15 = vadd.f32 %v1093_v20, %v1005_v16  ;;  %v888_v44 = vpop.f32.mrf.mxu0 }
 0x13a   : > { %v977_v46 = vpop.f32.mrf.mxu1 }
 0x13b   : > { %v978_v32 = vadd.f32 %v977_v46, %v888_v44  ;;  %4501 = vmatmul.msk.bf16.gmra.mxu0 %vm785_vm0, %v6045_v4  ;;  %v5482_v46 = vld [vmem:[%s7584_s2 + $0x178] sm:$0xff] }
 0x13c   : > { %1270 = vmatmul.bf16.gmra.mxu3 %v6130_v61 }
 0x13d   : > { %2024 = vmatmul.bf16.gmra.mxu1 %v4611_v41  ;;  %v6420_v13 = vadd.f32 %v1066_v26, %v978_v32  ;;  %2084 = vmatpush.bf16.msra.mxu3 %v5482_v46 }
 0x13f   : > { %v1073_v16 = vpop.f32.mrf.mxu2  ;;  %v1096_v8 = vpop.f32.mrf.mxu3 }
 0x140   : > { %v6422_v49 = vadd.f32 %v1096_v8, %v1008_v59  ;;  %v890_v22 = vpop.f32.mrf.mxu0  ;;  %v5445_v8 = vld [vmem:[%s5897_s16 + $0xe0] sm:$0xf0] }
 0x142   : > { %v979_v34 = vpop.f32.mrf.mxu1 }
 0x143   : > { %v980_v50 = vadd.f32 %v979_v34, %v890_v22 }
 0x144   : > { %1349 = vmatmul.bf16.gmra.mxu2 %v6081_v27 }
 0x145   : > { %v6425_v55 = vadd.f32 %v1068_v19, %v980_v50 }
 0x147   : > { %v1076_v4 = vpop.f32.mrf.mxu2  ;;  %v1098_v42 = vpop.f32.mrf.mxu3 }
 0x148   : > { %v6429_v61 = vadd.f32 %v1098_v42, %v1010_v62  ;;  %v893_v26 = vpop.f32.mrf.mxu0 }
 0x14a   : > { %v982_v20 = vpop.f32.mrf.mxu1 }
 0x14b   : > { %v983_v44 = vadd.f32 %v982_v20, %v893_v26  ;;  %4502 = vmatmul.msk.bf16.gmra.mxu0 %vm785_vm0, %v6066_v17  ;;  %v5487_v17 = vld [vmem:[%s7584_s2 + $0x1a0] sm:$0xff]  ;;  %v5538_v26 = vld [vmem:[%s7585_s3 + $0x78] sm:$0xff] }
 0x14c   : > { %1275 = vmatmul.bf16.gmra.mxu3 %v6163_v23  ;;  %2176 = vmatpush.bf16.msra.mxu2 %v5487_v17 }
 0x14d   : > { %2029 = vmatmul.bf16.gmra.mxu1 %v4623_v48  ;;  %v6434_v27 = vadd.f32 %v1071_v11, %v983_v44  ;;  %v4634_v11 = vld [vmem:[%s5897_s16 + $0xd8] sm:$0xf]  ;;  %2642 = vmatpush.bf16.msra.mxu0 %v5538_v26 }
 0x14e   : > { %v4635_v35 = vor.u32 %v5445_v8, %v4634_v11 }
 0x14f   : > { %v1078_v59 = vpop.f32.mrf.mxu2  ;;  %v1236_v19 = vpop.f32.mrf.mxu3 }
 0x150   : > { %v6437_v41 = vadd.f32 %v1236_v19, %v6212_v5  ;;  %v895_v62 = vpop.f32.mrf.mxu0 }
 0x152   : > { %v984_v32 = vpop.f32.mrf.mxu1 }
 0x153   : > { %v985_v57 = vadd.f32 %v984_v32, %v895_v62  ;;  %v5448_v32 = vld [vmem:[%s5897_s16 + $0xf8] sm:$0xf0] }
 0x154   : > { %1354 = vmatmul.bf16.gmra.mxu2 %v6108_v45 }
 0x155   : > { %v6446_v23 = vadd.f32 %v1073_v16, %v985_v57  ;;  %v5544_v16 = vld [vmem:[%s7585_s3 + $0xa8] sm:$0xff] }
 0x156   : > { %2733 = vmatpush.bf16.msra.mxu1 %v5544_v16 }
 0x157   : > { %v1081_v5 = vpop.f32.mrf.mxu2  ;;  %v1238_v22 = vpop.f32.mrf.mxu3 }
 0x158   : > { %v6451_v34 = vadd.f32 %v1081_v5, %v6333_v56  ;;  %v1239_v50 = vadd.f32 %v1238_v22, %v6225_v33  ;;  %v898_v28 = vpop.f32.mrf.mxu0 }
 0x15a   : > { %v987_v42 = vpop.f32.mrf.mxu1 }
 0x15b   : > { %v988_v45 = vadd.f32 %v987_v42, %v898_v28  ;;  %4503 = vmatmul.msk.bf16.gmra.mxu0 %vm785_vm0, %v6090_v31  ;;  %v5481_v28 = vld [vmem:[%s7584_s2 + $0x170] sm:$0xff] }
 0x15c   : > { %1280 = vmatmul.bf16.gmra.mxu3 %v6196_v58  ;;  %v4646_v58 = vld [vmem:[%s5897_s16 + $0xf0] sm:$0xf] }
 0x15d   : > { %2034 = vmatmul.bf16.gmra.mxu1 %v4635_v35  ;;  %v6463_v33 = vadd.f32 %v1076_v4, %v988_v45  ;;  %2085 = vmatpush.bf16.msra.mxu3 %v5481_v28 }
 0x15f   : > { %v1083_v56 = vpop.f32.mrf.mxu2  ;;  %v1241_v48 = vpop.f32.mrf.mxu3 }
 0x160   : > { %v6466_v20 = vadd.f32 %v1083_v56, %v6343_v47  ;;  %v1242_v44 = vadd.f32 %v1241_v48, %v6242_v2  ;;  %v900_v19 = vpop.f32.mrf.mxu0  ;;  %v4647_v2 = vor.u32 %v5448_v32, %v4646_v58  ;;  %v4670_v32 = vld [vmem:[%s5897_s16 + $0x120] sm:$0xf] }
 0x162   : > { %v989_v62 = vpop.f32.mrf.mxu1 }
 0x163   : > { %v990_v46 = vadd.f32 %v989_v62, %v900_v19 }
 0x164   : > { %1359 = vmatmul.bf16.gmra.mxu2 %v6132_v1 }
 0x165   : > { %v6470_v31 = vadd.f32 %v1078_v59, %v990_v46 }
 0x167   : > { %v1086_v4 = vpop.f32.mrf.mxu2  ;;  %v1243_v57 = vpop.f32.mrf.mxu3 }
 0x168   : > { %v6475_v17 = vadd.f32 %v1086_v4, %v6354_v63  ;;  %v1244_v11 = vadd.f32 %v1243_v57, %v6258_v39  ;;  %v1414_v47 = vpop.f32.mrf.mxu0  ;;  %v5454_v4 = vld [vmem:[%s5897_s16 + $0x128] sm:$0xf0] }
 0x16a   : > { %v6478_v8 = vpop.f32.mrf.mxu1 }
 0x16b   : > { %4504 = vmatmul.msk.bf16.gmra.mxu0 %vm785_vm0, %v6120_v54  ;;  %v4658_v54 = vld [vmem:[%s5897_s16 + $0x108] sm:$0xf] }
 0x16c   : > { %1285 = vmatmul.bf16.gmra.mxu3 %v6232_v51  ;;  %v5451_v51 = vld [vmem:[%s5897_s16 + $0x110] sm:$0xf0] }
 0x16d   : > { %2039 = vmatmul.bf16.gmra.mxu1 %v4647_v2 }
 0x16f   : > { %v1088_v1 = vpop.f32.mrf.mxu2  ;;  %v1246_v59 = vpop.f32.mrf.mxu3 }
 0x170   : > { %v6484_v5 = vadd.f32 %v1088_v1, %v6362_v24  ;;  %v1247_v63 = vadd.f32 %v1246_v59, %v6271_v18  ;;  %v1416_v39 = vpop.f32.mrf.mxu0  ;;  %v4659_v18 = vor.u32 %v5451_v51, %v4658_v54  ;;  %v4671_v1 = vor.u32 %v5454_v4, %v4670_v32  ;;  %v5480_v51 = vld [vmem:[%s7584_s2 + $0x168] sm:$0xff] }
 0x171   : > { %2086 = vmatpush.bf16.msra.mxu3 %v5480_v51 }
 0x172   : > { %v6487_v22 = vpop.f32.mrf.mxu1 }
 0x174   : > { %1364 = vmatmul.bf16.gmra.mxu2 %v6168_v25  ;;  %v5537_v25 = vld [vmem:[%s7585_s3 + $0x70] sm:$0xff] }
 0x175   : > { %2643 = vmatpush.bf16.msra.mxu0 %v5537_v25 }
 0x177   : > { %v1248_v35 = vpop.f32.mrf.mxu3  ;;  %v1325_v42 = vpop.f32.mrf.mxu2 }
 0x178   : > { %v1249_v45 = vadd.f32 %v1248_v35, %v6289_v29  ;;  %v1326_v24 = vadd.f32 %v1325_v42, %v6437_v41  ;;  %v1419_v26 = vpop.f32.mrf.mxu0  ;;  %v7629_v35 = vld [vmem:[#allocation10_spill] sm:$0xff] }
 0x17a   : > { %v6497_v16 = vpop.f32.mrf.mxu1  ;;  %v6499_v56 = vadd.f32 %v1414_v47, %v1326_v24 }
 0x17b   : > { %4505 = vmatmul.msk.bf16.gmra.mxu0 %vm785_vm0, %v6147_v9 }
 0x17c   : > { %1290 = vmatmul.bf16.gmra.mxu3 %v6265_v60 }
 0x17d   : > { %2044 = vmatmul.bf16.gmra.mxu1 %v4659_v18 }
 0x17f   : > { %v1251_v29 = vpop.f32.mrf.mxu3  ;;  %v1327_v41 = vpop.f32.mrf.mxu2 }
 0x180   : > { %v1252_v48 = vadd.f32 %v1251_v29, %v6308_v3  ;;  %v1328_v19 = vadd.f32 %v1327_v41, %v1239_v50  ;;  %v1421_v62 = vpop.f32.mrf.mxu0  ;;  %v5536_v41 = vld [vmem:[%s7585_s3 + $0x68] sm:$0xff] }
 0x181   : > { %2644 = vmatpush.bf16.msra.mxu0 %v5536_v41 }
 0x182   : > { %v6508_v46 = vpop.f32.mrf.mxu1  ;;  %v6510_v58 = vadd.f32 %v1416_v39, %v1328_v19  ;;  %v5543_v19 = vld [vmem:[%s7585_s3 + $0xa0] sm:$0xff] }
 0x183   : > { %2734 = vmatpush.bf16.msra.mxu1 %v5543_v19 }
 0x184   : > { %1369 = vmatmul.bf16.gmra.mxu2 %v6201_v6 }
 0x187   : > { %v1253_v57 = vpop.f32.mrf.mxu3  ;;  %v1330_v9 = vpop.f32.mrf.mxu2 }
 0x188   : > { %v1254_v60 = vadd.f32 %v1253_v57, %v6320_v38  ;;  %v1331_v47 = vadd.f32 %v1330_v9, %v1242_v44  ;;  %v1424_v2 = vpop.f32.mrf.mxu0 }
 0x18a   : > { %v6516_v59 = vpop.f32.mrf.mxu1  ;;  %v6518_v3 = vadd.f32 %v1419_v26, %v1331_v47 }
 0x18b   : > { %4506 = vmatmul.msk.bf16.gmra.mxu0 %vm785_vm0, %v6183_v40  ;;  %v4682_v40 = vld [vmem:[%s5897_s16 + $0x138] sm:$0xf] }
 0x18c   : > { %1295 = vmatmul.bf16.gmra.mxu3 %v6295_v7  ;;  %v5457_v7 = vld [vmem:[%s5897_s16 + $0x140] sm:$0xf0] }
 0x18d   : > { %2049 = vmatmul.bf16.gmra.mxu1 %v4671_v1  ;;  %v4683_v18 = vor.u32 %v5457_v7, %v4682_v40  ;;  %v7632_v1 = vld [vmem:[#allocation12_spill] sm:$0xff] }
 0x18f   : > { %v1256_v6 = vpop.f32.mrf.mxu3  ;;  %v1332_v50 = vpop.f32.mrf.mxu2 }
 0x190   : > { %v1257_v39 = vadd.f32 %v1256_v6, %v6328_v43  ;;  %v1333_v38 = vadd.f32 %v1332_v50, %v1244_v11  ;;  %v1426_v44 = vpop.f32.mrf.mxu0  ;;  %v4694_v6 = vld [vmem:[%s5897_s16 + $0x150] sm:$0xf]  ;;  %v5460_v50 = vld [vmem:[%s5897_s16 + $0x158] sm:$0xf0] }
 0x192   : > { %v6524_v28 = vpop.f32.mrf.mxu1  ;;  %v6526_v54 = vadd.f32 %v1421_v62, %v1333_v38  ;;  %v7630_v62 = vld [vmem:[#allocation9_spill] sm:$0xff] }
 0x194   : > { %1374 = vmatmul.bf16.gmra.mxu2 %v7629_v35  ;;  %v5479_v35 = vld [vmem:[%s7584_s2 + $0x160] sm:$0xff] }
 0x195   : > { %2087 = vmatpush.bf16.msra.mxu3 %v5479_v35  ;;  %v7636_v35 = vld [vmem:[#allocation13_spill] sm:$0xff] }
 0x197   : > { %v1258_v42 = vpop.f32.mrf.mxu3  ;;  %v1335_v24 = vpop.f32.mrf.mxu2 }
 0x198   : > { %v1259_v26 = vadd.f32 %v1258_v42, %v6338_v10  ;;  %v1336_v43 = vadd.f32 %v1335_v24, %v1247_v63  ;;  %v1429_v11 = vpop.f32.mrf.mxu0  ;;  %v7631_v10 = vld [vmem:[#allocation2_spill] sm:$0xff]  ;;  %v7633_v24 = vld [vmem:[#allocation11_spill] sm:$0xff] }
 0x19a   : > { %v6535_v25 = vpop.f32.mrf.mxu1  ;;  %v6537_v29 = vadd.f32 %v1424_v2, %v1336_v43  ;;  %v7634_v43 = vld [vmem:[#allocation3_spill] sm:$0xff] }
 0x19b   : > { %4507 = vmatmul.msk.bf16.gmra.mxu0 %vm785_vm0, %v7630_v62 }
 0x19c   : > { %1300 = vmatmul.bf16.gmra.mxu3 %v7631_v10 }
 0x19d   : > { %2054 = vmatmul.bf16.gmra.mxu1 %v4683_v18 }
 0x19f   : > { %v1261_v63 = vpop.f32.mrf.mxu3  ;;  %v1337_v32 = vpop.f32.mrf.mxu2 }
 0x1a0   : > { %v1262_v4 = vadd.f32 %v1261_v63, %v6351_v30  ;;  %v1338_v57 = vadd.f32 %v1337_v32, %v1249_v45  ;;  %v1431_v9 = vpop.f32.mrf.mxu0  ;;  %v4695_v45 = vor.u32 %v5460_v50, %v4694_v6  ;;  %v7635_v63 = vld [vmem:[#allocation14_spill] sm:$0xff]  ;;  %v5463_v32 = vld [vmem:[%s5897_s16 + $0x170] sm:$0xf0] }
 0x1a2   : > { %v6549_v47 = vpop.f32.mrf.mxu1  ;;  %v6551_v2 = vadd.f32 %v1426_v44, %v1338_v57 }
 0x1a4   : > { %1379 = vmatmul.bf16.gmra.mxu2 %v7632_v1 }
 0x1a7   : > { %v1263_v38 = vpop.f32.mrf.mxu3  ;;  %v1340_v51 = vpop.f32.mrf.mxu2 }
 0x1a8   : > { %v1264_v40 = vadd.f32 %v1263_v38, %v6357_v52  ;;  %v1341_v7 = vadd.f32 %v1340_v51, %v1252_v48  ;;  %v1434_v30 = vpop.f32.mrf.mxu0 }
 0x1aa   : > { %v6560_v42 = vpop.f32.mrf.mxu1  ;;  %v6562_v44 = vadd.f32 %v1429_v11, %v1341_v7  ;;  %v4706_v11 = vld [vmem:[%s5897_s16 + $0x168] sm:$0xf] }
 0x1ab   : > { %4508 = vmatmul.msk.bf16.gmra.mxu0 %vm785_vm0, %v7633_v24  ;;  %v4707_v51 = vor.u32 %v5463_v32, %v4706_v11  ;;  %v4718_v11 = vld [vmem:[%s5897_s16 + $0x180] sm:$0xf]  ;;  %v5466_v32 = vld [vmem:[%s5897_s16 + $0x188] sm:$0xf0] }
 0x1ac   : > { %1305 = vmatmul.bf16.gmra.mxu3 %v7634_v43 }
 0x1ad   : > { %2059 = vmatmul.bf16.gmra.mxu1 %v4695_v45 }
 0x1af   : > { %v1266_v18 = vpop.f32.mrf.mxu3  ;;  %v1342_v41 = vpop.f32.mrf.mxu2 }
 0x1b0   : > { %v6568_v52 = vadd.f32 %v1266_v18, %v6367_v36  ;;  %v1343_v48 = vadd.f32 %v1342_v41, %v1254_v60  ;;  %v1436_v19 = vpop.f32.mrf.mxu0  ;;  %v7638_v41 = vld [vmem:[#allocation5_spill] sm:$0xff] }
 0x1b2   : > { %v6570_v62 = vpop.f32.mrf.mxu1  ;;  %v6572_v10 = vadd.f32 %v1431_v9, %v1343_v48  ;;  %v5535_v9 = vld [vmem:[%s7585_s3 + $0x60] sm:$0xff]  ;;  %v5423_v48 = vld [vmem:[%s5897_s16 + $0x34] sm:$0xf] }
 0x1b3   : > { %2645 = vmatpush.bf16.msra.mxu0 %v5535_v9 }
 0x1b4   : > { %1384 = vmatmul.bf16.gmra.mxu2 %v7635_v63  ;;  %v4552_v63 = vld [vmem:[%s5897_s16 + $0x3c] sm:$0xf0] }
 0x1b7   : > { %v1268_v57 = vpop.f32.mrf.mxu3  ;;  %v1345_v1 = vpop.f32.mrf.mxu2 }
 0x1b8   : > { %v6578_v6 = vadd.f32 %v1268_v57, %v6374_v21  ;;  %v1346_v50 = vadd.f32 %v1345_v1, %v1257_v39  ;;  %v1439_v38 = vpop.f32.mrf.mxu0  ;;  %v7637_v21 = vld [vmem:[#allocation4_spill] sm:$0xff] }
 0x1ba   : > { %v6580_v36 = vpop.f32.mrf.mxu1  ;;  %v6582_v60 = vadd.f32 %v1434_v30, %v1346_v50 }
 0x1bb   : > { %4509 = vmatmul.msk.bf16.gmra.mxu0 %vm785_vm0, %v7636_v35 }
 0x1bc   : > { %1310 = vmatmul.bf16.gmra.mxu3 %v7637_v21  ;;  %v7639_v21 = vld [vmem:[#allocation15_spill] sm:$0xff] }
 0x1bd   : > { %2064 = vmatmul.bf16.gmra.mxu1 %v4707_v51 }
 0x1bf   : > { %v1271_v39 = vpop.f32.mrf.mxu3  ;;  %v1347_v7 = vpop.f32.mrf.mxu2 }
 0x1c0   : > { %v6591_v45 = vadd.f32 %v1271_v39, %v6388_v37  ;;  %v1348_v30 = vadd.f32 %v1347_v7, %v1259_v26  ;;  %v1441_v24 = vpop.f32.mrf.mxu0  ;;  %v4555_v37 = vor.u32 %v5423_v48, %v4552_v63  ;;  %v4719_v26 = vor.u32 %v5466_v32, %v4718_v11  ;;  %v7640_v63 = vld [vmem:[#allocation6_spill] sm:$0xff]  ;;  %v5426_v11 = vld [vmem:[%s5897_s16 + $0x4c] sm:$0xf]  ;;  %v5532_v32 = vld [vmem:[%s7585_s3 + $0x58] sm:$0xff] }
 0x1c1   : > { %2993 = vmatpush.bf16.msrb.mxu2 %v5532_v32  ;;  %v7642_v32 = vld [vmem:[#allocation8_spill] sm:$0xff] }
 0x1c2   : > { %v6593_v43 = vpop.f32.mrf.mxu1  ;;  %v6595_v18 = vadd.f32 %v1436_v19, %v1348_v30 }
 0x1c4   : > { %1389 = vmatmul.bf16.gmra.mxu2 %v7638_v41 }
 0x1c7   : > { %v1273_v57 = vpop.f32.mrf.mxu3  ;;  %v1350_v1 = vpop.f32.mrf.mxu2 }
 0x1c8   : > { %v6603_v50 = vadd.f32 %v1273_v57, %v6392_v12  ;;  %v1351_v51 = vadd.f32 %v1350_v1, %v1262_v4  ;;  %v1444_v9 = vpop.f32.mrf.mxu0  ;;  %v4730_v57 = vld [vmem:[%s5897_s16 + $0x198] sm:$0xf] }
 0x1ca   : > { %v6605_v35 = vpop.f32.mrf.mxu1  ;;  %v6607_v19 = vadd.f32 %v1439_v38, %v1351_v51  ;;  %v5528_v38 = vld [vmem:[%s7585_s3 + $0x38] sm:$0xff] }
 0x1cb   : > { %4510 = vmatmul.msk.bf16.gmra.mxu0 %vm785_vm0, %v7639_v21  ;;  %2900 = vmatpush.bf16.msrb.mxu3 %v5528_v38  ;;  %v5586_v38 = vld [vmem:[%s7585_s3 + $0xf8] sm:$0xff] }
 0x1cc   : > { %2088 = vmatmul.bf16.vlgmr.msra.gmra.mxu3 %v4555_v37  ;;  %3399 = vmatpush.bf16.msrb.mxu0 %v5586_v38 }
 0x1cd   : > { %2069 = vmatmul.bf16.gmra.mxu1 %v4719_v26 }
 0x1cf   : > { %v1276_v39 = vpop.f32.mrf.mxu3  ;;  %v1352_v12 = vpop.f32.mrf.mxu2 }
 0x1d0   : > { %v6612_v4 = vadd.f32 %v1276_v39, %v6400_v0  ;;  %v1353_v7 = vadd.f32 %v1352_v12, %v1264_v40  ;;  %v1446_v30 = vpop.f32.mrf.mxu0  ;;  %v4564_v0 = vld [vmem:[%s5897_s16 + $0x54] sm:$0xf0]  ;;  %v5469_v40 = vld [vmem:[%s5897_s16 + $0x1a0] sm:$0xf0] }
 0x1d1   : > { %v4567_v26 = vor.u32 %v5426_v11, %v4564_v0  ;;  %v4731_v39 = vor.u32 %v5469_v40, %v4730_v57 }
 0x1d2   : > { %v6614_v41 = vpop.f32.mrf.mxu1  ;;  %v6616_v48 = vadd.f32 %v1441_v24, %v1353_v7 }
 0x1d4   : > { %1394 = vmatmul.bf16.gmra.mxu2 %v7640_v63  ;;  %v5590_v63 = vld [vmem:[%s7585_s3 + $0x118] sm:$0xff] }
 0x1d5   : > { %3492 = vmatpush.bf16.msrb.mxu1 %v5590_v63 }
 0x1d7   : > { %v1278_v1 = vpop.f32.mrf.mxu3  ;;  %v1355_v24 = vpop.f32.mrf.mxu2 }
 0x1d8   : > { %v6630_v51 = vadd.f32 %v1278_v1, %v6408_v53  ;;  %v1356_v37 = vadd.f32 %v1355_v24, %v6568_v52  ;;  %v1449_v21 = vpop.f32.mrf.mxu0  ;;  %v7644_v1 = vld [vmem:[#allocation7_spill] sm:$0xff]  ;;  %v4854_v24 = vld [vmem:[%s6655_s20 + $0x10] sm:$0xf] }
 0x1da   : > { %v6633_v12 = vpop.f32.mrf.mxu1  ;;  %v6635_v7 = vadd.f32 %v1444_v9, %v1356_v37  ;;  %v5492_v37 = vld [vmem:[%s6655_s20 + $0x14] sm:$0xf0] }
 0x1db   : > { %7641 = vst [vmem:[#allocation10_spill] sm:$0xff] %v6633_v12  ;;  %4511 = vmatmul.msk.bf16.gmra.mxu0 %vm785_vm0, %v7642_v32  ;;  %v6666_v32 = vor.u32 %v5492_v37, %v4854_v24 }
 0x1dc   : > { %2093 = vmatmul.bf16.gmra.mxu3 %v4567_v26  ;;  %v5491_v26 = vld [vmem:[%s6655_s20 + $0x14] sm:$0xf] }
 0x1dd   : > { %2074 = vmatmul.bf16.gmra.mxu1 %v4731_v39  ;;  %v4856_v39 = vld [vmem:[%s6655_s20 + $0x18] sm:$0xf0] }
 0x1df   : > { %v1281_v53 = vpop.f32.mrf.mxu3  ;;  %v1357_v52 = vpop.f32.mrf.mxu2 }
 0x1e0   : > { %v6647_v9 = vadd.f32 %v1281_v53, %v6420_v13  ;;  %v1358_v11 = vadd.f32 %v1357_v52, %v6578_v6  ;;  %v1451_v0 = vpop.f32.mrf.mxu0  ;;  %v5429_v13 = vld [vmem:[%s5897_s16 + $0x64] sm:$0xf]  ;;  %v4576_v6 = vld [vmem:[%s5897_s16 + $0x6c] sm:$0xf0] }
 0x1e1   : > { %v4579_v52 = vor.u32 %v5429_v13, %v4576_v6 }
 0x1e2   : > { %v6650_v57 = vpop.f32.mrf.mxu1  ;;  %v6657_v40 = vadd.f32 %v1446_v30, %v1358_v11 }
 0x1e3   : > { %7643 = vst [vmem:[#allocation9_spill] sm:$0xff] %v6650_v57 }
 0x1e4   : > { %1399 = vmatmul.bf16.gmra.mxu2 %v7644_v1  ;;  %v6672_v1 = vor.u32 %v5491_v26, %v4856_v39 }
 0x1e6   : > { %7645 = vst [vmem:[#allocation2_spill] sm:$0xff] %v6672_v1 }
 0x1e7   : > { %v1283_v38 = vpop.f32.mrf.mxu3  ;;  %v1360_v63 = vpop.f32.mrf.mxu2 }
 0x1e8   : > { %v6669_v53 = vadd.f32 %v1283_v38, %v6425_v55  ;;  %v1361_v30 = vadd.f32 %v1360_v63, %v6591_v45  ;;  %v1454_v11 = vpop.f32.mrf.mxu0  ;;  %v4558_v55 = vld [vmem:[%s5897_s16 + $0x38] sm:$0xf]  ;;  %v5425_v45 = vld [vmem:[%s5897_s16 + $0x40] sm:$0xf0]  ;;  %v5527_v63 = vld [vmem:[%s7585_s3 + $0x30] sm:$0xff] }
 0x1e9   : > { %v4559_v6 = vor.u32 %v5425_v45, %v4558_v55  ;;  %2901 = vmatpush.bf16.msrb.mxu3 %v5527_v63 }
 0x1ea   : > { %v6674_v57 = vpop.f32.mrf.mxu1  ;;  %v6676_v12 = vadd.f32 %v1449_v21, %v1361_v30  ;;  %v5432_v30 = vld [vmem:[%s5897_s16 + $0x7c] sm:$0xf] }
 0x1eb   : > { %7646 = vst [vmem:[#allocation12_spill] sm:$0xff] %v6674_v57  ;;  %2646 = vmatmul.bf16.vlgmr.msra.gmra.mxu0 %v6666_v32 }
 0x1ec   : > { %7647 = vst [vmem:[#allocation11_spill] sm:$0xff] %v6676_v12  ;;  %2098 = vmatmul.bf16.gmra.mxu3 %v4579_v52  ;;  %v4862_v52 = vld [vmem:[%s6655_s20 + $0x20] sm:$0xf]  ;;  %v5585_v12 = vld [vmem:[%s7585_s3 + $0xf0] sm:$0xff] }
 0x1ed   : > { %5028 = vmatmul.msk.bf16.vlgmr.msra.gmra.mxu1 %vm2589_vm1, %v6672_v1  ;;  %v5494_v1 = vld [vmem:[%s6655_s20 + $0x24] sm:$0xf0]  ;;  %3400 = vmatpush.bf16.msrb.mxu0 %v5585_v12  ;;  %v5495_v12 = vld [vmem:[%s6655_s20 + $0x34] sm:$0xf] }
 0x1ef   : > { %v1286_v13 = vpop.f32.mrf.mxu3  ;;  %v1362_v24 = vpop.f32.mrf.mxu2 }
 0x1f0   : > { %v6684_v37 = vadd.f32 %v1286_v13, %v6434_v27  ;;  %v1363_v21 = vadd.f32 %v1362_v24, %v6603_v50  ;;  %v1456_v26 = vpop.f32.mrf.mxu0  ;;  %v4588_v27 = vld [vmem:[%s5897_s16 + $0x84] sm:$0xf0]  ;;  %v5493_v13 = vld [vmem:[%s6655_s20 + $0x24] sm:$0xf]  ;;  %v4864_v50 = vld [vmem:[%s6655_s20 + $0x28] sm:$0xf0]  ;;  %v6701_v24 = vor.u32 %v5494_v1, %v4862_v52 }
 0x1f1   : > { %v6707_v57 = vor.u32 %v5493_v13, %v4864_v50 }
 0x1f2   : > { %v6687_v39 = vpop.f32.mrf.mxu1  ;;  %v6689_v38 = vadd.f32 %v1451_v0, %v1363_v21 }
 0x1f3   : > { %7648 = vst [vmem:[#allocation3_spill] sm:$0xff] %v6687_v39  ;;  %v4591_v39 = vor.u32 %v5432_v30, %v4588_v27 }
 0x1f4   : > { %7649 = vst [vmem:[#allocation14_spill] sm:$0xff] %v6689_v38  ;;  %4812 = vmatmul.msk.bf16.vlgmr.msra.gmra.mxu2 %vm785_vm0, %v4559_v6 }
 0x1f5   : > { %7650 = vst [vmem:[#allocation13_spill] sm:$0xff] %v6707_v57 }
 0x1f7   : > { %v1288_v55 = vpop.f32.mrf.mxu3  ;;  %v1365_v45 = vpop.f32.mrf.mxu2 }
 0x1f8   : > { %v6704_v0 = vadd.f32 %v1288_v55, %v6446_v23  ;;  %v1366_v21 = vadd.f32 %v1365_v45, %v6612_v4  ;;  %v1459_v6 = vpop.f32.mrf.mxu0  ;;  %v4570_v23 = vld [vmem:[%s5897_s16 + $0x50] sm:$0xf]  ;;  %v5428_v4 = vld [vmem:[%s5897_s16 + $0x58] sm:$0xf0]  ;;  %v5435_v55 = vld [vmem:[%s5897_s16 + $0x94] sm:$0xf] }
 0x1f9   : > { %v4571_v27 = vor.u32 %v5428_v4, %v4570_v23  ;;  %v4870_v45 = vld [vmem:[%s6655_s20 + $0x30] sm:$0xf] }
 0x1fa   : > { %v6709_v38 = vpop.f32.mrf.mxu1  ;;  %v6711_v63 = vadd.f32 %v1454_v11, %v1366_v21  ;;  %v5496_v21 = vld [vmem:[%s6655_s20 + $0x34] sm:$0xf0] }
 0x1fb   : > { %7651 = vst [vmem:[#allocation4_spill] sm:$0xff] %v6709_v38  ;;  %2651 = vmatmul.bf16.gmra.mxu0 %v6701_v24  ;;  %v4872_v38 = vld [vmem:[%s6655_s20 + $0x38] sm:$0xf0] }
 0x1fc   : > { %7652 = vst [vmem:[#allocation5_spill] sm:$0xff] %v6711_v63  ;;  %2103 = vmatmul.bf16.gmra.mxu3 %v4591_v39  ;;  %v6736_v63 = vor.u32 %v5496_v21, %v4870_v45  ;;  %v5431_v45 = vld [vmem:[%s5897_s16 + $0x70] sm:$0xf0] }
 0x1fd   : > { %5029 = vmatmul.msk.bf16.gmra.mxu1 %vm2589_vm1, %v6707_v57  ;;  %v4600_v57 = vld [vmem:[%s5897_s16 + $0x9c] sm:$0xf0] }
 0x1fe   : > { %v4603_v23 = vor.u32 %v5435_v55, %v4600_v57 }
 0x1ff   : > { %v1291_v11 = vpop.f32.mrf.mxu3  ;;  %v1367_v1 = vpop.f32.mrf.mxu2 }
 0x200   : > { %v6722_v30 = vadd.f32 %v1291_v11, %v6463_v33  ;;  %v1368_v52 = vadd.f32 %v1367_v1, %v6630_v51  ;;  %v1461_v13 = vpop.f32.mrf.mxu0  ;;  %v6742_v1 = vor.u32 %v5495_v12, %v4872_v38 }
 0x202   : > { %v6725_v39 = vpop.f32.mrf.mxu1  ;;  %v6727_v50 = vadd.f32 %v1456_v26, %v1368_v52  ;;  %7654 = vst [vmem:[#allocation6_spill] sm:$0xff] %v6742_v1 }
 0x203   : > { %7653 = vst [vmem:[#allocation15_spill] sm:$0xff] %v6725_v39 }
 0x204   : > { %4813 = vmatmul.msk.bf16.gmra.mxu2 %vm785_vm0, %v4571_v27 }
 0x207   : > { %v1293_v33 = vpop.f32.mrf.mxu3  ;;  %v1370_v11 = vpop.f32.mrf.mxu2 }
 0x208   : > { %v6739_v51 = vadd.f32 %v1293_v33, %v6470_v31  ;;  %v1371_v26 = vadd.f32 %v1370_v11, %v6647_v9  ;;  %v1464_v4 = vpop.f32.mrf.mxu0  ;;  %v4582_v31 = vld [vmem:[%s5897_s16 + $0x68] sm:$0xf] }
 0x209   : > { %v4583_v55 = vor.u32 %v5431_v45, %v4582_v31  ;;  %v5526_v11 = vld [vmem:[%s7585_s3 + $0x28] sm:$0xff]  ;;  %v5497_v31 = vld [vmem:[%s6655_s20 + $0x44] sm:$0xf] }
 0x20a   : > { %v6744_v52 = vpop.f32.mrf.mxu1  ;;  %v6746_v27 = vadd.f32 %v1459_v6, %v1371_v26  ;;  %v5438_v26 = vld [vmem:[%s5897_s16 + $0xac] sm:$0xf]  ;;  %2902 = vmatpush.bf16.msrb.mxu3 %v5526_v11 }
 0x20b   : > { %7655 = vst [vmem:[#allocation8_spill] sm:$0xff] %v6744_v52  ;;  %2656 = vmatmul.bf16.gmra.mxu0 %v6736_v63  ;;  %v4880_v45 = vld [vmem:[%s6655_s20 + $0x48] sm:$0xf0] }
 0x20c   : > { %2108 = vmatmul.bf16.gmra.mxu3 %v4603_v23  ;;  %v4878_v23 = vld [vmem:[%s6655_s20 + $0x40] sm:$0xf]  ;;  %v6780_v52 = vor.u32 %v5497_v31, %v4880_v45 }
 0x20d   : > { %5030 = vmatmul.msk.bf16.gmra.mxu1 %vm2589_vm1, %v6742_v1  ;;  %v5498_v1 = vld [vmem:[%s6655_s20 + $0x44] sm:$0xf0] }
 0x20e   : > { %7658 = vst [vmem:[#allocation17_spill] sm:$0xff] %v6780_v52 }
 0x20f   : > { %v1296_v9 = vpop.f32.mrf.mxu3  ;;  %v1372_v57 = vpop.f32.mrf.mxu2 }
 0x210   : > { %v6754_v38 = vadd.f32 %v1296_v9, %v6451_v34  ;;  %v1373_v6 = vadd.f32 %v1372_v57, %v6669_v53  ;;  %v1466_v21 = vpop.f32.mrf.mxu0  ;;  %v5531_v34 = vld [vmem:[%s7585_s3 + $0x50] sm:$0xff]  ;;  %v4612_v53 = vld [vmem:[%s5897_s16 + $0xb4] sm:$0xf0]  ;;  %v6774_v57 = vor.u32 %v5498_v1, %v4878_v23 }
 0x211   : > { %2994 = vmatpush.bf16.msrb.mxu2 %v5531_v34  ;;  %v4615_v11 = vor.u32 %v5438_v26, %v4612_v53  ;;  %v5584_v34 = vld [vmem:[%s7585_s3 + $0xe8] sm:$0xff]  ;;  %v5589_v1 = vld [vmem:[%s7585_s3 + $0x110] sm:$0xff] }
 0x212   : > { %v6757_v12 = vpop.f32.mrf.mxu1  ;;  %v6759_v33 = vadd.f32 %v1461_v13, %v1373_v6  ;;  %3401 = vmatpush.bf16.msrb.mxu0 %v5584_v34  ;;  %3493 = vmatpush.bf16.msrb.mxu1 %v5589_v1  ;;  %v5500_v34 = vld [vmem:[%s6655_s20 + $0x54] sm:$0xf0]  ;;  %v5499_v1 = vld [vmem:[%s6655_s20 + $0x54] sm:$0xf] }
 0x213   : > { %7656 = vst [vmem:[#allocation7_spill] sm:$0xff] %v6757_v12 }
 0x214   : > { %7657 = vst [vmem:[#allocation16_spill] sm:$0xff] %v6759_v33  ;;  %4814 = vmatmul.msk.bf16.gmra.mxu2 %vm785_vm0, %v4583_v55 }
 0x217   : > { %v1298_v13 = vpop.f32.mrf.mxu3  ;;  %v1375_v9 = vpop.f32.mrf.mxu2 }
 0x218   : > { %v6777_v6 = vadd.f32 %v1298_v13, %v6466_v20  ;;  %v1376_v55 = vadd.f32 %v1375_v9, %v6684_v37  ;;  %v1469_v12 = vpop.f32.mrf.mxu0  ;;  %v4594_v20 = vld [vmem:[%s5897_s16 + $0x80] sm:$0xf]  ;;  %v5434_v37 = vld [vmem:[%s5897_s16 + $0x88] sm:$0xf0] }
 0x219   : > { %v4595_v31 = vor.u32 %v5434_v37, %v4594_v20 }
 0x21a   : > { %v6782_v33 = vpop.f32.mrf.mxu1  ;;  %v6784_v39 = vadd.f32 %v1464_v4, %v1376_v55  ;;  %v5441_v55 = vld [vmem:[%s5897_s16 + $0xc4] sm:$0xf] }
 0x21b   : > { %7659 = vst [vmem:[#allocation18_spill] sm:$0xff] %v6782_v33  ;;  %2661 = vmatmul.bf16.gmra.mxu0 %v6774_v57  ;;  %v4888_v33 = vld [vmem:[%s6655_s20 + $0x58] sm:$0xf0] }
 0x21c   : > { %7660 = vst [vmem:[#allocation19_spill] sm:$0xff] %v6784_v39  ;;  %2113 = vmatmul.bf16.gmra.mxu3 %v4615_v11  ;;  %v4886_v11 = vld [vmem:[%s6655_s20 + $0x50] sm:$0xf] }
 0x21d   : > { %5031 = vmatmul.msk.bf16.gmra.mxu1 %vm2589_vm1, %v6780_v52  ;;  %v4624_v52 = vld [vmem:[%s5897_s16 + $0xcc] sm:$0xf0]  ;;  %v6812_v39 = vor.u32 %v5500_v34, %v4886_v11 }
 0x21e   : > { %v4627_v20 = vor.u32 %v5441_v55, %v4624_v52 }
 0x21f   : > { %v1301_v4 = vpop.f32.mrf.mxu3  ;;  %v1377_v26 = vpop.f32.mrf.mxu2 }
 0x220   : > { %v6798_v23 = vadd.f32 %v1301_v4, %v6475_v17  ;;  %v1378_v53 = vadd.f32 %v1377_v26, %v6704_v0  ;;  %v1471_v45 = vpop.f32.mrf.mxu0  ;;  %v6818_v26 = vor.u32 %v5499_v1, %v4888_v33 }
 0x222   : > { %v6801_v13 = vpop.f32.mrf.mxu1  ;;  %v6803_v9 = vadd.f32 %v1466_v21, %v1378_v53  ;;  %7662 = vst [vmem:[#allocation21_spill] sm:$0xff] %v6818_v26 }
 0x223   : > { %7661 = vst [vmem:[#allocation20_spill] sm:$0xff] %v6801_v13  ;;  %v5583_v13 = vld [vmem:[%s7585_s3 + $0xe0] sm:$0xff] }
 0x224   : > { %4815 = vmatmul.msk.bf16.gmra.mxu2 %vm785_vm0, %v4595_v31  ;;  %3402 = vmatpush.bf16.msrb.mxu0 %v5583_v13  ;;  %v5503_v13 = vld [vmem:[%s6655_s20 + $0x74] sm:$0xf] }
 0x227   : > { %v1303_v17 = vpop.f32.mrf.mxu3  ;;  %v1380_v4 = vpop.f32.mrf.mxu2 }
 0x228   : > { %v6815_v0 = vadd.f32 %v1303_v17, %v6484_v5  ;;  %v1381_v21 = vadd.f32 %v1380_v4, %v6722_v30  ;;  %v1474_v37 = vpop.f32.mrf.mxu0  ;;  %v4606_v5 = vld [vmem:[%s5897_s16 + $0x98] sm:$0xf]  ;;  %v5437_v30 = vld [vmem:[%s5897_s16 + $0xa0] sm:$0xf0] }
 0x229   : > { %v4607_v11 = vor.u32 %v5437_v30, %v4606_v5  ;;  %v5525_v4 = vld [vmem:[%s7585_s3 + $0x20] sm:$0xff] }
 0x22a   : > { %v6820_v53 = vpop.f32.mrf.mxu1  ;;  %v6822_v31 = vadd.f32 %v1469_v12, %v1381_v21  ;;  %v5444_v21 = vld [vmem:[%s5897_s16 + $0xdc] sm:$0xf]  ;;  %2903 = vmatpush.bf16.msrb.mxu3 %v5525_v4 }
 0x22b   : > { %7663 = vst [vmem:[#allocation22_spill] sm:$0xff] %v6820_v53  ;;  %2666 = vmatmul.bf16.gmra.mxu0 %v6812_v39 }
 0x22c   : > { %2118 = vmatmul.bf16.gmra.mxu3 %v4627_v20  ;;  %v4894_v20 = vld [vmem:[%s6655_s20 + $0x60] sm:$0xf] }
 0x22d   : > { %5032 = vmatmul.msk.bf16.gmra.mxu1 %vm2589_vm1, %v6818_v26  ;;  %v5502_v26 = vld [vmem:[%s6655_s20 + $0x64] sm:$0xf0] }
 0x22f   : > { %v1306_v52 = vpop.f32.mrf.mxu3  ;;  %v1382_v33 = vpop.f32.mrf.mxu2 }
 0x230   : > { %v6830_v55 = vadd.f32 %v1306_v52, %v6402_v14  ;;  %v1383_v12 = vadd.f32 %v1382_v33, %v6739_v51  ;;  %v1476_v34 = vpop.f32.mrf.mxu0  ;;  %v4636_v14 = vld [vmem:[%s5897_s16 + $0xe4] sm:$0xf0]  ;;  %v5501_v52 = vld [vmem:[%s6655_s20 + $0x64] sm:$0xf]  ;;  %v4896_v51 = vld [vmem:[%s6655_s20 + $0x68] sm:$0xf0]  ;;  %v6847_v33 = vor.u32 %v5502_v26, %v4894_v20 }
 0x231   : > { %v6853_v53 = vor.u32 %v5501_v52, %v4896_v51 }
 0x232   : > { %v6833_v1 = vpop.f32.mrf.mxu1  ;;  %v6835_v17 = vadd.f32 %v1471_v45, %v1383_v12 }
 0x233   : > { %7664 = vst [vmem:[#allocation23_spill] sm:$0xff] %v6833_v1  ;;  %v4639_v1 = vor.u32 %v5444_v21, %v4636_v14 }
 0x234   : > { %7665 = vst [vmem:[#allocation24_spill] sm:$0xff] %v6835_v17  ;;  %4816 = vmatmul.msk.bf16.gmra.mxu2 %vm785_vm0, %v4607_v11 }
 0x235   : > { %7666 = vst [vmem:[#allocation25_spill] sm:$0xff] %v6853_v53 }
 0x237   : > { %v1308_v5 = vpop.f32.mrf.mxu3  ;;  %v1385_v30 = vpop.f32.mrf.mxu2 }
 0x238   : > { %v6850_v45 = vadd.f32 %v1308_v5, %v6412_v15  ;;  %v1386_v12 = vadd.f32 %v1385_v30, %v6754_v38  ;;  %v1479_v11 = vpop.f32.mrf.mxu0  ;;  %v4618_v15 = vld [vmem:[%s5897_s16 + $0xb0] sm:$0xf]  ;;  %v5440_v38 = vld [vmem:[%s5897_s16 + $0xb8] sm:$0xf0]  ;;  %v5447_v5 = vld [vmem:[%s5897_s16 + $0xf4] sm:$0xf] }
 0x239   : > { %v4619_v14 = vor.u32 %v5440_v38, %v4618_v15  ;;  %v4902_v30 = vld [vmem:[%s6655_s20 + $0x70] sm:$0xf] }
 0x23a   : > { %v6855_v17 = vpop.f32.mrf.mxu1  ;;  %v6857_v4 = vadd.f32 %v1474_v37, %v1386_v12  ;;  %v5504_v12 = vld [vmem:[%s6655_s20 + $0x74] sm:$0xf0] }
 0x23b   : > { %7667 = vst [vmem:[#allocation26_spill] sm:$0xff] %v6855_v17  ;;  %2671 = vmatmul.bf16.gmra.mxu0 %v6847_v33  ;;  %v4904_v17 = vld [vmem:[%s6655_s20 + $0x78] sm:$0xf0] }
 0x23c   : > { %7668 = vst [vmem:[#allocation27_spill] sm:$0xff] %v6857_v4  ;;  %2123 = vmatmul.bf16.gmra.mxu3 %v4639_v1  ;;  %v6882_v4 = vor.u32 %v5504_v12, %v4902_v30 }
 0x23d   : > { %5033 = vmatmul.msk.bf16.gmra.mxu1 %vm2589_vm1, %v6853_v53  ;;  %v4648_v53 = vld [vmem:[%s5897_s16 + $0xfc] sm:$0xf0] }
 0x23e   : > { %v4651_v15 = vor.u32 %v5447_v5, %v4648_v53 }
 0x23f   : > { %v1311_v37 = vpop.f32.mrf.mxu3  ;;  %v1387_v26 = vpop.f32.mrf.mxu2 }
 0x240   : > { %v6868_v21 = vadd.f32 %v1311_v37, %v6422_v49  ;;  %v1388_v20 = vadd.f32 %v1387_v26, %v6777_v6  ;;  %v1481_v52 = vpop.f32.mrf.mxu0  ;;  %v6888_v26 = vor.u32 %v5503_v13, %v4904_v17 }
 0x242   : > { %v6871_v1 = vpop.f32.mrf.mxu1  ;;  %v6873_v51 = vadd.f32 %v1476_v34, %v1388_v20  ;;  %7670 = vst [vmem:[#allocation29_spill] sm:$0xff] %v6888_v26 }
 0x243   : > { %7669 = vst [vmem:[#allocation28_spill] sm:$0xff] %v6871_v1 }
 0x244   : > { %4817 = vmatmul.msk.bf16.gmra.mxu2 %vm785_vm0, %v4619_v14 }
 0x247   : > { %v1313_v49 = vpop.f32.mrf.mxu3  ;;  %v1390_v37 = vpop.f32.mrf.mxu2 }
 0x248   : > { %v6885_v6 = vadd.f32 %v1313_v49, %v6429_v61  ;;  %v1391_v34 = vadd.f32 %v1390_v37, %v6798_v23  ;;  %v1484_v38 = vpop.f32.mrf.mxu0  ;;  %v4630_v61 = vld [vmem:[%s5897_s16 + $0xc8] sm:$0xf]  ;;  %v5443_v23 = vld [vmem:[%s5897_s16 + $0xd0] sm:$0xf0]  ;;  %v5524_v49 = vld [vmem:[%s7585_s3 + $0x18] sm:$0xff] }
 0x249   : > { %v5450_v37 = vld [vmem:[%s5897_s16 + $0x10c] sm:$0xf]  ;;  %2904 = vmatpush.bf16.msrb.mxu3 %v5524_v49 }
 0x24a   : > { %v6890_v20 = vpop.f32.mrf.mxu1  ;;  %v6892_v14 = vadd.f32 %v1479_v11, %v1391_v34  ;;  %v4631_v11 = vor.u32 %v5443_v23, %v4630_v61  ;;  %v4910_v34 = vld [vmem:[%s6655_s20 + $0x80] sm:$0xf]  ;;  %v4660_v61 = vld [vmem:[%s5897_s16 + $0x114] sm:$0xf0]  ;;  %v5505_v23 = vld [vmem:[%s6655_s20 + $0x84] sm:$0xf] }
 0x24b   : > { %7671 = vst [vmem:[#allocation30_spill] sm:$0xff] %v6890_v20  ;;  %2676 = vmatmul.bf16.gmra.mxu0 %v6882_v4 }
 0x24c   : > { %7672 = vst [vmem:[#allocation31_spill] sm:$0xff] %v6892_v14  ;;  %2128 = vmatmul.bf16.gmra.mxu3 %v4651_v15  ;;  %v5506_v15 = vld [vmem:[%s6655_s20 + $0x84] sm:$0xf0] }
 0x24d   : > { %5034 = vmatmul.msk.bf16.gmra.mxu1 %vm2589_vm1, %v6888_v26  ;;  %v6921_v26 = vor.u32 %v5506_v15, %v4910_v34  ;;  %v5446_v34 = vld [vmem:[%s5897_s16 + $0xe8] sm:$0xf0] }
 0x24f   : > { %v1392_v53 = vpop.f32.mrf.mxu2  ;;  %v6899_v17 = vpop.f32.mrf.mxu3  ;;  %7675 = vst [vmem:[#allocation34_spill] sm:$0xff] %v6921_v26 }
 0x250   : > { %v1393_v5 = vadd.f32 %v1392_v53, %v6815_v0  ;;  %v1486_v30 = vpop.f32.mrf.mxu0  ;;  %v5530_v0 = vld [vmem:[%s7585_s3 + $0x48] sm:$0xff] }
 0x251   : > { %v4912_v53 = vld [vmem:[%s6655_s20 + $0x88] sm:$0xf0]  ;;  %2995 = vmatpush.bf16.msrb.mxu2 %v5530_v0 }
 0x252   : > { %v6902_v12 = vpop.f32.mrf.mxu1  ;;  %v6904_v13 = vadd.f32 %v1481_v52, %v1393_v5  ;;  %v6924_v49 = vor.u32 %v5505_v23, %v4912_v53 }
 0x253   : > { %7673 = vst [vmem:[#allocation32_spill] sm:$0xff] %v6902_v12  ;;  %v4663_v12 = vor.u32 %v5450_v37, %v4660_v61  ;;  %v5588_v37 = vld [vmem:[%s7585_s3 + $0x108] sm:$0xff] }
 0x254   : > { %7674 = vst [vmem:[#allocation33_spill] sm:$0xff] %v6904_v13  ;;  %4818 = vmatmul.msk.bf16.gmra.mxu2 %vm785_vm0, %v4631_v11  ;;  %3494 = vmatpush.bf16.msrb.mxu1 %v5588_v37  ;;  %v4920_v37 = vld [vmem:[%s6655_s20 + $0x98] sm:$0xf0] }
 0x255   : > { %7676 = vst [vmem:[#allocation35_spill] sm:$0xff] %v6924_v49 }
 0x257   : > { %v1395_v52 = vpop.f32.mrf.mxu2  ;;  %v6919_v5 = vpop.f32.mrf.mxu3 }
 0x258   : > { %v1396_v11 = vadd.f32 %v1395_v52, %v6830_v55  ;;  %v1489_v20 = vpop.f32.mrf.mxu0  ;;  %v5582_v55 = vld [vmem:[%s7585_s3 + $0xd8] sm:$0xff] }
 0x259   : > { %3403 = vmatpush.bf16.msrb.mxu0 %v5582_v55  ;;  %v5507_v55 = vld [vmem:[%s6655_s20 + $0x94] sm:$0xf] }
 0x25a   : > { %v6926_v13 = vpop.f32.mrf.mxu1  ;;  %v6928_v1 = vadd.f32 %v1484_v38, %v1396_v11  ;;  %v4642_v38 = vld [vmem:[%s5897_s16 + $0xe0] sm:$0xf]  ;;  %v5453_v11 = vld [vmem:[%s5897_s16 + $0x124] sm:$0xf] }
 0x25b   : > { %7677 = vst [vmem:[#allocation36_spill] sm:$0xff] %v6926_v13  ;;  %2681 = vmatmul.bf16.gmra.mxu0 %v6921_v26  ;;  %v4643_v61 = vor.u32 %v5446_v34, %v4642_v38  ;;  %v5508_v13 = vld [vmem:[%s6655_s20 + $0x94] sm:$0xf0] }
 0x25c   : > { %7678 = vst [vmem:[#allocation37_spill] sm:$0xff] %v6928_v1  ;;  %2133 = vmatmul.bf16.gmra.mxu3 %v4663_v12  ;;  %v4672_v1 = vld [vmem:[%s5897_s16 + $0x12c] sm:$0xf0] }
 0x25d   : > { %5035 = vmatmul.msk.bf16.gmra.mxu1 %vm2589_vm1, %v6924_v49  ;;  %v4918_v49 = vld [vmem:[%s6655_s20 + $0x90] sm:$0xf]  ;;  %v4675_v34 = vor.u32 %v5453_v11, %v4672_v1  ;;  %v5449_v1 = vld [vmem:[%s5897_s16 + $0x100] sm:$0xf0] }
 0x25f   : > { %v1397_v12 = vpop.f32.mrf.mxu2  ;;  %v6941_v15 = vpop.f32.mrf.mxu3 }
 0x260   : > { %v1398_v0 = vadd.f32 %v1397_v12, %v6850_v45  ;;  %v1491_v23 = vpop.f32.mrf.mxu0  ;;  %v6957_v45 = vor.u32 %v5508_v13, %v4918_v49  ;;  %v6960_v12 = vor.u32 %v5507_v55, %v4920_v37 }
 0x262   : > { %v6944_v53 = vpop.f32.mrf.mxu1  ;;  %v6946_v52 = vadd.f32 %v1486_v30, %v1398_v0  ;;  %7681 = vst [vmem:[#allocation40_spill] sm:$0xff] %v6960_v12 }
 0x263   : > { %7679 = vst [vmem:[#allocation38_spill] sm:$0xff] %v6944_v53 }
 0x264   : > { %7680 = vst [vmem:[#allocation39_spill] sm:$0xff] %v6946_v52  ;;  %4819 = vmatmul.msk.bf16.gmra.mxu2 %vm785_vm0, %v4643_v61 }
 0x267   : > { %v1400_v26 = vpop.f32.mrf.mxu2  ;;  %v6955_v14 = vpop.f32.mrf.mxu3 }
 0x268   : > { %v1401_v38 = vadd.f32 %v1400_v26, %v6868_v21  ;;  %v2647_v30 = vpop.f32.mrf.mxu0  ;;  %v4654_v21 = vld [vmem:[%s5897_s16 + $0xf8] sm:$0xf] }
 0x269   : > { %v4655_v49 = vor.u32 %v5449_v1, %v4654_v21 }
 0x26a   : > { %v2736_v0 = vpop.f32.mrf.mxu1  ;;  %v6962_v61 = vadd.f32 %v1489_v20, %v1401_v38 }
 0x26b   : > { %v6964_v53 = vadd.f32 %v2736_v0, %v2647_v30  ;;  %2686 = vmatmul.bf16.gmra.mxu0 %v6957_v45  ;;  %v4926_v30 = vld [vmem:[%s6655_s20 + $0xa0] sm:$0xf]  ;;  %v5510_v0 = vld [vmem:[%s6655_s20 + $0xa4] sm:$0xf0] }
 0x26c   : > { %7682 = vst [vmem:[#allocation41_spill] sm:$0xff] %v6962_v61  ;;  %2138 = vmatmul.bf16.gmra.mxu3 %v4675_v34  ;;  %v5456_v34 = vld [vmem:[%s5897_s16 + $0x13c] sm:$0xf]  ;;  %v4928_v61 = vld [vmem:[%s6655_s20 + $0xa8] sm:$0xf0]  ;;  %v6990_v1 = vor.u32 %v5510_v0, %v4926_v30 }
 0x26d   : > { %7683 = vst [vmem:[#allocation42_spill] sm:$0xff] %v6964_v53  ;;  %5036 = vmatmul.msk.bf16.gmra.mxu1 %vm2589_vm1, %v6960_v12  ;;  %v4684_v12 = vld [vmem:[%s5897_s16 + $0x144] sm:$0xf0]  ;;  %v5509_v53 = vld [vmem:[%s6655_s20 + $0xa4] sm:$0xf] }
 0x26e   : > { %7686 = vst [vmem:[#allocation45_spill] sm:$0xff] %v6990_v1 }
 0x26f   : > { %v1402_v26 = vpop.f32.mrf.mxu2  ;;  %v6971_v13 = vpop.f32.mrf.mxu3 }
 0x270   : > { %v1403_v20 = vadd.f32 %v1402_v26, %v6885_v6  ;;  %v2649_v11 = vpop.f32.mrf.mxu0  ;;  %v5523_v6 = vld [vmem:[%s7585_s3 + $0x10] sm:$0xff]  ;;  %v4687_v26 = vor.u32 %v5456_v34, %v4684_v12  ;;  %v5452_v34 = vld [vmem:[%s5897_s16 + $0x118] sm:$0xf0] }
 0x271   : > { %2905 = vmatpush.bf16.msrb.mxu3 %v5523_v6  ;;  %v4666_v12 = vld [vmem:[%s5897_s16 + $0x110] sm:$0xf] }
 0x272   : > { %v2738_v55 = vpop.f32.mrf.mxu1  ;;  %v6974_v37 = vadd.f32 %v1491_v23, %v1403_v20  ;;  %v4667_v6 = vor.u32 %v5452_v34, %v4666_v12  ;;  %v4934_v12 = vld [vmem:[%s6655_s20 + $0xb0] sm:$0xf]  ;;  %v5512_v34 = vld [vmem:[%s6655_s20 + $0xb4] sm:$0xf0] }
 0x273   : > { %v6976_v38 = vadd.f32 %v2738_v55, %v2649_v11  ;;  %v2090_v55 = vadd.f32 %v6899_v17, %v6478_v8 }
 0x274   : > { %7684 = vst [vmem:[#allocation43_spill] sm:$0xff] %v6974_v37  ;;  %4820 = vmatmul.msk.bf16.gmra.mxu2 %vm785_vm0, %v4655_v49  ;;  %v6992_v49 = vor.u32 %v5509_v53, %v4928_v61  ;;  %v2092_v53 = vadd.f32 %v6919_v5, %v6487_v22  ;;  %v5581_v61 = vld [vmem:[%s7585_s3 + $0xd0] sm:$0xff] }
 0x275   : > { %7685 = vst [vmem:[#allocation44_spill] sm:$0xff] %v6976_v38  ;;  %3404 = vmatpush.bf16.msrb.mxu0 %v5581_v61  ;;  %v4936_v61 = vld [vmem:[%s6655_s20 + $0xb8] sm:$0xf0] }
 0x276   : > { %7687 = vst [vmem:[#allocation46_spill] sm:$0xff] %v6992_v49 }
 0x277   : > { %v6988_v21 = vpop.f32.mrf.mxu3  ;;  %v2178_v23 = vpop.f32.mrf.mxu2 }
 0x278   : > { %v2652_v20 = vpop.f32.mrf.mxu0  ;;  %v2179_v37 = vadd.f32 %v2178_v23, %v2090_v55  ;;  %v5459_v55 = vld [vmem:[%s5897_s16 + $0x154] sm:$0xf] }
 0x27a   : > { %v2741_v11 = vpop.f32.mrf.mxu1  ;;  %v2258_v30 = vadd.f32 %v2179_v37, %v6499_v56 }
 0x27b   : > { %v6996_v38 = vadd.f32 %v2741_v11, %v2652_v20  ;;  %2691 = vmatmul.bf16.gmra.mxu0 %v6990_v1 }
 0x27c   : > { %2143 = vmatmul.bf16.gmra.mxu3 %v4687_v26  ;;  %v3775_v56 = vmul.f32 %v2258_v30, %v2258_v30 }
 0x27d   : > { %7688 = vst [vmem:[#allocation47_spill] sm:$0xff] %v6996_v38  ;;  %5037 = vmatmul.msk.bf16.gmra.mxu1 %vm2589_vm1, %v6992_v49 }
 0x27f   : > { %v7008_v8 = vpop.f32.mrf.mxu3  ;;  %v2180_v17 = vpop.f32.mrf.mxu2 }
 0x280   : > { %v2181_v0 = vadd.f32 %v2180_v17, %v2092_v53  ;;  %v2654_v23 = vpop.f32.mrf.mxu0  ;;  %v4696_v53 = vld [vmem:[%s5897_s16 + $0x15c] sm:$0xf0]  ;;  %v2095_v17 = vadd.f32 %v6941_v15, %v6497_v16 }
 0x282   : > { %v2743_v22 = vpop.f32.mrf.mxu1  ;;  %v2259_v5 = vadd.f32 %v2181_v0, %v6510_v58  ;;  %v5511_v58 = vld [vmem:[%s6655_s20 + $0xb4] sm:$0xf] }
 0x283   : > { %v7013_v26 = vadd.f32 %v2743_v22, %v2654_v23 }
 0x284   : > { %v5594_v37 = vpack.c.bf16 %v2259_v5, %v2258_v30  ;;  %v3737_v20 = vadd.f32 %v2259_v5, %v2258_v30  ;;  %v3776_v11 = vmul.f32 %v2259_v5, %v2259_v5  ;;  %4821 = vmatmul.msk.bf16.gmra.mxu2 %vm785_vm0, %v4667_v6  ;;  %v7034_v30 = vor.u32 %v5512_v34, %v4934_v12 }
 0x285   : > { %7689 = vst [vmem:[#allocation48_spill] sm:$0xff] %v7013_v26  ;;  %v4699_v6 = vor.u32 %v5459_v55, %v4696_v53  ;;  %v7036_v26 = vor.u32 %v5511_v58, %v4936_v61 }
 0x286   : > { %5595 = vst [vmem:[%s7020_s10] sm:$0xff] %v5594_v37   ;;  %v3807_v0 = vadd.f32 %v3776_v11, %v3775_v56  ;;  %v4678_v56 = vld [vmem:[%s5897_s16 + $0x128] sm:$0xf]  ;;  %v5455_v37 = vld [vmem:[%s5897_s16 + $0x130] sm:$0xf0]  ;;  %v2097_v11 = vadd.f32 %v6955_v14, %v6508_v46  ;;  %v5462_v14 = vld [vmem:[%s5897_s16 + $0x16c] sm:$0xf] }
 0x287   : > { %v7032_v23 = vpop.f32.mrf.mxu3  ;;  %v2183_v22 = vpop.f32.mrf.mxu2 }
 0x288   : > { %v2184_v5 = vadd.f32 %v2183_v22, %v2095_v17  ;;  %v2657_v49 = vpop.f32.mrf.mxu0  ;;  %v5514_v22 = vld [vmem:[%s6655_s20 + $0xc4] sm:$0xf0] }
 0x28a   : > { %v2746_v38 = vpop.f32.mrf.mxu1  ;;  %v2260_v1 = vadd.f32 %v2184_v5, %v6518_v3  ;;  %v4708_v5 = vld [vmem:[%s5897_s16 + $0x174] sm:$0xf0] }
 0x28b   : > { %v7039_v52 = vadd.f32 %v2746_v38, %v2657_v49  ;;  %2696 = vmatmul.bf16.gmra.mxu0 %v7034_v30 }
 0x28c   : > { %v3738_v16 = vadd.f32 %v3737_v20, %v2260_v1  ;;  %v3777_v15 = vmul.f32 %v2260_v1, %v2260_v1  ;;  %2148 = vmatmul.bf16.gmra.mxu3 %v4699_v6  ;;  %v4679_v20 = vor.u32 %v5455_v37, %v4678_v56  ;;  %v5513_v6 = vld [vmem:[%s6655_s20 + $0xc4] sm:$0xf]  ;;  %v2100_v56 = vadd.f32 %v6971_v13, %v6516_v59 }
 0x28d   : > { %5038 = vmatmul.msk.bf16.gmra.mxu1 %vm2589_vm1, %v7036_v26 }
 0x28e   : > { %v3808_v55 = vadd.f32 %v3807_v0, %v3777_v15  ;;  %v4942_v0 = vld [vmem:[%s6655_s20 + $0xc0] sm:$0xf]  ;;  %v4944_v15 = vld [vmem:[%s6655_s20 + $0xc8] sm:$0xf0] }
 0x28f   : > { %v7048_v3 = vpop.f32.mrf.mxu3  ;;  %v2185_v38 = vpop.f32.mrf.mxu2  ;;  %v7073_v13 = vor.u32 %v5513_v6, %v4944_v15 }
 0x290   : > { %v2186_v49 = vadd.f32 %v2185_v38, %v2097_v11  ;;  %v2659_v12 = vpop.f32.mrf.mxu0  ;;  %v7071_v38 = vor.u32 %v5514_v22, %v4942_v0  ;;  %v2102_v0 = vadd.f32 %v6988_v21, %v6524_v28 }
 0x292   : > { %v2748_v34 = vpop.f32.mrf.mxu1  ;;  %v2261_v53 = vadd.f32 %v2186_v49, %v6526_v54  ;;  %v5522_v54 = vld [vmem:[%s7585_s3 + $0x8] sm:$0xff] }
 0x293   : > { %v7051_v58 = vadd.f32 %v2748_v34, %v2659_v12  ;;  %2906 = vmatpush.bf16.msrb.mxu3 %v5522_v54 }
 0x294   : > { %v5599_v61 = vpack.c.bf16 %v2261_v53, %v2260_v1  ;;  %v3739_v17 = vadd.f32 %v3738_v16, %v2261_v53  ;;  %v3778_v46 = vmul.f32 %v2261_v53, %v2261_v53  ;;  %4822 = vmatmul.msk.bf16.gmra.mxu2 %vm785_vm0, %v4679_v20  ;;  %v5529_v1 = vld [vmem:[%s7585_s3 + $0x40] sm:$0xff]  ;;  %v4711_v20 = vor.u32 %v5462_v14, %v4708_v5  ;;  %v5458_v14 = vld [vmem:[%s5897_s16 + $0x148] sm:$0xf0] }
 0x295   : > { %2996 = vmatpush.bf16.msrb.mxu2 %v5529_v1 }
 0x296   : > { %5751 = vst [vmem:[%s7020_s10 + $0x8] sm:$0xff] %v5599_v61   ;;  %v3809_v37 = vadd.f32 %v3808_v55, %v3778_v46  ;;  %v4690_v46 = vld [vmem:[%s5897_s16 + $0x140] sm:$0xf] }
 0x297   : > { %v7069_v16 = vpop.f32.mrf.mxu3  ;;  %v2188_v11 = vpop.f32.mrf.mxu2 }
 0x298   : > { %v2189_v49 = vadd.f32 %v2188_v11, %v2100_v56  ;;  %v2662_v59 = vpop.f32.mrf.mxu0  ;;  %v4691_v56 = vor.u32 %v5458_v14, %v4690_v46  ;;  %v5515_v46 = vld [vmem:[%s6655_s20 + $0xd4] sm:$0xf]  ;;  %v4952_v14 = vld [vmem:[%s6655_s20 + $0xd8] sm:$0xf0] }
 0x29a   : > { %v2751_v55 = vpop.f32.mrf.mxu1  ;;  %v2262_v12 = vadd.f32 %v2189_v49, %v6537_v29  ;;  %v5580_v29 = vld [vmem:[%s7585_s3 + $0xc8] sm:$0xff] }
 0x29b   : > { %v7076_v34 = vadd.f32 %v2751_v55, %v2662_v59  ;;  %2701 = vmatmul.bf16.gmra.mxu0 %v7071_v38  ;;  %v4950_v59 = vld [vmem:[%s6655_s20 + $0xd0] sm:$0xf]  ;;  %v5516_v55 = vld [vmem:[%s6655_s20 + $0xd4] sm:$0xf0] }
 0x29c   : > { %v3740_v53 = vadd.f32 %v3739_v17, %v2262_v12  ;;  %v3779_v61 = vmul.f32 %v2262_v12, %v2262_v12  ;;  %2153 = vmatmul.bf16.gmra.mxu3 %v4711_v20  ;;  %v5587_v17 = vld [vmem:[%s7585_s3 + $0x100] sm:$0xff]  ;;  %3405 = vmatpush.bf16.msrb.mxu0 %v5580_v29 }
 0x29d   : > { %5039 = vmatmul.msk.bf16.gmra.mxu1 %vm2589_vm1, %v7073_v13  ;;  %v5465_v20 = vld [vmem:[%s5897_s16 + $0x184] sm:$0xf] }
 0x29e   : > { %v3810_v22 = vadd.f32 %v3809_v37, %v3779_v61  ;;  %3495 = vmatpush.bf16.msrb.mxu1 %v5587_v17  ;;  %v4720_v61 = vld [vmem:[%s5897_s16 + $0x18c] sm:$0xf0] }
 0x29f   : > { %v7091_v5 = vpop.f32.mrf.mxu3  ;;  %v2190_v6 = vpop.f32.mrf.mxu2 }
 0x2a0   : > { %v2191_v15 = vadd.f32 %v2190_v6, %v2102_v0  ;;  %v2664_v28 = vpop.f32.mrf.mxu0  ;;  %v2105_v0 = vadd.f32 %v7008_v8, %v6535_v25 }
 0x2a2   : > { %v2753_v21 = vpop.f32.mrf.mxu1  ;;  %v2263_v37 = vadd.f32 %v2191_v15, %v6551_v2  ;;  %v4723_v15 = vor.u32 %v5465_v20, %v4720_v61  ;;  %v2107_v20 = vadd.f32 %v7032_v23, %v6549_v47  ;;  %v5468_v23 = vld [vmem:[%s5897_s16 + $0x19c] sm:$0xf] }
 0x2a3   : > { %v7094_v54 = vadd.f32 %v2753_v21, %v2664_v28  ;;  %v7113_v28 = vor.u32 %v5515_v46, %v4952_v14 }
 0x2a4   : > { %v5604_v1 = vpack.c.bf16 %v2263_v37, %v2262_v12  ;;  %v3741_v11 = vadd.f32 %v3740_v53, %v2263_v37  ;;  %v3780_v49 = vmul.f32 %v2263_v37, %v2263_v37  ;;  %4823 = vmatmul.msk.bf16.gmra.mxu2 %vm785_vm0, %v4691_v56  ;;  %v7108_v12 = vor.u32 %v5516_v55, %v4950_v59  ;;  %v5521_v53 = vld [vmem:[%s7585_s3] sm:$0xff] }
 0x2a5   : > { %2907 = vmatpush.bf16.msrb.mxu3 %v5521_v53 }
 0x2a6   : > { %5752 = vst [vmem:[%s7020_s10 + $0x10] sm:$0xff] %v5604_v1   ;;  %v3811_v29 = vadd.f32 %v3810_v22, %v3780_v49  ;;  %v4702_v1 = vld [vmem:[%s5897_s16 + $0x158] sm:$0xf]  ;;  %v5461_v49 = vld [vmem:[%s5897_s16 + $0x160] sm:$0xf0] }
 0x2a7   : > { %v7106_v17 = vpop.f32.mrf.mxu3  ;;  %v2193_v2 = vpop.f32.mrf.mxu2  ;;  %v4703_v61 = vor.u32 %v5461_v49, %v4702_v1  ;;  %v2110_v1 = vadd.f32 %v7048_v3, %v6560_v42 }
 0x2a8   : > { %v2194_v6 = vadd.f32 %v2193_v2, %v2105_v0  ;;  %v2667_v56 = vpop.f32.mrf.mxu0 }
 0x2aa   : > { %v2756_v21 = vpop.f32.mrf.mxu1  ;;  %v2264_v25 = vadd.f32 %v2194_v6, %v6562_v44 }
 0x2ab   : > { %v7116_v8 = vadd.f32 %v2756_v21, %v2667_v56  ;;  %2706 = vmatmul.bf16.gmra.mxu0 %v7108_v12  ;;  %v4732_v56 = vld [vmem:[%s5897_s16 + $0x1a4] sm:$0xf0]  ;;  %v5517_v21 = vld [vmem:[%s6655_s20 + $0xe4] sm:$0xf] }
 0x2ac   : > { %v3742_v22 = vadd.f32 %v3741_v11, %v2264_v25  ;;  %v3781_v37 = vmul.f32 %v2264_v25, %v2264_v25  ;;  %2158 = vmatmul.bf16.gmra.mxu3 %v4723_v15  ;;  %v5518_v15 = vld [vmem:[%s6655_s20 + $0xe4] sm:$0xf0] }
 0x2ad   : > { %5040 = vmatmul.msk.bf16.gmra.mxu1 %vm2589_vm1, %v7113_v28 }
 0x2ae   : > { %v3812_v59 = vadd.f32 %v3811_v29, %v3781_v37  ;;  %v4958_v29 = vld [vmem:[%s6655_s20 + $0xe0] sm:$0xf]  ;;  %v4960_v37 = vld [vmem:[%s6655_s20 + $0xe8] sm:$0xf0] }
 0x2af   : > { %v7125_v44 = vpop.f32.mrf.mxu3  ;;  %v2195_v55 = vpop.f32.mrf.mxu2 }
 0x2b0   : > { %v2196_v11 = vadd.f32 %v2195_v55, %v2107_v20  ;;  %v2669_v46 = vpop.f32.mrf.mxu0  ;;  %v4735_v55 = vor.u32 %v5468_v23, %v4732_v56 }
 0x2b2   : > { %v2758_v14 = vpop.f32.mrf.mxu1  ;;  %v2265_v0 = vadd.f32 %v2196_v11, %v6572_v10 }
 0x2b3   : > { %v7128_v2 = vadd.f32 %v2758_v14, %v2669_v46 }
 0x2b4   : > { %v5609_v53 = vpack.c.bf16 %v2265_v0, %v2264_v25  ;;  %v3743_v6 = vadd.f32 %v3742_v22, %v2265_v0  ;;  %v3782_v47 = vmul.f32 %v2265_v0, %v2265_v0  ;;  %4824 = vmatmul.msk.bf16.gmra.mxu2 %vm785_vm0, %v4703_v61  ;;  %v7142_v22 = vor.u32 %v5518_v15, %v4958_v29 }
 0x2b5   : > { %v7144_v61 = vor.u32 %v5517_v21, %v4960_v37 }
 0x2b6   : > { %5753 = vst [vmem:[%s7020_s10 + $0x18] sm:$0xff] %v5609_v53   ;;  %v3813_v49 = vadd.f32 %v3812_v59, %v3782_v47  ;;  %v4714_v59 = vld [vmem:[%s5897_s16 + $0x170] sm:$0xf]  ;;  %v5464_v53 = vld [vmem:[%s5897_s16 + $0x178] sm:$0xf0]  ;;  %v2112_v47 = vadd.f32 %v7069_v16, %v6570_v62 }
 0x2b7   : > { %v7140_v10 = vpop.f32.mrf.mxu3  ;;  %v2198_v25 = vpop.f32.mrf.mxu2  ;;  %v4715_v56 = vor.u32 %v5464_v53, %v4714_v59  ;;  %v2115_v59 = vadd.f32 %v7091_v5, %v6580_v36 }
 0x2b8   : > { %v2199_v20 = vadd.f32 %v2198_v25, %v2110_v1  ;;  %v2672_v11 = vpop.f32.mrf.mxu0 }
 0x2ba   : > { %v2761_v46 = vpop.f32.mrf.mxu1  ;;  %v2266_v14 = vadd.f32 %v2199_v20, %v6582_v60  ;;  %v5579_v60 = vld [vmem:[%s7585_s3 + $0xc0] sm:$0xff] }
 0x2bb   : > { %v7147_v0 = vadd.f32 %v2761_v46, %v2672_v11  ;;  %2711 = vmatmul.bf16.gmra.mxu0 %v7142_v22  ;;  %v5046_v20 = vld [vmem:[%s6655_s20] sm:$0xf]  ;;  %v5520_v11 = vld [vmem:[%s6655_s20 + $0xf4] sm:$0xf0]  ;;  %v5490_v46 = vld [vmem:[%s6655_s20 + $0x4] sm:$0xf0] }
 0x2bc   : > { %v3744_v42 = vadd.f32 %v3743_v6, %v2266_v14  ;;  %v3783_v3 = vmul.f32 %v2266_v14, %v2266_v14  ;;  %2163 = vmatmul.bf16.gmra.mxu3 %v4735_v55  ;;  %3406 = vmatpush.bf16.msrb.mxu0 %v5579_v60  ;;  %v4966_v55 = vld [vmem:[%s6655_s20 + $0xf0] sm:$0xf] }
 0x2bd   : > { %5041 = vmatmul.msk.bf16.gmra.mxu1 %vm2589_vm1, %v7144_v61 }
 0x2be   : > { %v3814_v23 = vadd.f32 %v3813_v49, %v3783_v3  ;;  %v5519_v3 = vld [vmem:[%s6655_s20 + $0xf4] sm:$0xf] }
 0x2bf   : > { %v7159_v29 = vpop.f32.mrf.mxu3  ;;  %v2200_v6 = vpop.f32.mrf.mxu2 }
 0x2c0   : > { %v2201_v15 = vadd.f32 %v2200_v6, %v2112_v47  ;;  %v2674_v21 = vpop.f32.mrf.mxu0  ;;  %v4968_v47 = vld [vmem:[%s6655_s20 + $0xf8] sm:$0xf0]  ;;  %v5047_v6 = vor.u32 %v5490_v46, %v5046_v20 }
 0x2c2   : > { %v2763_v62 = vpop.f32.mrf.mxu1  ;;  %v2267_v16 = vadd.f32 %v2201_v15, %v6595_v18 }
 0x2c3   : > { %v7162_v37 = vadd.f32 %v2763_v62, %v2674_v21 }
 0x2c4   : > { %v5614_v1 = vpack.c.bf16 %v2267_v16, %v2266_v14  ;;  %v3745_v49 = vadd.f32 %v3744_v42, %v2267_v16  ;;  %v3784_v25 = vmul.f32 %v2267_v16, %v2267_v16  ;;  %4825 = vmatmul.msk.bf16.gmra.mxu2 %vm785_vm0, %v4715_v56  ;;  %v7176_v42 = vor.u32 %v5520_v11, %v4966_v55 }
 0x2c5   : > { %v7178_v56 = vor.u32 %v5519_v3, %v4968_v47 }
 0x2c6   : > { %5754 = vst [vmem:[%s7020_s10 + $0x20] sm:$0xff] %v5614_v1   ;;  %v3815_v53 = vadd.f32 %v3814_v23, %v3784_v25  ;;  %v4726_v23 = vld [vmem:[%s5897_s16 + $0x188] sm:$0xf]  ;;  %v5467_v1 = vld [vmem:[%s5897_s16 + $0x190] sm:$0xf0]  ;;  %v2117_v25 = vadd.f32 %v7106_v17, %v6593_v43 }
 0x2c7   : > { %v7174_v18 = vpop.f32.mrf.mxu3  ;;  %v2203_v14 = vpop.f32.mrf.mxu2  ;;  %v4727_v11 = vor.u32 %v5467_v1, %v4726_v23  ;;  %v4974_v43 = vld [vmem:[%s6655_s20 + $0x100] sm:$0xf]  ;;  %v5534_v17 = vld [vmem:[%s6655_s20 + $0x104] sm:$0xf0] }
 0x2c8   : > { %v2204_v60 = vadd.f32 %v2203_v14, %v2115_v59  ;;  %v2677_v15 = vpop.f32.mrf.mxu0  ;;  %v4975_v1 = vor.u32 %v5534_v17, %v4974_v43 }
 0x2ca   : > { %v2766_v21 = vpop.f32.mrf.mxu1  ;;  %v2268_v62 = vadd.f32 %v2204_v60, %v6607_v19 }
 0x2cb   : > { %v7181_v16 = vadd.f32 %v2766_v21, %v2677_v15  ;;  %2716 = vmatmul.bf16.gmra.mxu0 %v7176_v42  ;;  %v4976_v15 = vld [vmem:[%s6655_s20 + $0x108] sm:$0xf0]  ;;  %v2120_v21 = vadd.f32 %v7125_v44, %v6605_v35  ;;  %v4738_v35 = vld [vmem:[%s5897_s16 + $0x1a0] sm:$0xf] }
 0x2cc   : > { %v3746_v36 = vadd.f32 %v3745_v49, %v2268_v62  ;;  %v3785_v5 = vmul.f32 %v2268_v62, %v2268_v62  ;;  %2908 = vmatmul.bf16.vlgmr.msrb.gmra.mxu3 %v5047_v6  ;;  %v5470_v44 = vld [vmem:[%s5897_s16 + $0x1a8] sm:$0xf0]  ;;  %s4095_s16 = sshll.u32 %s7752_s22, 2 }
 0x2cd   : > { %5042 = vmatmul.msk.bf16.gmra.mxu1 %vm2589_vm1, %v7178_v56  ;;  %s7441_s29 = scalar_lea.vmem %s7588_s6, %s4095_s16 }
 0x2ce   : > { %v3816_v20 = vadd.f32 %v3815_v53, %v3785_v5  ;;  %v5533_v53 = vld [vmem:[%s6655_s20 + $0x104] sm:$0xf] }
 0x2cf   : > { %v7190_v19 = vpop.f32.mrf.mxu3  ;;  %v2205_v55 = vpop.f32.mrf.mxu2 }
 0x2d0   : > { %v2206_v49 = vadd.f32 %v2205_v55, %v2117_v25  ;;  %v2679_v46 = vpop.f32.mrf.mxu0  ;;  %v4979_v25 = vor.u32 %v5533_v53, %v4976_v15 }
 0x2d2   : > { %v2768_v3 = vpop.f32.mrf.mxu1  ;;  %v2269_v47 = vadd.f32 %v2206_v49, %v6616_v48 }
 0x2d3   : > { %v7193_v59 = vadd.f32 %v2768_v3, %v2679_v46 }
 0x2d4   : > { %v5619_v14 = vpack.c.bf16 %v2269_v47, %v2268_v62  ;;  %v3747_v60 = vadd.f32 %v3746_v36, %v2269_v47  ;;  %v3786_v6 = vmul.f32 %v2269_v47, %v2269_v47  ;;  %4826 = vmatmul.msk.bf16.gmra.mxu2 %vm785_vm0, %v4727_v11 }
 0x2d6   : > { %5755 = vst [vmem:[%s7020_s10 + $0x28] sm:$0xff] %v5619_v14   ;;  %v3817_v5 = vadd.f32 %v3816_v20, %v3786_v6  ;;  %v2122_v20 = vadd.f32 %v7140_v10, %v6614_v41  ;;  %v4739_v6 = vor.u32 %v5470_v44, %v4738_v35  ;;  %v5142_v41 = vld [vmem:[%s6655_s20 + $0x20] sm:$0xf]  ;;  %v5548_v10 = vld [vmem:[%s6655_s20 + $0x24] sm:$0xf0] }
 0x2d7   : > { %v7203_v23 = vpop.f32.mrf.mxu3  ;;  %v2208_v48 = vpop.f32.mrf.mxu2 }
 0x2d8   : > { %v2209_v62 = vadd.f32 %v2208_v48, %v2120_v21  ;;  %v2682_v36 = vpop.f32.mrf.mxu0 }
 0x2da   : > { %v2771_v55 = vpop.f32.mrf.mxu1  ;;  %v2270_v49 = vadd.f32 %v2209_v62, %v6635_v7  ;;  %v7690_v62 = vld [vmem:[#allocation10_spill] sm:$0xff] }
 0x2db   : > { %v7206_v11 = vadd.f32 %v2771_v55, %v2682_v36  ;;  %2721 = vmatmul.bf16.gmra.mxu0 %v4975_v1  ;;  %v5144_v1 = vld [vmem:[%s6655_s20 + $0x28] sm:$0xf0]  ;;  %v2125_v36 = vadd.f32 %v7159_v29, %v7690_v62  ;;  %v5489_v29 = vld [vmem:[%s6655_s20 + $0x4] sm:$0xf] }
 0x2dc   : > { %v3748_v46 = vadd.f32 %v3747_v60, %v2270_v49  ;;  %v3787_v3 = vmul.f32 %v2270_v49, %v2270_v49  ;;  %2913 = vmatmul.bf16.gmra.mxu3 %v6666_v32 }
 0x2dd   : > { %5043 = vmatmul.msk.bf16.gmra.mxu1 %vm2589_vm1, %v4979_v25 }
 0x2de   : > { %v3818_v47 = vadd.f32 %v3817_v5, %v3787_v3  ;;  %v5547_v5 = vld [vmem:[%s6655_s20 + $0x24] sm:$0xf]  ;;  %v5143_v3 = vor.u32 %v5548_v10, %v5142_v41 }
 0x2df   : > { %v7214_v7 = vpop.f32.mrf.mxu3  ;;  %v2210_v14 = vpop.f32.mrf.mxu2  ;;  %v5147_v35 = vor.u32 %v5547_v5, %v5144_v1  ;;  %v7693_v1 = vld [vmem:[#allocation14_spill] sm:$0xff] }
 0x2e0   : > { %v2211_v60 = vadd.f32 %v2210_v14, %v2122_v20  ;;  %v2684_v43 = vpop.f32.mrf.mxu0  ;;  %v7691_v20 = vld [vmem:[#allocation11_spill] sm:$0xff] }
 0x2e2   : > { %v2773_v32 = vpop.f32.mrf.mxu1  ;;  %v2271_v17 = vadd.f32 %v2211_v60, %v6657_v40 }
 0x2e3   : > { %v7217_v53 = vadd.f32 %v2773_v32, %v2684_v43  ;;  %v7692_v32 = vld [vmem:[#allocation9_spill] sm:$0xff] }
 0x2e4   : > { %v5624_v15 = vpack.c.bf16 %v2271_v17, %v2270_v49  ;;  %v3749_v21 = vadd.f32 %v3748_v46, %v2271_v17  ;;  %v3788_v48 = vmul.f32 %v2271_v17, %v2271_v17  ;;  %4827 = vmatmul.msk.bf16.gmra.mxu2 %vm785_vm0, %v4739_v6  ;;  %v2127_v17 = vadd.f32 %v7174_v18, %v7692_v32  ;;  %v5150_v18 = vld [vmem:[%s6655_s20 + $0x30] sm:$0xf] }
 0x2e6   : > { %5756 = vst [vmem:[%s7020_s10 + $0x30] sm:$0xff] %v5624_v15   ;;  %v3819_v25 = vadd.f32 %v3818_v47, %v3788_v48  ;;  %v5048_v47 = vld [vmem:[%s6655_s20 + $0x8] sm:$0xf0] }
 0x2e7   : > { %v7227_v55 = vpop.f32.mrf.mxu3  ;;  %v2213_v40 = vpop.f32.mrf.mxu2  ;;  %v5051_v10 = vor.u32 %v5489_v29, %v5048_v47 }
 0x2e8   : > { %v2214_v49 = vadd.f32 %v2213_v40, %v2125_v36  ;;  %v2687_v46 = vpop.f32.mrf.mxu0 }
 0x2ea   : > { %v2776_v44 = vpop.f32.mrf.mxu1  ;;  %v2272_v14 = vadd.f32 %v2214_v49, %v7691_v20 }
 0x2eb   : > { %v7230_v60 = vadd.f32 %v2776_v44, %v2687_v46  ;;  %3407 = vmatmul.bf16.vlgmr.msrb.gmra.mxu0 %v5143_v3  ;;  %v5549_v46 = vld [vmem:[%s6655_s20 + $0x34] sm:$0xf] }
 0x2ec   : > { %v3750_v6 = vadd.f32 %v3749_v21, %v2272_v14  ;;  %v3789_v43 = vmul.f32 %v2272_v14, %v2272_v14  ;;  %2918 = vmatmul.bf16.gmra.mxu3 %v6701_v24  ;;  %v7694_v44 = vld [vmem:[#allocation12_spill] sm:$0xff] }
 0x2ed   : > { %5316 = vmatmul.msk.bf16.vlgmr.msrb.gmra.mxu1 %vm2589_vm1, %v5147_v35  ;;  %v5152_v35 = vld [vmem:[%s6655_s20 + $0x38] sm:$0xf0]  ;;  %v2130_v20 = vadd.f32 %v7190_v19, %v7694_v44  ;;  %v7696_v19 = vld [vmem:[#allocation3_spill] sm:$0xff] }
 0x2ee   : > { %v3820_v15 = vadd.f32 %v3819_v25, %v3789_v43  ;;  %v5550_v25 = vld [vmem:[%s6655_s20 + $0x34] sm:$0xf0] }
 0x2ef   : > { %v7238_v48 = vpop.f32.mrf.mxu3  ;;  %v2215_v41 = vpop.f32.mrf.mxu2  ;;  %v5151_v32 = vor.u32 %v5550_v25, %v5150_v18 }
 0x2f0   : > { %v2216_v21 = vadd.f32 %v2215_v41, %v2127_v17  ;;  %v2689_v5 = vpop.f32.mrf.mxu0 }
 0x2f2   : > { %v2778_v24 = vpop.f32.mrf.mxu1  ;;  %v2273_v62 = vadd.f32 %v2216_v21, %v7693_v1  ;;  %v7695_v21 = vld [vmem:[#allocation5_spill] sm:$0xff] }
 0x2f3   : > { %v7241_v36 = vadd.f32 %v2778_v24, %v2689_v5 }
 0x2f4   : > { %v5629_v40 = vpack.c.bf16 %v2273_v62, %v2272_v14  ;;  %v3751_v3 = vadd.f32 %v3750_v6, %v2273_v62  ;;  %v3790_v49 = vmul.f32 %v2273_v62, %v2273_v62  ;;  %5100 = vmatmul.msk.bf16.vlgmr.msrb.gmra.mxu2 %vm2589_vm1, %v5051_v10  ;;  %v5155_v14 = vor.u32 %v5549_v46, %v5152_v35 }
 0x2f6   : > { %5757 = vst [vmem:[%s7020_s10 + $0x38] sm:$0xff] %v5629_v40   ;;  %v3821_v43 = vadd.f32 %v3820_v15, %v3790_v49  ;;  %v2132_v15 = vadd.f32 %v7203_v23, %v7696_v19  ;;  %v5158_v23 = vld [vmem:[%s6655_s20 + $0x40] sm:$0xf] }
 0x2f7   : > { %v7251_v29 = vpop.f32.mrf.mxu3  ;;  %v2218_v47 = vpop.f32.mrf.mxu2 }
 0x2f8   : > { %v2219_v17 = vadd.f32 %v2218_v47, %v2130_v20  ;;  %v2692_v41 = vpop.f32.mrf.mxu0  ;;  %v7697_v47 = vld [vmem:[#allocation2_spill] sm:$0xff] }
 0x2fa   : > { %v2781_v6 = vpop.f32.mrf.mxu1  ;;  %v2274_v5 = vadd.f32 %v2219_v17, %v7695_v21  ;;  %v5160_v17 = vld [vmem:[%s6655_s20 + $0x48] sm:$0xf0] }
 0x2fb   : > { %v7254_v10 = vadd.f32 %v2781_v6, %v2692_v41  ;;  %3412 = vmatmul.bf16.gmra.mxu0 %v5151_v32  ;;  %v5552_v32 = vld [vmem:[%s6655_s20 + $0x44] sm:$0xf0]  ;;  %v7698_v41 = vld [vmem:[#allocation4_spill] sm:$0xff] }
 0x2fc   : > { %v3752_v24 = vadd.f32 %v3751_v3, %v2274_v5  ;;  %v3791_v1 = vmul.f32 %v2274_v5, %v2274_v5  ;;  %2923 = vmatmul.bf16.gmra.mxu3 %v6736_v63 }
 0x2fd   : > { %5317 = vmatmul.msk.bf16.gmra.mxu1 %vm2589_vm1, %v5155_v14  ;;  %v2135_v14 = vadd.f32 %v7214_v7, %v7698_v41  ;;  %v7699_v7 = vld [vmem:[#allocation15_spill] sm:$0xff] }
 0x2fe   : > { %v3822_v62 = vadd.f32 %v3821_v43, %v3791_v1  ;;  %v5551_v43 = vld [vmem:[%s6655_s20 + $0x44] sm:$0xf]  ;;  %v5159_v1 = vor.u32 %v5552_v32, %v5158_v23  ;;  %v7700_v23 = vld [vmem:[#allocation16_spill] sm:$0xff] }
 0x2ff   : > { %v7260_v40 = vpop.f32.mrf.mxu3  ;;  %v2220_v49 = vpop.f32.mrf.mxu2 }
 0x300   : > { %v2221_v18 = vadd.f32 %v2220_v49, %v2132_v15  ;;  %v2694_v25 = vpop.f32.mrf.mxu0 }
 0x302   : > { %v2783_v3 = vpop.f32.mrf.mxu1  ;;  %v2275_v46 = vadd.f32 %v2221_v18, %v6727_v50 }
 0x303   : > { %v7263_v35 = vadd.f32 %v2783_v3, %v2694_v25 }
 0x304   : > { %v5634_v63 = vpack.c.bf16 %v2275_v46, %v2274_v5  ;;  %v3753_v44 = vadd.f32 %v3752_v24, %v2275_v46  ;;  %v3792_v20 = vmul.f32 %v2275_v46, %v2275_v46  ;;  %5101 = vmatmul.msk.bf16.gmra.mxu2 %vm2589_vm1, %v7697_v47  ;;  %v5163_v24 = vor.u32 %v5551_v43, %v5160_v17 }
 0x306   : > { %5758 = vst [vmem:[%s7020_s10 + $0x40] sm:$0xff] %v5634_v63   ;;  %v3823_v6 = vadd.f32 %v3822_v62, %v3792_v20  ;;  %v2137_v62 = vadd.f32 %v7227_v55, %v7699_v7  ;;  %v5166_v55 = vld [vmem:[%s6655_s20 + $0x50] sm:$0xf] }
 0x307   : > { %v7274_v21 = vpop.f32.mrf.mxu3  ;;  %v2223_v50 = vpop.f32.mrf.mxu2 }
 0x308   : > { %v2224_v19 = vadd.f32 %v2223_v50, %v2135_v14  ;;  %v2697_v5 = vpop.f32.mrf.mxu0  ;;  %v7701_v14 = vld [vmem:[#allocation13_spill] sm:$0xff] }
 0x309   : > { %v5554_v50 = vld [vmem:[%s6655_s20 + $0x54] sm:$0xf0] }
 0x30a   : > { %v2786_v15 = vpop.f32.mrf.mxu1  ;;  %v2276_v49 = vadd.f32 %v2224_v19, %v6746_v27  ;;  %v7702_v19 = vld [vmem:[#allocation8_spill] sm:$0xff]  ;;  %v5167_v7 = vor.u32 %v5554_v50, %v5166_v55 }
 0x30b   : > { %v7277_v18 = vadd.f32 %v2786_v15, %v2697_v5  ;;  %3417 = vmatmul.bf16.gmra.mxu0 %v5159_v1  ;;  %v5168_v1 = vld [vmem:[%s6655_s20 + $0x58] sm:$0xf0]  ;;  %v2140_v5 = vadd.f32 %v7238_v48, %v7702_v19  ;;  %v7704_v48 = vld [vmem:[#allocation7_spill] sm:$0xff] }
 0x30c   : > { %v3754_v25 = vadd.f32 %v3753_v44, %v2276_v49  ;;  %v3793_v3 = vmul.f32 %v2276_v49, %v2276_v49  ;;  %2928 = vmatmul.bf16.gmra.mxu3 %v6774_v57 }
 0x30d   : > { %5318 = vmatmul.msk.bf16.gmra.mxu1 %vm2589_vm1, %v5163_v24 }
 0x30e   : > { %v3824_v46 = vadd.f32 %v3823_v6, %v3793_v3  ;;  %v5553_v6 = vld [vmem:[%s6655_s20 + $0x54] sm:$0xf] }
 0x30f   : > { %v7283_v63 = vpop.f32.mrf.mxu3  ;;  %v2225_v27 = vpop.f32.mrf.mxu2 }
 0x310   : > { %v2226_v20 = vadd.f32 %v2225_v27, %v2137_v62  ;;  %v2699_v47 = vpop.f32.mrf.mxu0 }
 0x312   : > { %v2788_v44 = vpop.f32.mrf.mxu1  ;;  %v2277_v32 = vadd.f32 %v2226_v20, %v7700_v23  ;;  %v7703_v20 = vld [vmem:[#allocation19_spill] sm:$0xff] }
 0x313   : > { %v7286_v43 = vadd.f32 %v2788_v44, %v2699_v47 }
 0x314   : > { %v5639_v57 = vpack.c.bf16 %v2277_v32, %v2276_v49  ;;  %v3755_v17 = vadd.f32 %v3754_v25, %v2277_v32  ;;  %v3794_v41 = vmul.f32 %v2277_v32, %v2277_v32  ;;  %5102 = vmatmul.msk.bf16.gmra.mxu2 %vm2589_vm1, %v7701_v14  ;;  %v5171_v25 = vor.u32 %v5553_v6, %v5168_v1 }
 0x316   : > { %5759 = vst [vmem:[%s7020_s10 + $0x48] sm:$0xff] %v5639_v57   ;;  %v3825_v24 = vadd.f32 %v3824_v46, %v3794_v41  ;;  %v2142_v46 = vadd.f32 %v7251_v29, %v7704_v48  ;;  %v5174_v29 = vld [vmem:[%s6655_s20 + $0x60] sm:$0xf] }
 0x317   : > { %v7297_v15 = vpop.f32.mrf.mxu3  ;;  %v2228_v3 = vpop.f32.mrf.mxu2 }
 0x318   : > { %v2229_v62 = vadd.f32 %v2228_v3, %v2140_v5  ;;  %v2702_v49 = vpop.f32.mrf.mxu0  ;;  %v7705_v3 = vld [vmem:[#allocation6_spill] sm:$0xff] }
 0x31a   : > { %v2791_v27 = vpop.f32.mrf.mxu1  ;;  %v2278_v47 = vadd.f32 %v2229_v62, %v7703_v20  ;;  %v5176_v62 = vld [vmem:[%s6655_s20 + $0x68] sm:$0xf0] }
 0x31b   : > { %v7300_v44 = vadd.f32 %v2791_v27, %v2702_v49  ;;  %3422 = vmatmul.bf16.gmra.mxu0 %v5167_v7  ;;  %v5556_v7 = vld [vmem:[%s6655_s20 + $0x64] sm:$0xf0]  ;;  %v7706_v49 = vld [vmem:[#allocation18_spill] sm:$0xff] }
 0x31c   : > { %v3756_v23 = vadd.f32 %v3755_v17, %v2278_v47  ;;  %v3795_v32 = vmul.f32 %v2278_v47, %v2278_v47  ;;  %2933 = vmatmul.bf16.gmra.mxu3 %v6812_v39 }
 0x31d   : > { %5319 = vmatmul.msk.bf16.gmra.mxu1 %vm2589_vm1, %v5171_v25  ;;  %v2145_v25 = vadd.f32 %v7260_v40, %v7706_v49  ;;  %v7707_v40 = vld [vmem:[#allocation20_spill] sm:$0xff] }
 0x31e   : > { %v3826_v57 = vadd.f32 %v3825_v24, %v3795_v32  ;;  %v5555_v24 = vld [vmem:[%s6655_s20 + $0x64] sm:$0xf]  ;;  %v5175_v32 = vor.u32 %v5556_v7, %v5174_v29  ;;  %v7708_v29 = vld [vmem:[#allocation24_spill] sm:$0xff] }
 0x31f   : > { %v7306_v41 = vpop.f32.mrf.mxu3  ;;  %v2230_v14 = vpop.f32.mrf.mxu2 }
 0x320   : > { %v2231_v55 = vadd.f32 %v2230_v14, %v2142_v46  ;;  %v2704_v50 = vpop.f32.mrf.mxu0 }
 0x322   : > { %v2793_v17 = vpop.f32.mrf.mxu1  ;;  %v2279_v6 = vadd.f32 %v2231_v55, %v6803_v9 }
 0x323   : > { %v7309_v1 = vadd.f32 %v2793_v17, %v2704_v50 }
 0x324   : > { %v5644_v39 = vpack.c.bf16 %v2279_v6, %v2278_v47  ;;  %v3757_v19 = vadd.f32 %v3756_v23, %v2279_v6  ;;  %v3796_v5 = vmul.f32 %v2279_v6, %v2279_v6  ;;  %5103 = vmatmul.msk.bf16.gmra.mxu2 %vm2589_vm1, %v7705_v3  ;;  %v5179_v23 = vor.u32 %v5555_v24, %v5176_v62 }
 0x326   : > { %5760 = vst [vmem:[%s7020_s10 + $0x50] sm:$0xff] %v5644_v39   ;;  %v3827_v27 = vadd.f32 %v3826_v57, %v3796_v5  ;;  %v2147_v57 = vadd.f32 %v7274_v21, %v7707_v40  ;;  %v5182_v21 = vld [vmem:[%s6655_s20 + $0x70] sm:$0xf] }
 0x327   : > { %v7320_v20 = vpop.f32.mrf.mxu3  ;;  %v2233_v9 = vpop.f32.mrf.mxu2 }
 0x328   : > { %v2234_v48 = vadd.f32 %v2233_v9, %v2145_v25  ;;  %v2707_v47 = vpop.f32.mrf.mxu0  ;;  %v7710_v25 = vld [vmem:[#allocation17_spill] sm:$0xff] }
 0x329   : > { %v5558_v9 = vld [vmem:[%s6655_s20 + $0x74] sm:$0xf0] }
 0x32a   : > { %v2796_v46 = vpop.f32.mrf.mxu1  ;;  %v2280_v14 = vadd.f32 %v2234_v48, %v6822_v31  ;;  %v7711_v48 = vld [vmem:[#allocation22_spill] sm:$0xff]  ;;  %v5183_v40 = vor.u32 %v5558_v9, %v5182_v21 }
 0x32b   : > { %v7323_v55 = vadd.f32 %v2796_v46, %v2707_v47  ;;  %3427 = vmatmul.bf16.gmra.mxu0 %v5175_v32  ;;  %v5184_v32 = vld [vmem:[%s6655_s20 + $0x78] sm:$0xf0]  ;;  %v2150_v47 = vadd.f32 %v7283_v63, %v7711_v48  ;;  %v7714_v63 = vld [vmem:[#allocation23_spill] sm:$0xff] }
 0x32c   : > { %v3758_v50 = vadd.f32 %v3757_v19, %v2280_v14  ;;  %v3797_v17 = vmul.f32 %v2280_v14, %v2280_v14  ;;  %2938 = vmatmul.bf16.gmra.mxu3 %v6847_v33 }
 0x32d   : > { %5320 = vmatmul.msk.bf16.gmra.mxu1 %vm2589_vm1, %v5179_v23 }
 0x32e   : > { %v3828_v6 = vadd.f32 %v3827_v27, %v3797_v17  ;;  %v5557_v27 = vld [vmem:[%s6655_s20 + $0x74] sm:$0xf] }
 0x32f   : > { %v7329_v39 = vpop.f32.mrf.mxu3  ;;  %v2235_v31 = vpop.f32.mrf.mxu2 }
 0x330   : > { %v2236_v5 = vadd.f32 %v2235_v31, %v2147_v57  ;;  %v2709_v3 = vpop.f32.mrf.mxu0 }
 0x332   : > { %v2798_v19 = vpop.f32.mrf.mxu1  ;;  %v2281_v7 = vadd.f32 %v2236_v5, %v7708_v29  ;;  %v7712_v5 = vld [vmem:[#allocation27_spill] sm:$0xff] }
 0x333   : > { %v7332_v24 = vadd.f32 %v2798_v19, %v2709_v3 }
 0x334   : > { %v5649_v33 = vpack.c.bf16 %v2281_v7, %v2280_v14  ;;  %v3759_v62 = vadd.f32 %v3758_v50, %v2281_v7  ;;  %v3798_v49 = vmul.f32 %v2281_v7, %v2281_v7  ;;  %5104 = vmatmul.msk.bf16.gmra.mxu2 %vm2589_vm1, %v7710_v25  ;;  %v5187_v50 = vor.u32 %v5557_v27, %v5184_v32 }
 0x335   : > { %7709 = vst [vmem:[#allocation10_spill] sm:$0xff] %v7332_v24 }
 0x336   : > { %5761 = vst [vmem:[%s7020_s10 + $0x58] sm:$0xff] %v5649_v33   ;;  %v3829_v23 = vadd.f32 %v3828_v6, %v3798_v49  ;;  %v2152_v6 = vadd.f32 %v7297_v15, %v7714_v63  ;;  %v5190_v15 = vld [vmem:[%s6655_s20 + $0x80] sm:$0xf] }
 0x337   : > { %v7343_v46 = vpop.f32.mrf.mxu3  ;;  %v2238_v17 = vpop.f32.mrf.mxu2 }
 0x338   : > { %v2239_v57 = vadd.f32 %v2238_v17, %v2150_v47  ;;  %v2712_v14 = vpop.f32.mrf.mxu0  ;;  %v7716_v17 = vld [vmem:[#allocation21_spill] sm:$0xff] }
 0x33a   : > { %v2801_v31 = vpop.f32.mrf.mxu1  ;;  %v2282_v3 = vadd.f32 %v2239_v57, %v7712_v5  ;;  %v5192_v57 = vld [vmem:[%s6655_s20 + $0x88] sm:$0xf0] }
 0x33b   : > { %v7346_v19 = vadd.f32 %v2801_v31, %v2712_v14  ;;  %3432 = vmatmul.bf16.gmra.mxu0 %v5183_v40  ;;  %v5560_v40 = vld [vmem:[%s6655_s20 + $0x84] sm:$0xf0]  ;;  %v7717_v14 = vld [vmem:[#allocation26_spill] sm:$0xff] }
 0x33c   : > { %v3760_v29 = vadd.f32 %v3759_v62, %v2282_v3  ;;  %v3799_v7 = vmul.f32 %v2282_v3, %v2282_v3  ;;  %2943 = vmatmul.bf16.gmra.mxu3 %v6882_v4 }
 0x33d   : > { %7713 = vst [vmem:[#allocation11_spill] sm:$0xff] %v7346_v19  ;;  %5321 = vmatmul.msk.bf16.gmra.mxu1 %vm2589_vm1, %v5187_v50  ;;  %v2155_v50 = vadd.f32 %v7306_v41, %v7717_v14  ;;  %v7721_v41 = vld [vmem:[#allocation28_spill] sm:$0xff] }
 0x33e   : > { %v3830_v33 = vadd.f32 %v3829_v23, %v3799_v7  ;;  %v5559_v23 = vld [vmem:[%s6655_s20 + $0x84] sm:$0xf]  ;;  %v5191_v7 = vor.u32 %v5560_v40, %v5190_v15 }
 0x33f   : > { %v7352_v49 = vpop.f32.mrf.mxu3  ;;  %v2240_v25 = vpop.f32.mrf.mxu2 }
 0x340   : > { %v2241_v21 = vadd.f32 %v2240_v25, %v2152_v6  ;;  %v2714_v9 = vpop.f32.mrf.mxu0  ;;  %v7718_v25 = vld [vmem:[#allocation31_spill] sm:$0xff] }
 0x342   : > { %v2803_v62 = vpop.f32.mrf.mxu1  ;;  %v2283_v27 = vadd.f32 %v2241_v21, %v6873_v51 }
 0x343   : > { %v7355_v32 = vadd.f32 %v2803_v62, %v2714_v9 }
 0x344   : > { %v5654_v4 = vpack.c.bf16 %v2283_v27, %v2282_v3  ;;  %v3761_v48 = vadd.f32 %v3760_v29, %v2283_v27  ;;  %v3800_v47 = vmul.f32 %v2283_v27, %v2283_v27  ;;  %5105 = vmatmul.msk.bf16.gmra.mxu2 %vm2589_vm1, %v7716_v17  ;;  %v5195_v29 = vor.u32 %v5559_v23, %v5192_v57  ;;  %v7720_v17 = vld [vmem:[#allocation34_spill] sm:$0xff]  ;;  %v7722_v57 = vld [vmem:[#allocation33_spill] sm:$0xff] }
 0x345   : > { %7715 = vst [vmem:[#allocation9_spill] sm:$0xff] %v7355_v32 }
 0x346   : > { %5762 = vst [vmem:[%s7020_s10 + $0x60] sm:$0xff] %v5654_v4   ;;  %v3831_v31 = vadd.f32 %v3830_v33, %v3800_v47  ;;  %v2157_v33 = vadd.f32 %v7320_v20, %v7721_v41  ;;  %v5198_v20 = vld [vmem:[%s6655_s20 + $0x90] sm:$0xf] }
 0x347   : > { %v7366_v5 = vpop.f32.mrf.mxu3  ;;  %v2243_v51 = vpop.f32.mrf.mxu2 }
 0x348   : > { %v2244_v63 = vadd.f32 %v2243_v51, %v2155_v50  ;;  %v2717_v3 = vpop.f32.mrf.mxu0 }
 0x34a   : > { %v2806_v6 = vpop.f32.mrf.mxu1  ;;  %v2284_v21 = vadd.f32 %v2244_v63, %v7718_v25  ;;  %v7725_v25 = vld [vmem:[#allocation30_spill] sm:$0xff] }
 0x34b   : > { %v7369_v9 = vadd.f32 %v2806_v6, %v2717_v3  ;;  %3437 = vmatmul.bf16.gmra.mxu0 %v5191_v7  ;;  %v7724_v3 = vld [vmem:[#allocation25_spill] sm:$0xff] }
 0x34c   : > { %v3762_v62 = vadd.f32 %v3761_v48, %v2284_v21  ;;  %v3801_v27 = vmul.f32 %v2284_v21, %v2284_v21  ;;  %2948 = vmatmul.bf16.gmra.mxu3 %v7720_v17  ;;  %v5200_v6 = vld [vmem:[%s6655_s20 + $0x98] sm:$0xf0] }
 0x34d   : > { %7719 = vst [vmem:[#allocation14_spill] sm:$0xff] %v7369_v9  ;;  %5322 = vmatmul.msk.bf16.gmra.mxu1 %vm2589_vm1, %v5195_v29  ;;  %v5562_v29 = vld [vmem:[%s6655_s20 + $0x94] sm:$0xf0] }
 0x34e   : > { %v3832_v4 = vadd.f32 %v3831_v31, %v3801_v27  ;;  %v5561_v31 = vld [vmem:[%s6655_s20 + $0x94] sm:$0xf]  ;;  %v2160_v27 = vadd.f32 %v7329_v39, %v7725_v25 }
 0x34f   : > { %v2245_v47 = vpop.f32.mrf.mxu2  ;;  %v7375_v15 = vpop.f32.mrf.mxu3  ;;  %v7728_v39 = vld [vmem:[#allocation32_spill] sm:$0xff] }
 0x350   : > { %v2246_v40 = vadd.f32 %v2245_v47, %v2157_v33  ;;  %v2719_v23 = vpop.f32.mrf.mxu0  ;;  %v5199_v47 = vor.u32 %v5562_v29, %v5198_v20 }
 0x352   : > { %v2808_v48 = vpop.f32.mrf.mxu1  ;;  %v2285_v14 = vadd.f32 %v2246_v40, %v7722_v57 }
 0x353   : > { %v7378_v50 = vadd.f32 %v2808_v48, %v2719_v23  ;;  %v7726_v48 = vld [vmem:[#allocation37_spill] sm:$0xff] }
 0x354   : > { %v5659_v51 = vpack.c.bf16 %v2285_v14, %v2284_v21  ;;  %v3763_v7 = vadd.f32 %v3762_v62, %v2285_v14  ;;  %v3802_v63 = vmul.f32 %v2285_v14, %v2285_v14  ;;  %5106 = vmatmul.msk.bf16.gmra.mxu2 %vm2589_vm1, %v7724_v3  ;;  %v5203_v62 = vor.u32 %v5561_v31, %v5200_v6  ;;  %v7729_v6 = vld [vmem:[#allocation39_spill] sm:$0xff] }
 0x355   : > { %7723 = vst [vmem:[#allocation12_spill] sm:$0xff] %v7378_v50 }
 0x356   : > { %5763 = vst [vmem:[%s7020_s10 + $0x68] sm:$0xff] %v5659_v51   ;;  %v3833_v17 = vadd.f32 %v3832_v4, %v3802_v63  ;;  %v2162_v4 = vadd.f32 %v7343_v46, %v7728_v39  ;;  %v5206_v46 = vld [vmem:[%s6655_s20 + $0xa0] sm:$0xf] }
 0x357   : > { %v2248_v41 = vpop.f32.mrf.mxu2  ;;  %v7389_v33 = vpop.f32.mrf.mxu3 }
 0x358   : > { %v2249_v40 = vadd.f32 %v2248_v41, %v2160_v27  ;;  %v2722_v21 = vpop.f32.mrf.mxu0 }
 0x35a   : > { %v2811_v23 = vpop.f32.mrf.mxu1  ;;  %v2286_v57 = vadd.f32 %v2249_v40, %v7726_v48  ;;  %v7731_v40 = vld [vmem:[#allocation29_spill] sm:$0xff] }
 0x35b   : > { %v7392_v14 = vadd.f32 %v2811_v23, %v2722_v21  ;;  %3442 = vmatmul.bf16.gmra.mxu0 %v5199_v47  ;;  %v5564_v21 = vld [vmem:[%s6655_s20 + $0xa4] sm:$0xf0] }
 0x35c   : > { %v3764_v3 = vadd.f32 %v3763_v7, %v2286_v57  ;;  %v3803_v50 = vmul.f32 %v2286_v57, %v2286_v57  ;;  %2953 = vmatmul.bf16.gmra.mxu3 %v6957_v45 }
 0x35d   : > { %7727 = vst [vmem:[#allocation5_spill] sm:$0xff] %v7392_v14  ;;  %5323 = vmatmul.msk.bf16.gmra.mxu1 %vm2589_vm1, %v5203_v62  ;;  %v7732_v62 = vld [vmem:[#allocation36_spill] sm:$0xff] }
 0x35e   : > { %v3834_v51 = vadd.f32 %v3833_v17, %v3803_v50  ;;  %v5563_v50 = vld [vmem:[%s6655_s20 + $0xa4] sm:$0xf]  ;;  %v5208_v17 = vld [vmem:[%s6655_s20 + $0xa8] sm:$0xf0]  ;;  %v2165_v23 = vadd.f32 %v7352_v49, %v7732_v62 }
 0x35f   : > { %v2250_v63 = vpop.f32.mrf.mxu2  ;;  %v7398_v20 = vpop.f32.mrf.mxu3  ;;  %v7735_v49 = vld [vmem:[#allocation38_spill] sm:$0xff] }
 0x360   : > { %v2251_v29 = vadd.f32 %v2250_v63, %v2162_v4  ;;  %v2724_v31 = vpop.f32.mrf.mxu0  ;;  %v5207_v63 = vor.u32 %v5564_v21, %v5206_v46 }
 0x362   : > { %v2813_v7 = vpop.f32.mrf.mxu1  ;;  %v2287_v25 = vadd.f32 %v2251_v29, %v7729_v6 }
 0x363   : > { %v7401_v27 = vadd.f32 %v2813_v7, %v2724_v31  ;;  %v7733_v7 = vld [vmem:[#allocation41_spill] sm:$0xff] }
 0x364   : > { %v5664_v45 = vpack.c.bf16 %v2287_v25, %v2286_v57  ;;  %v3765_v41 = vadd.f32 %v3764_v3, %v2287_v25  ;;  %v3804_v47 = vmul.f32 %v2287_v25, %v2287_v25  ;;  %5107 = vmatmul.msk.bf16.gmra.mxu2 %vm2589_vm1, %v7731_v40  ;;  %v5211_v3 = vor.u32 %v5563_v50, %v5208_v17  ;;  %v7736_v17 = vld [vmem:[#allocation43_spill] sm:$0xff] }
 0x365   : > { %7730 = vst [vmem:[#allocation3_spill] sm:$0xff] %v7401_v27  ;;  %v7734_v27 = vld [vmem:[#allocation45_spill] sm:$0xff] }
 0x366   : > { %5764 = vst [vmem:[%s7020_s10 + $0x70] sm:$0xff] %v5664_v45   ;;  %v3835_v48 = vadd.f32 %v3834_v51, %v3804_v47  ;;  %v2167_v51 = vadd.f32 %v7366_v5, %v7735_v49  ;;  %v5216_v5 = vld [vmem:[%s6655_s20 + $0xb8] sm:$0xf0] }
 0x367   : > { %v2253_v39 = vpop.f32.mrf.mxu2  ;;  %v7412_v4 = vpop.f32.mrf.mxu3 }
 0x368   : > { %v2254_v29 = vadd.f32 %v2253_v39, %v2165_v23  ;;  %v3408_v57 = vpop.f32.mrf.mxu0 }
 0x36a   : > { %v3497_v31 = vpop.f32.mrf.mxu1  ;;  %v2288_v6 = vadd.f32 %v2254_v29, %v7733_v7  ;;  %v5214_v29 = vld [vmem:[%s6655_s20 + $0xb0] sm:$0xf]  ;;  %v5565_v7 = vld [vmem:[%s6655_s20 + $0xb4] sm:$0xf] }
 0x36b   : > { %3447 = vmatmul.bf16.gmra.mxu0 %v5207_v63  ;;  %v7737_v63 = vld [vmem:[#allocation35_spill] sm:$0xff]  ;;  %v3498_v19 = vadd.f32 %v3497_v31, %v3408_v57 }
 0x36c   : > { %v3766_v25 = vadd.f32 %v3765_v41, %v2288_v6  ;;  %v3805_v40 = vmul.f32 %v2288_v6, %v2288_v6  ;;  %2958 = vmatmul.bf16.gmra.mxu3 %v7734_v27 }
 0x36d   : > { %5324 = vmatmul.msk.bf16.gmra.mxu1 %vm2589_vm1, %v5211_v3  ;;  %v5566_v3 = vld [vmem:[%s6655_s20 + $0xb4] sm:$0xf0] }
 0x36e   : > { %v3836_v45 = vadd.f32 %v3835_v48, %v3805_v40 }
 0x36f   : > { %v2255_v47 = vpop.f32.mrf.mxu2  ;;  %v7419_v46 = vpop.f32.mrf.mxu3 }
 0x370   : > { %v2256_v21 = vadd.f32 %v2255_v47, %v2167_v51  ;;  %v3410_v50 = vpop.f32.mrf.mxu0  ;;  %v5215_v47 = vor.u32 %v5566_v3, %v5214_v29 }
 0x372   : > { %v3499_v41 = vpop.f32.mrf.mxu1  ;;  %v2289_v62 = vadd.f32 %v2256_v21, %v7736_v17  ;;  %v7738_v17 = vld [vmem:[#allocation42_spill] sm:$0xff] }
 0x373   : > { %v3500_v31 = vadd.f32 %v3499_v41, %v3410_v50  ;;  %v7740_v41 = vld [vmem:[#allocation40_spill] sm:$0xff] }
 0x374   : > { %v5669_v23 = vpack.c.bf16 %v2289_v62, %v2288_v6  ;;  %v3767_v39 = vadd.f32 %v3766_v25, %v2289_v62  ;;  %v3806_v27 = vmul.f32 %v2289_v62, %v2289_v62  ;;  %5108 = vmatmul.msk.bf16.gmra.mxu2 %vm2589_vm1, %v7737_v63  ;;  %v5219_v25 = vor.u32 %v5565_v7, %v5216_v5 }
 0x375   : > { %v2910_v62 = vadd.f32 %v7375_v15, %v7738_v17  ;;  %v7741_v17 = vld [vmem:[#allocation47_spill] sm:$0xff] }
 0x376   : > { %5765 = vst [vmem:[%s7020_s10 + $0x78] sm:$0xff] %v5669_v23   ;;  %v3768_v48 = vrot.slane %v3767_v39, 4  ;;  %v3837_v40 = vadd.f32 %v3836_v45, %v3806_v27 }
 0x377   : > { %v7429_v49 = vpop.f32.mrf.mxu3  ;;  %v2998_v51 = vpop.f32.mrf.mxu2 }
 0x378   : > { %v3769_v14 = vadd.f32 %v3768_v48, %v3767_v39  ;;  %v3838_v21 = vrot.slane %v3837_v40, 4  ;;  %v3413_v6 = vpop.f32.mrf.mxu0  ;;  %v2999_v24 = vadd.f32 %v2998_v51, %v2910_v62  ;;  %v7739_v39 = vld [vmem:[#allocation44_spill] sm:$0xff]  ;;  %v5222_v51 = vld [vmem:[%s6655_s20 + $0xc0] sm:$0xf]  ;;  %v2915_v62 = vadd.f32 %v7398_v20, %v7741_v17  ;;  %v5570_v17 = vld [vmem:[%s6655_s20 + $0xd4] sm:$0xf0] }
 0x379   : > { %v2912_v27 = vadd.f32 %v7389_v33, %v7739_v39  ;;  %v7742_v20 = vld [vmem:[#allocation48_spill] sm:$0xff] }
 0x37a   : > { %v3502_v63 = vpop.f32.mrf.mxu1  ;;  %v3770_v9 = vrot.slane %v3769_v14, 2  ;;  %v3839_v32 = vadd.f32 %v3838_v21, %v3837_v40  ;;  %v3577_v15 = vadd.f32 %v3498_v19, %v2999_v24  ;;  %v5567_v21 = vld [vmem:[%s6655_s20 + $0xc4] sm:$0xf] }
 0x37b   : > { %3452 = vmatmul.bf16.gmra.mxu0 %v5215_v47  ;;  %v5568_v47 = vld [vmem:[%s6655_s20 + $0xc4] sm:$0xf0] }
 0x37c   : > { %v3771_v23 = vadd.f32 %v3770_v9, %v3769_v14  ;;  %v3840_v45 = vrot.slane %v3839_v32, 2  ;;  %2963 = vmatmul.bf16.gmra.mxu3 %v7034_v30  ;;  %v3883_v40 = vmul.f32 %v3577_v15, %v3577_v15 }
 0x37d   : > { %5325 = vmatmul.msk.bf16.gmra.mxu1 %vm2589_vm1, %v5219_v25  ;;  %v5224_v25 = vld [vmem:[%s6655_s20 + $0xc8] sm:$0xf0] }
 0x37e   : > { %v3772_v29 = vrot.slane %v3771_v23, 1  ;;  %v3841_v3 = vadd.f32 %v3840_v45, %v3839_v32  ;;  %v3503_v45 = vadd.f32 %v3502_v63, %v3413_v6  ;;  %v2917_v6 = vadd.f32 %v7412_v4, %v7742_v20  ;;  %v5569_v4 = vld [vmem:[%s6655_s20 + $0xd4] sm:$0xf] }
 0x37f   : > { %v7443_v9 = vpop.f32.mrf.mxu3  ;;  %v3000_v14 = vpop.f32.mrf.mxu2 }
 0x380   : > { %v3773_v30 = vadd.f32 %v3772_v29, %v3771_v23  ;;  %v3842_v57 = vrot.slane %v3841_v3, 1  ;;  %v3001_v33 = vadd.f32 %v3000_v14, %v2912_v27  ;;  %v3415_v32 = vpop.f32.mrf.mxu0  ;;  %v5223_v29 = vor.u32 %v5568_v47, %v5222_v51 }
 0x381   : > { %v5227_v14 = vor.u32 %v5567_v21, %v5224_v25  ;;  %v7743_v21 = vld [vmem:[#allocation46_spill] sm:$0xff]  ;;  %v5230_v25 = vld [vmem:[%s6655_s20 + $0xd0] sm:$0xf] }
 0x382   : > { %v3504_v7 = vpop.f32.mrf.mxu1  ;;  %3774 = vst [vmem:[%s7441_s29] sm:$0x1] %v3773_v30  ;;  %v3843_v5 = vadd.f32 %v3842_v57, %v3841_v3  ;;  %v3578_v48 = vadd.f32 %v3500_v31, %v3001_v33 }
 0x384   : > { %3844 = vst [vmem:[%s7441_s29 + $0x1] sm:$0x1] %v3843_v5  ;;  %v5674_v24 = vpack.c.bf16 %v3578_v48, %v3577_v15  ;;  %v3845_v19 = vadd.f32 %v3578_v48, %v3577_v15  ;;  %v3884_v50 = vmul.f32 %v3578_v48, %v3578_v48  ;;  %5109 = vmatmul.msk.bf16.gmra.mxu2 %vm2589_vm1, %v7740_v41 }
 0x386   : > { %5675 = vst [vmem:[%s7451_s9] sm:$0xff] %v5674_v24   ;;  %v3915_v23 = vadd.f32 %v3884_v50, %v3883_v40  ;;  %v3505_v40 = vadd.f32 %v3504_v7, %v3415_v32 }
 0x387   : > { %v7463_v39 = vpop.f32.mrf.mxu3  ;;  %v3003_v27 = vpop.f32.mrf.mxu2 }
 0x388   : > { %v3004_v3 = vadd.f32 %v3003_v27, %v2915_v62  ;;  %v3418_v15 = vpop.f32.mrf.mxu0  ;;  %v5232_v62 = vld [vmem:[%s6655_s20 + $0xd8] sm:$0xf0] }
 0x38a   : > { %v3507_v30 = vpop.f32.mrf.mxu1  ;;  %v3579_v57 = vadd.f32 %v3503_v45, %v3004_v3 }
 0x38b   : > { %3457 = vmatmul.bf16.gmra.mxu0 %v5223_v29  ;;  %v3508_v32 = vadd.f32 %v3507_v30, %v3418_v15  ;;  %v5231_v29 = vor.u32 %v5570_v17, %v5230_v25  ;;  %v2925_v25 = vadd.f32 %v7443_v9, %v7076_v34  ;;  %v2927_v34 = vadd.f32 %v7463_v39, %v7094_v54  ;;  %v5573_v54 = vld [vmem:[%s6655_s20 + $0xf4] sm:$0xf]  ;;  %v5248_v39 = vld [vmem:[%s6655_s20 + $0xf8] sm:$0xf0] }
 0x38c   : > { %v3846_v31 = vadd.f32 %v3845_v19, %v3579_v57  ;;  %v3885_v33 = vmul.f32 %v3579_v57, %v3579_v57  ;;  %2968 = vmatmul.bf16.gmra.mxu3 %v7071_v38 }
 0x38d   : > { %5326 = vmatmul.msk.bf16.gmra.mxu1 %vm2589_vm1, %v5227_v14 }
 0x38e   : > { %v3916_v63 = vadd.f32 %v3915_v23, %v3885_v33  ;;  %v2920_v23 = vadd.f32 %v7419_v46, %v7039_v52  ;;  %v2922_v52 = vadd.f32 %v7429_v49, %v7051_v58  ;;  %v5571_v58 = vld [vmem:[%s6655_s20 + $0xe4] sm:$0xf]  ;;  %v5240_v49 = vld [vmem:[%s6655_s20 + $0xe8] sm:$0xf0] }
 0x38f   : > { %v7469_v5 = vpop.f32.mrf.mxu3  ;;  %v3005_v48 = vpop.f32.mrf.mxu2 }
 0x390   : > { %v3006_v24 = vadd.f32 %v3005_v48, %v2917_v6  ;;  %v3420_v19 = vpop.f32.mrf.mxu0 }
 0x392   : > { %v3509_v50 = vpop.f32.mrf.mxu1  ;;  %v3580_v41 = vadd.f32 %v3505_v40, %v3006_v24 }
 0x394   : > { %v5679_v51 = vpack.c.bf16 %v3580_v41, %v3579_v57  ;;  %v3847_v38 = vadd.f32 %v3846_v31, %v3580_v41  ;;  %v3886_v47 = vmul.f32 %v3580_v41, %v3580_v41  ;;  %5110 = vmatmul.msk.bf16.gmra.mxu2 %vm2589_vm1, %v7743_v21  ;;  %v5235_v57 = vor.u32 %v5569_v4, %v5232_v62  ;;  %v5572_v21 = vld [vmem:[%s6655_s20 + $0xe4] sm:$0xf0] }
 0x396   : > { %5766 = vst [vmem:[%s7451_s9 + $0x8] sm:$0xff] %v5679_v51   ;;  %v3917_v45 = vadd.f32 %v3916_v63, %v3886_v47  ;;  %v3510_v63 = vadd.f32 %v3509_v50, %v3420_v19  ;;  %v5238_v47 = vld [vmem:[%s6655_s20 + $0xe0] sm:$0xf] }
 0x397   : > { %v7480_v7 = vpop.f32.mrf.mxu3  ;;  %v3008_v27 = vpop.f32.mrf.mxu2  ;;  %v5239_v62 = vor.u32 %v5572_v21, %v5238_v47 }
 0x398   : > { %v3009_v3 = vadd.f32 %v3008_v27, %v2920_v23  ;;  %v3423_v14 = vpop.f32.mrf.mxu0 }
 0x39a   : > { %v3512_v31 = vpop.f32.mrf.mxu1  ;;  %v3581_v33 = vadd.f32 %v3508_v32, %v3009_v3  ;;  %v5243_v32 = vor.u32 %v5571_v58, %v5240_v49  ;;  %v5251_v58 = vor.u32 %v5573_v54, %v5248_v39 }
 0x39b   : > { %3462 = vmatmul.bf16.gmra.mxu0 %v5231_v29  ;;  %v3513_v19 = vadd.f32 %v3512_v31, %v3423_v14 }
 0x39c   : > { %v3848_v20 = vadd.f32 %v3847_v38, %v3581_v33  ;;  %v3887_v6 = vmul.f32 %v3581_v33, %v3581_v33  ;;  %2973 = vmatmul.bf16.gmra.mxu3 %v7108_v12 }
 0x39d   : > { %5327 = vmatmul.msk.bf16.gmra.mxu1 %vm2589_vm1, %v5235_v57 }
 0x39e   : > { %v3918_v46 = vadd.f32 %v3917_v45, %v3887_v6 }
 0x39f   : > { %v7486_v15 = vpop.f32.mrf.mxu3  ;;  %v3010_v30 = vpop.f32.mrf.mxu2 }
 0x3a0   : > { %v3011_v48 = vadd.f32 %v3010_v30, %v2922_v52  ;;  %v3425_v40 = vpop.f32.mrf.mxu0 }
 0x3a2   : > { %v3514_v24 = vpop.f32.mrf.mxu1  ;;  %v3582_v41 = vadd.f32 %v3510_v63, %v3011_v48  ;;  %v5246_v63 = vld [vmem:[%s6655_s20 + $0xf0] sm:$0xf]  ;;  %v5574_v48 = vld [vmem:[%s6655_s20 + $0xf4] sm:$0xf0] }
 0x3a3   : > { %v3515_v31 = vadd.f32 %v3514_v24, %v3425_v40 }
 0x3a4   : > { %v5684_v51 = vpack.c.bf16 %v3582_v41, %v3581_v33  ;;  %v3849_v12 = vadd.f32 %v3848_v20, %v3582_v41  ;;  %v3888_v38 = vmul.f32 %v3582_v41, %v3582_v41  ;;  %5111 = vmatmul.msk.bf16.gmra.mxu2 %vm2589_vm1, %v7036_v26  ;;  %v2930_v41 = vadd.f32 %v7469_v5, %v7116_v8 }
 0x3a5   : > { %v2932_v8 = vadd.f32 %v7480_v7, %v7128_v2  ;;  %v5575_v2 = vld [vmem:[%s6655_s20 + $0x104] sm:$0xf]  ;;  %v5256_v7 = vld [vmem:[%s6655_s20 + $0x108] sm:$0xf0] }
 0x3a6   : > { %5767 = vst [vmem:[%s7451_s9 + $0x10] sm:$0xff] %v5684_v51   ;;  %v3919_v17 = vadd.f32 %v3918_v46, %v3888_v38  ;;  %v5247_v38 = vor.u32 %v5574_v48, %v5246_v63 }
 0x3a7   : > { %v7497_v50 = vpop.f32.mrf.mxu3  ;;  %v3013_v4 = vpop.f32.mrf.mxu2 }
 0x3a8   : > { %v3014_v23 = vadd.f32 %v3013_v4, %v2925_v25  ;;  %v3428_v45 = vpop.f32.mrf.mxu0 }
 0x3aa   : > { %v3517_v27 = vpop.f32.mrf.mxu1  ;;  %v3583_v29 = vadd.f32 %v3513_v19, %v3014_v23 }
 0x3ab   : > { %3467 = vmatmul.bf16.gmra.mxu0 %v5239_v62  ;;  %v3518_v40 = vadd.f32 %v3517_v27, %v3428_v45 }
 0x3ac   : > { %v3850_v26 = vadd.f32 %v3849_v12, %v3583_v29  ;;  %v3889_v3 = vmul.f32 %v3583_v29, %v3583_v29  ;;  %2978 = vmatmul.bf16.gmra.mxu3 %v7142_v22 }
 0x3ad   : > { %5328 = vmatmul.msk.bf16.gmra.mxu1 %vm2589_vm1, %v5243_v32 }
 0x3ae   : > { %v3920_v9 = vadd.f32 %v3919_v17, %v3889_v3  ;;  %v5254_v3 = vld [vmem:[%s6655_s20 + $0x100] sm:$0xf] }
 0x3af   : > { %v7503_v14 = vpop.f32.mrf.mxu3  ;;  %v3015_v57 = vpop.f32.mrf.mxu2 }
 0x3b0   : > { %v3016_v33 = vadd.f32 %v3015_v57, %v2927_v34  ;;  %v3430_v20 = vpop.f32.mrf.mxu0  ;;  %v5576_v34 = vld [vmem:[%s6655_s20 + $0x104] sm:$0xf0] }
 0x3b2   : > { %v3519_v6 = vpop.f32.mrf.mxu1  ;;  %v3584_v52 = vadd.f32 %v3515_v31, %v3016_v33 }
 0x3b3   : > { %v3520_v4 = vadd.f32 %v3519_v6, %v3430_v20  ;;  %v5255_v20 = vor.u32 %v5576_v34, %v5254_v3 }
 0x3b4   : > { %v5689_v46 = vpack.c.bf16 %v3584_v52, %v3583_v29  ;;  %v3851_v22 = vadd.f32 %v3850_v26, %v3584_v52  ;;  %v3890_v30 = vmul.f32 %v3584_v52, %v3584_v52  ;;  %5112 = vmatmul.msk.bf16.gmra.mxu2 %vm2589_vm1, %v7073_v13 }
 0x3b6   : > { %5768 = vst [vmem:[%s7451_s9 + $0x18] sm:$0xff] %v5689_v46   ;;  %v3921_v51 = vadd.f32 %v3920_v9, %v3890_v30  ;;  %v2935_v9 = vadd.f32 %v7486_v15, %v7147_v0  ;;  %v5259_v46 = vor.u32 %v5575_v2, %v5256_v7  ;;  %v2937_v0 = vadd.f32 %v7497_v50, %v7162_v37  ;;  %v5264_v37 = vld [vmem:[%s6655_s20 + $0x118] sm:$0xf0] }
 0x3b7   : > { %v7514_v24 = vpop.f32.mrf.mxu3  ;;  %v3018_v12 = vpop.f32.mrf.mxu2  ;;  %v2940_v50 = vadd.f32 %v7503_v14, %v7181_v16 }
 0x3b8   : > { %v3019_v47 = vadd.f32 %v3018_v12, %v2930_v41  ;;  %v3433_v21 = vpop.f32.mrf.mxu0 }
 0x3ba   : > { %v3522_v49 = vpop.f32.mrf.mxu1  ;;  %v3585_v25 = vadd.f32 %v3518_v40, %v3019_v47 }
 0x3bb   : > { %3472 = vmatmul.bf16.gmra.mxu0 %v5247_v38  ;;  %v3523_v31 = vadd.f32 %v3522_v49, %v3433_v21  ;;  %v5578_v49 = vld [vmem:[%s6655_s20 + $0x114] sm:$0xf0] }
 0x3bc   : > { %v3852_v13 = vadd.f32 %v3851_v22, %v3585_v25  ;;  %v3891_v17 = vmul.f32 %v3585_v25, %v3585_v25  ;;  %2983 = vmatmul.bf16.gmra.mxu3 %v7176_v42 }
 0x3bd   : > { %5329 = vmatmul.msk.bf16.gmra.mxu1 %vm2589_vm1, %v5251_v58  ;;  %v5262_v58 = vld [vmem:[%s6655_s20 + $0x110] sm:$0xf] }
 0x3be   : > { %v3922_v5 = vadd.f32 %v3921_v51, %v3891_v17 }
 0x3bf   : > { %v3020_v19 = vpop.f32.mrf.mxu2  ;;  %v7520_v45 = vpop.f32.mrf.mxu3 }
 0x3c0   : > { %v3021_v62 = vadd.f32 %v3020_v19, %v2932_v8  ;;  %v3435_v23 = vpop.f32.mrf.mxu0  ;;  %v5263_v19 = vor.u32 %v5578_v49, %v5262_v58 }
 0x3c2   : > { %v3524_v32 = vpop.f32.mrf.mxu1  ;;  %v3586_v27 = vadd.f32 %v3520_v4, %v3021_v62 }
 0x3c3   : > { %v3525_v39 = vadd.f32 %v3524_v32, %v3435_v23 }
 0x3c4   : > { %v5694_v29 = vpack.c.bf16 %v3586_v27, %v3585_v25  ;;  %v3853_v42 = vadd.f32 %v3852_v13, %v3586_v27  ;;  %v3892_v26 = vmul.f32 %v3586_v27, %v3586_v27  ;;  %5113 = vmatmul.msk.bf16.gmra.mxu2 %vm2589_vm1, %v7113_v28  ;;  %v5577_v13 = vld [vmem:[%s6655_s20 + $0x114] sm:$0xf] }
 0x3c5   : > { %v5267_v23 = vor.u32 %v5577_v13, %v5264_v37 }
 0x3c6   : > { %5769 = vst [vmem:[%s7451_s9 + $0x20] sm:$0xff] %v5694_v29   ;;  %v3923_v57 = vadd.f32 %v3922_v5, %v3892_v26 }
 0x3c7   : > { %v3023_v33 = vpop.f32.mrf.mxu2  ;;  %v2946_v63 = vpop.f32.mrf.mxu3 }
 0x3c8   : > { %v3024_v6 = vadd.f32 %v3023_v33, %v2935_v9  ;;  %v3438_v52 = vpop.f32.mrf.mxu0 }
 0x3ca   : > { %v3527_v22 = vpop.f32.mrf.mxu1  ;;  %v3587_v30 = vadd.f32 %v3523_v31, %v3024_v6 }
 0x3cb   : > { %3477 = vmatmul.bf16.gmra.mxu0 %v5255_v20  ;;  %v3528_v8 = vadd.f32 %v3527_v22, %v3438_v52  ;;  %v2945_v20 = vadd.f32 %v7520_v45, %v7206_v11 }
 0x3cc   : > { %v3854_v28 = vadd.f32 %v3853_v42, %v3587_v30  ;;  %v3893_v48 = vmul.f32 %v3587_v30, %v3587_v30  ;;  %v2942_v42 = vadd.f32 %v7514_v24, %v7193_v59 }
 0x3cd   : > { %5330 = vmatmul.msk.bf16.gmra.mxu1 %vm2589_vm1, %v5259_v46 }
 0x3ce   : > { %v3924_v15 = vadd.f32 %v3923_v57, %v3893_v48 }
 0x3cf   : > { %v3025_v54 = vpop.f32.mrf.mxu2  ;;  %v2949_v25 = vpop.f32.mrf.mxu3 }
 0x3d0   : > { %v3026_v41 = vadd.f32 %v3025_v54, %v2937_v0  ;;  %v3440_v51 = vpop.f32.mrf.mxu0 }
 0x3d2   : > { %v3529_v40 = vpop.f32.mrf.mxu1  ;;  %v3588_v12 = vadd.f32 %v3525_v39, %v3026_v41 }
 0x3d3   : > { %v3530_v3 = vadd.f32 %v3529_v40, %v3440_v51 }
 0x3d4   : > { %v5699_v38 = vpack.c.bf16 %v3588_v12, %v3587_v30  ;;  %v3855_v47 = vadd.f32 %v3854_v28, %v3588_v12  ;;  %v3894_v21 = vmul.f32 %v3588_v12, %v3588_v12  ;;  %5114 = vmatmul.msk.bf16.gmra.mxu2 %vm2589_vm1, %v7144_v61 }
 0x3d6   : > { %5770 = vst [vmem:[%s7451_s9 + $0x28] sm:$0xff] %v5699_v38   ;;  %v3925_v17 = vadd.f32 %v3924_v15, %v3894_v21  ;;  %v2947_v15 = vadd.f32 %v2946_v63, %v7217_v53  ;;  %v2950_v21 = vadd.f32 %v2949_v25, %v7230_v60 }
 0x3d7   : > { %v3028_v5 = vpop.f32.mrf.mxu2  ;;  %v2951_v14 = vpop.f32.mrf.mxu3 }
 0x3d8   : > { %v3029_v4 = vadd.f32 %v3028_v5, %v2940_v50  ;;  %v3443_v62 = vpop.f32.mrf.mxu0 }
 0x3da   : > { %v3532_v32 = vpop.f32.mrf.mxu1  ;;  %v3589_v27 = vadd.f32 %v3528_v8, %v3029_v4 }
 0x3db   : > { %3482 = vmatmul.bf16.gmra.mxu0 %v5263_v19  ;;  %v3533_v59 = vadd.f32 %v3532_v32, %v3443_v62  ;;  %v2952_v19 = vadd.f32 %v2951_v14, %v7241_v36 }
 0x3dc   : > { %v3856_v61 = vadd.f32 %v3855_v47, %v3589_v27  ;;  %v3895_v29 = vmul.f32 %v3589_v27, %v3589_v27 }
 0x3dd   : > { %5331 = vmatmul.msk.bf16.gmra.mxu1 %vm2589_vm1, %v5267_v23 }
 0x3de   : > { %v3926_v16 = vadd.f32 %v3925_v17, %v3895_v29 }
 0x3df   : > { %v3030_v26 = vpop.f32.mrf.mxu2  ;;  %v2954_v22 = vpop.f32.mrf.mxu3 }
 0x3e0   : > { %v3031_v34 = vadd.f32 %v3030_v26, %v2942_v42  ;;  %v3445_v2 = vpop.f32.mrf.mxu0 }
 0x3e2   : > { %v3534_v7 = vpop.f32.mrf.mxu1  ;;  %v3590_v9 = vadd.f32 %v3530_v3, %v3031_v34 }
 0x3e4   : > { %v5704_v57 = vpack.c.bf16 %v3590_v9, %v3589_v27  ;;  %v3857_v31 = vadd.f32 %v3856_v61, %v3590_v9  ;;  %v3896_v33 = vmul.f32 %v3590_v9, %v3590_v9  ;;  %5115 = vmatmul.msk.bf16.gmra.mxu2 %vm2589_vm1, %v7178_v56  ;;  %v3535_v56 = vadd.f32 %v3534_v7, %v3445_v2 }
 0x3e6   : > { %5771 = vst [vmem:[%s7451_s9 + $0x30] sm:$0xff] %v5704_v57   ;;  %v3927_v6 = vadd.f32 %v3926_v16, %v3896_v33  ;;  %v2955_v16 = vadd.f32 %v2954_v22, %v7254_v10 }
 0x3e7   : > { %v3033_v24 = vpop.f32.mrf.mxu2  ;;  %v2956_v40 = vpop.f32.mrf.mxu3 }
 0x3e8   : > { %v3034_v52 = vadd.f32 %v3033_v24, %v2945_v20  ;;  %v3448_v46 = vpop.f32.mrf.mxu0  ;;  %v2957_v33 = vadd.f32 %v2956_v40, %v7263_v35 }
 0x3ea   : > { %v3537_v30 = vpop.f32.mrf.mxu1  ;;  %v3591_v28 = vadd.f32 %v3533_v59, %v3034_v52 }
 0x3eb   : > { %v3538_v49 = vadd.f32 %v3537_v30, %v3448_v46 }
 0x3ec   : > { %v3858_v48 = vadd.f32 %v3857_v31, %v3591_v28  ;;  %v3897_v0 = vmul.f32 %v3591_v28, %v3591_v28 }
 0x3ee   : > { %v3928_v54 = vadd.f32 %v3927_v6, %v3897_v0 }
 0x3ef   : > { %v3035_v39 = vpop.f32.mrf.mxu2  ;;  %v2959_v5 = vpop.f32.mrf.mxu3 }
 0x3f0   : > { %v3036_v41 = vadd.f32 %v3035_v39, %v2947_v15  ;;  %v3450_v51 = vpop.f32.mrf.mxu0  ;;  %v2960_v0 = vadd.f32 %v2959_v5, %v7277_v18 }
 0x3f2   : > { %v3539_v11 = vpop.f32.mrf.mxu1  ;;  %v3592_v45 = vadd.f32 %v3535_v56, %v3036_v41 }
 0x3f3   : > { %v3540_v23 = vadd.f32 %v3539_v11, %v3450_v51 }
 0x3f4   : > { %v5709_v12 = vpack.c.bf16 %v3592_v45, %v3591_v28  ;;  %v3859_v38 = vadd.f32 %v3858_v48, %v3592_v45  ;;  %v3898_v47 = vmul.f32 %v3592_v45, %v3592_v45 }
 0x3f6   : > { %5772 = vst [vmem:[%s7451_s9 + $0x38] sm:$0xff] %v5709_v12   ;;  %v3929_v58 = vadd.f32 %v3928_v54, %v3898_v47 }
 0x3f7   : > { %v3038_v13 = vpop.f32.mrf.mxu2  ;;  %v2961_v34 = vpop.f32.mrf.mxu3 }
 0x3f8   : > { %v3039_v37 = vadd.f32 %v3038_v13, %v2950_v21  ;;  %v3453_v50 = vpop.f32.mrf.mxu0  ;;  %v2962_v12 = vadd.f32 %v2961_v34, %v7286_v43 }
 0x3fa   : > { %v3542_v53 = vpop.f32.mrf.mxu1  ;;  %v3593_v63 = vadd.f32 %v3538_v49, %v3039_v37 }
 0x3fb   : > { %v3543_v3 = vadd.f32 %v3542_v53, %v3453_v50 }
 0x3fc   : > { %v3860_v17 = vadd.f32 %v3859_v38, %v3593_v63  ;;  %v3899_v8 = vmul.f32 %v3593_v63, %v3593_v63 }
 0x3fe   : > { %v3930_v4 = vadd.f32 %v3929_v58, %v3899_v8 }
 0x3ff   : > { %v3040_v62 = vpop.f32.mrf.mxu2  ;;  %v2964_v10 = vpop.f32.mrf.mxu3 }
 0x400   : > { %v3041_v32 = vadd.f32 %v3040_v62, %v2952_v19  ;;  %v3455_v27 = vpop.f32.mrf.mxu0 }
 0x402   : > { %v3544_v60 = vpop.f32.mrf.mxu1  ;;  %v3594_v25 = vadd.f32 %v3540_v23, %v3041_v32 }
 0x403   : > { %v3545_v59 = vadd.f32 %v3544_v60, %v3455_v27 }
 0x404   : > { %v5714_v61 = vpack.c.bf16 %v3594_v25, %v3593_v63  ;;  %v3861_v29 = vadd.f32 %v3860_v17, %v3594_v25  ;;  %v3900_v42 = vmul.f32 %v3594_v25, %v3594_v25  ;;  %v2965_v17 = vadd.f32 %v2964_v10, %v7300_v44 }
 0x406   : > { %5773 = vst [vmem:[%s7451_s9 + $0x40] sm:$0xff] %v5714_v61   ;;  %v3931_v26 = vadd.f32 %v3930_v4, %v3900_v42 }
 0x407   : > { %v3043_v2 = vpop.f32.mrf.mxu2  ;;  %v2966_v11 = vpop.f32.mrf.mxu3 }
 0x408   : > { %v3044_v7 = vadd.f32 %v3043_v2, %v2955_v16  ;;  %v3458_v9 = vpop.f32.mrf.mxu0  ;;  %v2967_v60 = vadd.f32 %v2966_v11, %v7309_v1 }
 0x40a   : > { %v3547_v36 = vpop.f32.mrf.mxu1  ;;  %v3595_v14 = vadd.f32 %v3543_v3, %v3044_v7 }
 0x40b   : > { %v3548_v54 = vadd.f32 %v3547_v36, %v3458_v9 }
 0x40c   : > { %v3862_v57 = vadd.f32 %v3861_v29, %v3595_v14  ;;  %v3901_v31 = vmul.f32 %v3595_v14, %v3595_v14 }
 0x40e   : > { %v3932_v20 = vadd.f32 %v3931_v26, %v3901_v31 }
 0x40f   : > { %v3045_v6 = vpop.f32.mrf.mxu2  ;;  %v2969_v63 = vpop.f32.mrf.mxu3 }
 0x410   : > { %v3046_v24 = vadd.f32 %v3045_v6, %v2957_v33  ;;  %v3460_v52 = vpop.f32.mrf.mxu0  ;;  %v2970_v9 = vadd.f32 %v2969_v63, %v7323_v55 }
 0x412   : > { %v3549_v46 = vpop.f32.mrf.mxu1  ;;  %v3596_v22 = vadd.f32 %v3545_v59, %v3046_v24 }
 0x413   : > { %v3550_v21 = vadd.f32 %v3549_v46, %v3460_v52  ;;  %v7744_v52 = vld [vmem:[#allocation10_spill] sm:$0xff] }
 0x414   : > { %v5719_v30 = vpack.c.bf16 %v3596_v22, %v3595_v14  ;;  %v3863_v28 = vadd.f32 %v3862_v57, %v3596_v22  ;;  %v3902_v48 = vmul.f32 %v3596_v22, %v3596_v22 }
 0x416   : > { %5774 = vst [vmem:[%s7451_s9 + $0x48] sm:$0xff] %v5719_v30   ;;  %v3933_v15 = vadd.f32 %v3932_v20, %v3902_v48 }
 0x417   : > { %v3048_v39 = vpop.f32.mrf.mxu2  ;;  %v2971_v61 = vpop.f32.mrf.mxu3 }
 0x418   : > { %v3049_v56 = vadd.f32 %v3048_v39, %v2960_v0  ;;  %v3463_v41 = vpop.f32.mrf.mxu0  ;;  %v2972_v10 = vadd.f32 %v2971_v61, %v7744_v52 }
 0x41a   : > { %v3552_v35 = vpop.f32.mrf.mxu1  ;;  %v3597_v51 = vadd.f32 %v3548_v54, %v3049_v56 }
 0x41b   : > { %v3553_v5 = vadd.f32 %v3552_v35, %v3463_v41  ;;  %v7745_v41 = vld [vmem:[#allocation11_spill] sm:$0xff] }
 0x41c   : > { %v3864_v45 = vadd.f32 %v3863_v28, %v3597_v51  ;;  %v3903_v40 = vmul.f32 %v3597_v51, %v3597_v51 }
 0x41e   : > { %v3934_v38 = vadd.f32 %v3933_v15, %v3903_v40 }
 0x41f   : > { %v3050_v47 = vpop.f32.mrf.mxu2  ;;  %v2974_v33 = vpop.f32.mrf.mxu3 }
 0x420   : > { %v3051_v58 = vadd.f32 %v3050_v47, %v2962_v12  ;;  %v3465_v49 = vpop.f32.mrf.mxu0  ;;  %v2975_v35 = vadd.f32 %v2974_v33, %v7745_v41 }
 0x422   : > { %v3554_v18 = vpop.f32.mrf.mxu1  ;;  %v3598_v13 = vadd.f32 %v3550_v21, %v3051_v58  ;;  %v7746_v58 = vld [vmem:[#allocation9_spill] sm:$0xff] }
 0x423   : > { %v3555_v42 = vadd.f32 %v3554_v18, %v3465_v49 }
 0x424   : > { %v5724_v37 = vpack.c.bf16 %v3598_v13, %v3597_v51  ;;  %v3865_v50 = vadd.f32 %v3864_v45, %v3598_v13  ;;  %v3904_v53 = vmul.f32 %v3598_v13, %v3598_v13 }
 0x426   : > { %5775 = vst [vmem:[%s7451_s9 + $0x50] sm:$0xff] %v5724_v37   ;;  %v3935_v8 = vadd.f32 %v3934_v38, %v3904_v53 }
 0x427   : > { %v3053_v19 = vpop.f32.mrf.mxu2  ;;  %v2976_v55 = vpop.f32.mrf.mxu3 }
 0x428   : > { %v3054_v4 = vadd.f32 %v3053_v19, %v2965_v17  ;;  %v3468_v62 = vpop.f32.mrf.mxu0  ;;  %v2977_v49 = vadd.f32 %v2976_v55, %v7746_v58 }
 0x42a   : > { %v3557_v43 = vpop.f32.mrf.mxu1  ;;  %v3599_v23 = vadd.f32 %v3553_v5, %v3054_v4  ;;  %v7747_v4 = vld [vmem:[#allocation14_spill] sm:$0xff] }
 0x42b   : > { %v3558_v14 = vadd.f32 %v3557_v43, %v3468_v62 }
 0x42c   : > { %v3866_v32 = vadd.f32 %v3865_v50, %v3599_v23  ;;  %v3905_v27 = vmul.f32 %v3599_v23, %v3599_v23 }
 0x42e   : > { %v3936_v25 = vadd.f32 %v3935_v8, %v3905_v27 }
 0x42f   : > { %v3055_v29 = vpop.f32.mrf.mxu2  ;;  %v2979_v21 = vpop.f32.mrf.mxu3 }
 0x430   : > { %v3056_v16 = vadd.f32 %v3055_v29, %v2967_v60  ;;  %v3470_v26 = vpop.f32.mrf.mxu0  ;;  %v2980_v62 = vadd.f32 %v2979_v21, %v7747_v4 }
 0x432   : > { %v3559_v44 = vpop.f32.mrf.mxu1  ;;  %v3600_v3 = vadd.f32 %v3555_v42, %v3056_v16 }
 0x433   : > { %v3560_v30 = vadd.f32 %v3559_v44, %v3470_v26  ;;  %v7748_v26 = vld [vmem:[#allocation12_spill] sm:$0xff] }
 0x434   : > { %v5729_v34 = vpack.c.bf16 %v3600_v3, %v3599_v23  ;;  %v3867_v2 = vadd.f32 %v3866_v32, %v3600_v3  ;;  %v3906_v7 = vmul.f32 %v3600_v3, %v3600_v3 }
 0x436   : > { %5776 = vst [vmem:[%s7451_s9 + $0x58] sm:$0xff] %v5729_v34   ;;  %v3937_v36 = vadd.f32 %v3936_v25, %v3906_v7 }
 0x437   : > { %v3058_v57 = vpop.f32.mrf.mxu2  ;;  %v2981_v32 = vpop.f32.mrf.mxu3 }
 0x438   : > { %v3059_v31 = vadd.f32 %v3058_v57, %v2970_v9  ;;  %v3473_v20 = vpop.f32.mrf.mxu0  ;;  %v2982_v44 = vadd.f32 %v2981_v32, %v7748_v26 }
 0x43a   : > { %v3601_v1 = vadd.f32 %v3558_v14, %v3059_v31  ;;  %v3562_v6 = vpop.f32.mrf.mxu1 }
 0x43b   : > { %v3563_v11 = vadd.f32 %v3562_v6, %v3473_v20  ;;  %v7749_v20 = vld [vmem:[#allocation5_spill] sm:$0xff] }
 0x43c   : > { %v3868_v59 = vadd.f32 %v3867_v2, %v3601_v1  ;;  %v3907_v24 = vmul.f32 %v3601_v1, %v3601_v1 }
 0x43e   : > { %v3938_v46 = vadd.f32 %v3937_v36, %v3907_v24 }
 0x43f   : > { %v3060_v22 = vpop.f32.mrf.mxu2  ;;  %v2984_v9 = vpop.f32.mrf.mxu3 }
 0x440   : > { %v3061_v28 = vadd.f32 %v3060_v22, %v2972_v10  ;;  %v3475_v39 = vpop.f32.mrf.mxu0  ;;  %v2985_v6 = vadd.f32 %v2984_v9, %v7749_v20 }
 0x442   : > { %v3602_v48 = vadd.f32 %v3560_v30, %v3061_v28  ;;  %v3564_v56 = vpop.f32.mrf.mxu1 }
 0x443   : > { %v3565_v53 = vadd.f32 %v3564_v56, %v3475_v39 }
 0x444   : > { %v5734_v0 = vpack.c.bf16 %v3602_v48, %v3601_v1  ;;  %v3869_v15 = vadd.f32 %v3868_v59, %v3602_v48  ;;  %v3908_v54 = vmul.f32 %v3602_v48, %v3602_v48 }
 0x446   : > { %5777 = vst [vmem:[%s7451_s9 + $0x60] sm:$0xff] %v5734_v0   ;;  %v3939_v51 = vadd.f32 %v3938_v46, %v3908_v54  ;;  %v7750_v0 = vld [vmem:[#allocation3_spill] sm:$0xff] }
 0x447   : > { %v3063_v45 = vpop.f32.mrf.mxu2  ;;  %v2986_v22 = vpop.f32.mrf.mxu3 }
 0x448   : > { %v3064_v40 = vadd.f32 %v3063_v45, %v2975_v35  ;;  %v3478_v13 = vpop.f32.mrf.mxu0 }
 0x44a   : > { %v3603_v12 = vadd.f32 %v3563_v11, %v3064_v40  ;;  %v3567_v50 = vpop.f32.mrf.mxu1 }
 0x44b   : > { %v3568_v23 = vadd.f32 %v3567_v50, %v3478_v13 }
 0x44c   : > { %v3870_v38 = vadd.f32 %v3869_v15, %v3603_v12  ;;  %v3909_v47 = vmul.f32 %v3603_v12, %v3603_v12  ;;  %v2987_v15 = vadd.f32 %v2986_v22, %v7750_v0 }
 0x44e   : > { %v3940_v18 = vadd.f32 %v3939_v51, %v3909_v47 }
 0x44f   : > { %v3065_v37 = vpop.f32.mrf.mxu2 }
 0x450   : > { %v3066_v63 = vadd.f32 %v3065_v37, %v2977_v49  ;;  %v3480_v25 = vpop.f32.mrf.mxu0 }
 0x452   : > { %v3604_v17 = vadd.f32 %v3565_v53, %v3066_v63  ;;  %v3569_v61 = vpop.f32.mrf.mxu1 }
 0x453   : > { %v3570_v2 = vadd.f32 %v3569_v61, %v3480_v25 }
 0x454   : > { %v5739_v8 = vpack.c.bf16 %v3604_v17, %v3603_v12  ;;  %v3871_v5 = vadd.f32 %v3870_v38, %v3604_v17  ;;  %v3910_v19 = vmul.f32 %v3604_v17, %v3604_v17 }
 0x456   : > { %5778 = vst [vmem:[%s7451_s9 + $0x68] sm:$0xff] %v5739_v8   ;;  %v3941_v43 = vadd.f32 %v3940_v18, %v3910_v19 }
 0x457   : > { %v3068_v27 = vpop.f32.mrf.mxu2 }
 0x458   : > { %v3069_v60 = vadd.f32 %v3068_v27, %v2980_v62  ;;  %v3483_v14 = vpop.f32.mrf.mxu0 }
 0x45a   : > { %v3605_v29 = vadd.f32 %v3568_v23, %v3069_v60  ;;  %v3572_v57 = vpop.f32.mrf.mxu1 }
 0x45b   : > { %v3573_v24 = vadd.f32 %v3572_v57, %v3483_v14 }
 0x45c   : > { %v3872_v42 = vadd.f32 %v3871_v5, %v3605_v29  ;;  %v3911_v16 = vmul.f32 %v3605_v29, %v3605_v29 }
 0x45e   : > { %v3942_v3 = vadd.f32 %v3941_v43, %v3911_v16 }
 0x45f   : > { %v3070_v34 = vpop.f32.mrf.mxu2 }
 0x460   : > { %v3071_v7 = vadd.f32 %v3070_v34, %v2982_v44  ;;  %v3485_v48 = vpop.f32.mrf.mxu0 }
 0x462   : > { %v3606_v36 = vadd.f32 %v3570_v2, %v3071_v7  ;;  %v3574_v55 = vpop.f32.mrf.mxu1 }
 0x463   : > { %v3575_v56 = vadd.f32 %v3574_v55, %v3485_v48 }
 0x464   : > { %v5744_v31 = vpack.c.bf16 %v3606_v36, %v3605_v29  ;;  %v3873_v33 = vadd.f32 %v3872_v42, %v3606_v36  ;;  %v3912_v1 = vmul.f32 %v3606_v36, %v3606_v36 }
 0x466   : > { %5779 = vst [vmem:[%s7451_s9 + $0x70] sm:$0xff] %v5744_v31   ;;  %v3943_v59 = vadd.f32 %v3942_v3, %v3912_v1 }
 0x467   : > { %v3073_v52 = vpop.f32.mrf.mxu2 }
 0x468   : > { %v3074_v10 = vadd.f32 %v3073_v52, %v2985_v6 }
 0x46a   : > { %v3607_v46 = vadd.f32 %v3573_v24, %v3074_v10 }
 0x46c   : > { %v3874_v30 = vadd.f32 %v3873_v33, %v3607_v46  ;;  %v3913_v28 = vmul.f32 %v3607_v46, %v3607_v46 }
 0x46e   : > { %v3944_v54 = vadd.f32 %v3943_v59, %v3913_v28 }
 0x46f   : > { %v3075_v39 = vpop.f32.mrf.mxu2 }
 0x470   : > { %v3076_v41 = vadd.f32 %v3075_v39, %v2987_v15 }
 0x472   : > { %v3608_v35 = vadd.f32 %v3575_v56, %v3076_v41 }
 0x474   : > { %v5749_v51 = vpack.c.bf16 %v3608_v35, %v3607_v46  ;;  %v3875_v11 = vadd.f32 %v3874_v30, %v3608_v35  ;;  %v3914_v45 = vmul.f32 %v3608_v35, %v3608_v35 }
 0x476   : > { %5780 = vst [vmem:[%s7451_s9 + $0x78] sm:$0xff] %v5749_v51   ;;  %v3876_v40 = vrot.slane %v3875_v11, 4  ;;  %v3945_v12 = vadd.f32 %v3944_v54, %v3914_v45 }
 0x478   : > { %v3877_v38 = vadd.f32 %v3876_v40, %v3875_v11  ;;  %v3946_v47 = vrot.slane %v3945_v12, 4 }
 0x47a   : > { %v3878_v21 = vrot.slane %v3877_v38, 2  ;;  %v3947_v58 = vadd.f32 %v3946_v47, %v3945_v12 }
 0x47c   : > { %v3879_v49 = vadd.f32 %v3878_v21, %v3877_v38  ;;  %v3948_v18 = vrot.slane %v3947_v58, 2 }
 0x47e   : > { %v3880_v13 = vrot.slane %v3879_v49, 1  ;;  %v3949_v37 = vadd.f32 %v3948_v18, %v3947_v58 }
 0x480   : > { %v3881_v50 = vadd.f32 %v3880_v13, %v3879_v49  ;;  %v3950_v53 = vrot.slane %v3949_v37, 1 }
 0x482   : > { %3882 = vst [vmem:[%s7441_s29 + $0x2] sm:$0x1] %v3881_v50  ;;  %v3951_v63 = vadd.f32 %v3950_v53, %v3949_v37 }
 0x484   : > { %3952 = vst [vmem:[%s7441_s29 + $0x3] sm:$0x1] %v3951_v63 }
 0x485 PF: > { %s17_s21 = sadd.s32 1, %s5815_s21  }
 0x486   : > { %p14_p4 = scmp.ge.s32.totalorder %s17_s21, 4  }
 0x488   :  { %16 = sbr.rel (!%p14_p4) target bundleno = 1 (0x1), region = 97 }

</bundles_post_ra>
